<compile_context>
chip_gen: v7x
topology: tpu7x:2x2x1
jax: 0.10.0
libtpu: 0.0.40
codegen_flags: <defaults>
</compile_context>

<pallas_src>
import functools

import jax
import jax.numpy as jnp
from jax.experimental import pallas as pl
from jax.experimental.pallas import tpu as pltpu


def _round_up(n, m):
    return ((n + m - 1) // m) * m


def _default_bf16_act():
    """bf16 tanh only where the VPU/EUP have a bf16 path (v6e / v7x); f32 on v5e."""
    try:
        kind = jax.devices()[0].device_kind.lower()
    except Exception:
        return False
    return any(tag in kind for tag in ("v6", "v7", "7x"))


def pinn_kernel(xt_ref,
                w1_ref, b1_ref,
                w2_ref, b2_ref,
                w3_ref, b3_ref,
                w4_ref, b4_ref,
                w5_ref, b5_ref,
                o_ref,
                *, act_dtype):
    xt = xt_ref[...]                          # (tm, 2) f32
    x = xt[:, 0:1]                            # (tm, 1)
    t = xt[:, 1:2]                            # (tm, 1)
    w1 = w1_ref[...]                          # (2, 128) f32

    def act(z):
        # tanh on the EUP; bf16 on v6e/v7x halves EUP occupancy, f32 on v5e.
        return jnp.tanh(z.astype(act_dtype))

    # Layer 1: cat([x, t], 1) @ W1 + b1 == x*W1[0,:] + t*W1[1,:] + b1  (VPU, f32 math).
    h = act(x * w1[0:1, :] + t * w1[1:2, :] + b1_ref[...])                      # (tm, 128)

    # Layers 2-4: bf16 MXU operands, f32 accumulation, f32 bias add.
    h = act(jnp.dot(h.astype(jnp.bfloat16), w2_ref[...],
                    preferred_element_type=jnp.float32) + b2_ref[...])          # (tm, 256)
    h = act(jnp.dot(h.astype(jnp.bfloat16), w3_ref[...],
                    preferred_element_type=jnp.float32) + b3_ref[...])          # (tm, 256)
    h = act(jnp.dot(h.astype(jnp.bfloat16), w4_ref[...],
                    preferred_element_type=jnp.float32) + b4_ref[...])          # (tm, 128)

    # Layer 5: 128 -> 1 (no activation) as a VPU multiply + lane reduction (f32),
    # then a small (tm,1)->(1,tm) transpose (XLU) so the store is lane-dense.
    out_col = (jnp.sum(h.astype(jnp.float32) * w5_ref[...], axis=-1, keepdims=True)
               + b5_ref[...])                                                   # (tm, 1)
    o_ref[...] = jnp.transpose(out_col)                                         # (1, tm)


def pinn_forward(x, t, params, *, tm=1024, min_grid_steps=2, bf16_act=None):
    """x, t: (N, 1) f32.  Returns (N, 1) f32."""
    N = x.shape[0]
    (w1, b1), (w2, b2), (w3, b3), (w4, b4), (w5, b5) = params

    if bf16_act is None:
        bf16_act = _default_bf16_act()
    act_dtype = jnp.bfloat16 if bf16_act else jnp.float32

    # bf16 weights for the MXU layers (halves their DMA volume too); f32 elsewhere.
    w2b = w2.astype(jnp.bfloat16)
    w3b = w3.astype(jnp.bfloat16)
    w4b = w4.astype(jnp.bfloat16)
    w5_row = w5.reshape(1, w5.shape[0])       # (1, 128), consumed by the VPU reduce

    # Pack the two (N,1) inputs into one (N,2) tile stream (single DMA per step).
    xt = jnp.concatenate([x.astype(jnp.float32), t.astype(jnp.float32)], axis=1)

    # Batch tile: multiple of 128 (lane-dense output block stays unmasked), capped
    # so large batches still produce >= min_grid_steps parallel grid steps.
    n128 = _round_up(N, 128)
    if n128 >= 2 * 256:
        cap = max(256, _round_up(n128 // min_grid_steps, 128))
    else:
        cap = n128
    tm_eff = max(128, _round_up(min(tm, n128, cap), 128))
    Np = _round_up(N, tm_eff)
    if Np != N:
        xt = jnp.pad(xt, ((0, Np - N), (0, 0)))

    rep_spec = lambda a: pl.BlockSpec(a.shape, lambda i: (0, 0))   # grid-invariant

    grid_spec = pltpu.PrefetchScalarGridSpec(
        num_scalar_prefetch=0,
        grid=(Np // tm_eff,),
        in_specs=[
            pl.BlockSpec((tm_eff, 2), lambda i: (i, 0)),
            rep_spec(w1), rep_spec(b1),
            rep_spec(w2b), rep_spec(b2),
            rep_spec(w3b), rep_spec(b3),
            rep_spec(w4b), rep_spec(b4),
            rep_spec(w5_row), rep_spec(b5),
        ],
        out_specs=pl.BlockSpec((1, tm_eff), lambda i: (0, i)),      # lane-dense rows
    )

    out_row = pl.pallas_call(
        functools.partial(pinn_kernel, act_dtype=act_dtype),
        out_shape=jax.ShapeDtypeStruct((1, Np), jnp.float32),
        grid_spec=grid_spec,
        compiler_params=pltpu.CompilerParams(
            dimension_semantics=("parallel",)),
    )(xt, w1, b1, w2b, b2, w3b, b3, w4b, b4, w5_row, b5)

    return out_row.reshape(Np, 1)[:N]


def init_params(key):
    """Deterministic init mimicking nn.Linear default (U(-1/sqrt(fan_in), +))."""
    dims = [(2, 128), (128, 256), (256, 256), (256, 128), (128, 1)]
    params = []
    for i, (fan_in, fan_out) in enumerate(dims):
        kw, kb = jax.random.split(jax.random.fold_in(key, i))
        bound = 1.0 / jnp.sqrt(jnp.float32(fan_in))
        w = jax.random.uniform(kw, (fan_in, fan_out), jnp.float32, -bound, bound)
        b = jax.random.uniform(kb, (1, fan_out), jnp.float32, -bound, bound)
        params.append((w, b))
    return params


def pinn_reference(x, t, params):
    """Pure-f32 reference matching the PyTorch module."""
    h = jnp.concatenate([x, t], axis=1)
    for i, (w, b) in enumerate(params):
        h = h @ w + b
        if i < len(params) - 1:
            h = jnp.tanh(h)
    return h


if __name__ == "__main__":
    key = jax.random.PRNGKey(0)
    k_x, k_t, k_p = jax.random.split(key, 3)
    params = init_params(k_p)

    # Primary check: N=1024 -> tm_eff=512, 2 parallel grid steps.
    N = 1024
    x = jax.random.uniform(k_x, (N, 1), jnp.float32)
    t = jax.random.uniform(k_t, (N, 1), jnp.float32)
    out = jax.block_until_ready(pinn_forward(x, t, params))
    ref = pinn_reference(x, t, params)
    assert out.shape == (N, 1) and out.dtype == jnp.float32
    # Tolerance covers bf16 MXU operands (+ bf16 tanh on v6e/v7x) vs pure-f32 ref.
    assert jnp.allclose(out, ref, atol=5e-2, rtol=5e-2), "mismatch vs reference (N=1024)"

    # Ragged-batch check: exercises padding + lane-dense output reshape/slice.
    N2 = 777
    out2 = jax.block_until_ready(pinn_forward(x[:N2], t[:N2], params))
    ref2 = pinn_reference(x[:N2], t[:N2], params)
    assert out2.shape == (N2, 1)
    assert jnp.allclose(out2, ref2, atol=5e-2, rtol=5e-2), "mismatch vs reference (N=777)"

    print("KERNEL_OK")
</pallas_src>

<mosaic_0001>
module attributes {stable_mosaic.version = 11 : i64} {
  func.func @pinn_kernel(%arg0: i32, %arg1: memref<512x2xf32, #tpu.memory_space<vmem>>, %arg2: memref<2x128xf32, #tpu.memory_space<vmem>>, %arg3: memref<1x128xf32, #tpu.memory_space<vmem>>, %arg4: memref<128x256xbf16, #tpu.memory_space<vmem>>, %arg5: memref<1x256xf32, #tpu.memory_space<vmem>>, %arg6: memref<256x256xbf16, #tpu.memory_space<vmem>>, %arg7: memref<1x256xf32, #tpu.memory_space<vmem>>, %arg8: memref<256x128xbf16, #tpu.memory_space<vmem>>, %arg9: memref<1x128xf32, #tpu.memory_space<vmem>>, %arg10: memref<1x128xf32, #tpu.memory_space<vmem>>, %arg11: memref<1x1xf32, #tpu.memory_space<vmem>>, %arg12: memref<1x512xf32, #tpu.memory_space<vmem>>) attributes {dimension_semantics = [#tpu.dimension_semantics<parallel>], iteration_bounds = array<i64: 2>, scalar_prefetch = 0 : i64, scratch_operands = 0 : i64, tpu.core_type = #tpu.core_type<tc>, window_params = [{transform_indices = @transform_0, window_bounds = array<i64: 512, 2>}, {pipeline_mode = #tpu.pipeline_mode<synchronous>, transform_indices = @transform_1, window_bounds = array<i64: 2, 128>}, {pipeline_mode = #tpu.pipeline_mode<synchronous>, transform_indices = @transform_2, window_bounds = array<i64: 1, 128>}, {pipeline_mode = #tpu.pipeline_mode<synchronous>, transform_indices = @transform_3, window_bounds = array<i64: 128, 256>}, {pipeline_mode = #tpu.pipeline_mode<synchronous>, transform_indices = @transform_4, window_bounds = array<i64: 1, 256>}, {pipeline_mode = #tpu.pipeline_mode<synchronous>, transform_indices = @transform_5, window_bounds = array<i64: 256, 256>}, {pipeline_mode = #tpu.pipeline_mode<synchronous>, transform_indices = @transform_6, window_bounds = array<i64: 1, 256>}, {pipeline_mode = #tpu.pipeline_mode<synchronous>, transform_indices = @transform_7, window_bounds = array<i64: 256, 128>}, {pipeline_mode = #tpu.pipeline_mode<synchronous>, transform_indices = @transform_8, window_bounds = array<i64: 1, 128>}, {pipeline_mode = #tpu.pipeline_mode<synchronous>, transform_indices = @transform_9, window_bounds = array<i64: 1, 128>}, {pipeline_mode = #tpu.pipeline_mode<synchronous>, transform_indices = @transform_10, window_bounds = array<i64: 1, 1>}, {transform_indices = @transform_11, window_bounds = array<i64: 1, 512>}]} {
    %c0 = arith.constant 0 : index
    %c0_0 = arith.constant 0 : index
    %0 = vector.load %arg1[%c0, %c0_0] : memref<512x2xf32, #tpu.memory_space<vmem>>, vector<512x2xf32>
    %1 = vector.extract_strided_slice %0 {offsets = [0, 0], sizes = [512, 1], strides = [1, 1]} : vector<512x2xf32> to vector<512x1xf32>
    %2 = vector.extract_strided_slice %0 {offsets = [0, 1], sizes = [512, 1], strides = [1, 1]} : vector<512x2xf32> to vector<512x1xf32>
    %c0_1 = arith.constant 0 : index
    %c0_2 = arith.constant 0 : index
    %3 = vector.load %arg2[%c0_1, %c0_2] : memref<2x128xf32, #tpu.memory_space<vmem>>, vector<2x128xf32>
    %4 = vector.extract_strided_slice %3 {offsets = [0, 0], sizes = [1, 128], strides = [1, 1]} : vector<2x128xf32> to vector<1x128xf32>
    %5 = vector.broadcast %1 : vector<512x1xf32> to vector<512x128xf32>
    %6 = vector.broadcast %4 : vector<1x128xf32> to vector<512x128xf32>
    %7 = arith.mulf %5, %6 : vector<512x128xf32>
    %8 = vector.extract_strided_slice %3 {offsets = [1, 0], sizes = [1, 128], strides = [1, 1]} : vector<2x128xf32> to vector<1x128xf32>
    %9 = vector.broadcast %2 : vector<512x1xf32> to vector<512x128xf32>
    %10 = vector.broadcast %8 : vector<1x128xf32> to vector<512x128xf32>
    %11 = arith.mulf %9, %10 : vector<512x128xf32>
    %12 = arith.addf %7, %11 : vector<512x128xf32>
    %c0_3 = arith.constant 0 : index
    %c0_4 = arith.constant 0 : index
    %13 = vector.load %arg3[%c0_3, %c0_4] : memref<1x128xf32, #tpu.memory_space<vmem>>, vector<1x128xf32>
    %14 = vector.broadcast %13 : vector<1x128xf32> to vector<512x128xf32>
    %15 = arith.addf %12, %14 : vector<512x128xf32>
    %16 = math.tanh %15 : vector<512x128xf32>
    %17 = arith.truncf %16 : vector<512x128xf32> to vector<512x128xbf16>
    %c0_5 = arith.constant 0 : index
    %c0_6 = arith.constant 0 : index
    %18 = vector.load %arg4[%c0_5, %c0_6] : memref<128x256xbf16, #tpu.memory_space<vmem>>, vector<128x256xbf16>
    %cst = arith.constant dense<0.000000e+00> : vector<512x256xf32>
    %19 = tpu.matmul %17, %18, %cst {dimension_numbers = #tpu.dot_dimension_numbers<[1], [0], [0], [1], [0, 0, 1, 1], [], []>} : vector<512x128xbf16>, vector<128x256xbf16>, vector<512x256xf32> -> vector<512x256xf32>
    %c0_7 = arith.constant 0 : index
    %c0_8 = arith.constant 0 : index
    %20 = vector.load %arg5[%c0_7, %c0_8] : memref<1x256xf32, #tpu.memory_space<vmem>>, vector<1x256xf32>
    %21 = vector.broadcast %20 : vector<1x256xf32> to vector<512x256xf32>
    %22 = arith.addf %19, %21 : vector<512x256xf32>
    %23 = math.tanh %22 : vector<512x256xf32>
    %24 = arith.truncf %23 : vector<512x256xf32> to vector<512x256xbf16>
    %c0_9 = arith.constant 0 : index
    %c0_10 = arith.constant 0 : index
    %25 = vector.load %arg6[%c0_9, %c0_10] : memref<256x256xbf16, #tpu.memory_space<vmem>>, vector<256x256xbf16>
    %cst_11 = arith.constant dense<0.000000e+00> : vector<512x256xf32>
    %26 = tpu.matmul %24, %25, %cst_11 {dimension_numbers = #tpu.dot_dimension_numbers<[1], [0], [0], [1], [0, 0, 1, 1], [], []>} : vector<512x256xbf16>, vector<256x256xbf16>, vector<512x256xf32> -> vector<512x256xf32>
    %c0_12 = arith.constant 0 : index
    %c0_13 = arith.constant 0 : index
    %27 = vector.load %arg7[%c0_12, %c0_13] : memref<1x256xf32, #tpu.memory_space<vmem>>, vector<1x256xf32>
    %28 = vector.broadcast %27 : vector<1x256xf32> to vector<512x256xf32>
    %29 = arith.addf %26, %28 : vector<512x256xf32>
    %30 = math.tanh %29 : vector<512x256xf32>
    %31 = arith.truncf %30 : vector<512x256xf32> to vector<512x256xbf16>
    %c0_14 = arith.constant 0 : index
    %c0_15 = arith.constant 0 : index
    %32 = vector.load %arg8[%c0_14, %c0_15] : memref<256x128xbf16, #tpu.memory_space<vmem>>, vector<256x128xbf16>
    %cst_16 = arith.constant dense<0.000000e+00> : vector<512x128xf32>
    %33 = tpu.matmul %31, %32, %cst_16 {dimension_numbers = #tpu.dot_dimension_numbers<[1], [0], [0], [1], [0, 0, 1, 1], [], []>} : vector<512x256xbf16>, vector<256x128xbf16>, vector<512x128xf32> -> vector<512x128xf32>
    %c0_17 = arith.constant 0 : index
    %c0_18 = arith.constant 0 : index
    %34 = vector.load %arg9[%c0_17, %c0_18] : memref<1x128xf32, #tpu.memory_space<vmem>>, vector<1x128xf32>
    %35 = vector.broadcast %34 : vector<1x128xf32> to vector<512x128xf32>
    %36 = arith.addf %33, %35 : vector<512x128xf32>
    %37 = math.tanh %36 : vector<512x128xf32>
    %c0_19 = arith.constant 0 : index
    %c0_20 = arith.constant 0 : index
    %38 = vector.load %arg10[%c0_19, %c0_20] : memref<1x128xf32, #tpu.memory_space<vmem>>, vector<1x128xf32>
    %39 = vector.broadcast %38 : vector<1x128xf32> to vector<512x128xf32>
    %40 = arith.mulf %37, %39 : vector<512x128xf32>
    %cst_21 = arith.constant dense<0.000000e+00> : vector<512xf32>
    %41 = vector.multi_reduction <add>, %40, %cst_21 [1] : vector<512x128xf32> to vector<512xf32>
    %42 = vector.shape_cast %41 : vector<512xf32> to vector<512x1xf32>
    %c0_22 = arith.constant 0 : index
    %c0_23 = arith.constant 0 : index
    %43 = vector.load %arg11[%c0_22, %c0_23] : memref<1x1xf32, #tpu.memory_space<vmem>>, vector<1x1xf32>
    %44 = vector.broadcast %43 : vector<1x1xf32> to vector<512x1xf32>
    %45 = arith.addf %42, %44 : vector<512x1xf32>
    %46 = tpu.transpose %45, [1, 0] : vector<512x1xf32> -> vector<1x512xf32>
    %c0_24 = arith.constant 0 : index
    %c0_25 = arith.constant 0 : index
    %47 = vector.load %arg12[%c0_24, %c0_25] : memref<1x512xf32, #tpu.memory_space<vmem>>, vector<1x512xf32>
    tpu.vector_store %arg12[%c0_24, %c0_25], %46 {strides = array<i32>} : memref<1x512xf32, #tpu.memory_space<vmem>>, vector<1x512xf32>,
    return
  }
  func.func @transform_0(%arg0: i32) -> (i32, i32) {
    %c0_i32 = arith.constant 0 : i32
    %c0_i32_0 = arith.constant 0 : i32
    return %arg0, %c0_i32 : i32, i32
  }
  func.func @transform_1(%arg0: i32) -> (i32, i32) {
    %c0_i32 = arith.constant 0 : i32
    %c0_i32_0 = arith.constant 0 : i32
    %c0_i32_1 = arith.constant 0 : i32
    return %c0_i32, %c0_i32_0 : i32, i32
  }
  func.func @transform_2(%arg0: i32) -> (i32, i32) {
    %c0_i32 = arith.constant 0 : i32
    %c0_i32_0 = arith.constant 0 : i32
    %c0_i32_1 = arith.constant 0 : i32
    return %c0_i32, %c0_i32_0 : i32, i32
  }
  func.func @transform_3(%arg0: i32) -> (i32, i32) {
    %c0_i32 = arith.constant 0 : i32
    %c0_i32_0 = arith.constant 0 : i32
    %c0_i32_1 = arith.constant 0 : i32
    return %c0_i32, %c0_i32_0 : i32, i32
  }
  func.func @transform_4(%arg0: i32) -> (i32, i32) {
    %c0_i32 = arith.constant 0 : i32
    %c0_i32_0 = arith.constant 0 : i32
    %c0_i32_1 = arith.constant 0 : i32
    return %c0_i32, %c0_i32_0 : i32, i32
  }
  func.func @transform_5(%arg0: i32) -> (i32, i32) {
    %c0_i32 = arith.constant 0 : i32
    %c0_i32_0 = arith.constant 0 : i32
    %c0_i32_1 = arith.constant 0 : i32
    return %c0_i32, %c0_i32_0 : i32, i32
  }
  func.func @transform_6(%arg0: i32) -> (i32, i32) {
    %c0_i32 = arith.constant 0 : i32
    %c0_i32_0 = arith.constant 0 : i32
    %c0_i32_1 = arith.constant 0 : i32
    return %c0_i32, %c0_i32_0 : i32, i32
  }
  func.func @transform_7(%arg0: i32) -> (i32, i32) {
    %c0_i32 = arith.constant 0 : i32
    %c0_i32_0 = arith.constant 0 : i32
    %c0_i32_1 = arith.constant 0 : i32
    return %c0_i32, %c0_i32_0 : i32, i32
  }
  func.func @transform_8(%arg0: i32) -> (i32, i32) {
    %c0_i32 = arith.constant 0 : i32
    %c0_i32_0 = arith.constant 0 : i32
    %c0_i32_1 = arith.constant 0 : i32
    return %c0_i32, %c0_i32_0 : i32, i32
  }
  func.func @transform_9(%arg0: i32) -> (i32, i32) {
    %c0_i32 = arith.constant 0 : i32
    %c0_i32_0 = arith.constant 0 : i32
    %c0_i32_1 = arith.constant 0 : i32
    return %c0_i32, %c0_i32_0 : i32, i32
  }
  func.func @transform_10(%arg0: i32) -> (i32, i32) {
    %c0_i32 = arith.constant 0 : i32
    %c0_i32_0 = arith.constant 0 : i32
    %c0_i32_1 = arith.constant 0 : i32
    return %c0_i32, %c0_i32_0 : i32, i32
  }
  func.func @transform_11(%arg0: i32) -> (i32, i32) {
    %c0_i32 = arith.constant 0 : i32
    %c0_i32_0 = arith.constant 0 : i32
    return %c0_i32, %arg0 : i32, i32
  }
}

</mosaic_0001>

<bundles_post_ra>
// kernel: tpu_custom_call.1
= control target key start
LH: loop header
LB: loop body
LE: loop exit
PB: predicated region body
PF: predicated region fallthrough
CT: control target
= control target key end

     0   :  { %s6850_s0 = inlined_call_operand.vmem [shape: f32[1024,2], index: 0, kind: input, shape index: {}]   ;;  %s6851_s1 = inlined_call_operand.vmem [shape: f32[2,128], index: 1, kind: input, shape index: {}]   ;;  %s6852_s2 = inlined_call_operand.vmem [shape: f32[1,128], index: 2, kind: input, shape index: {}]   ;;  %s6853_s3 = inlined_call_operand.vmem [shape: bf16[128,256], index: 3, kind: input, shape index: {}]   ;;  %s6854_s4 = inlined_call_operand.vmem [shape: f32[1,256], index: 4, kind: input, shape index: {}]   ;;  %s6855_s5 = inlined_call_operand.vmem [shape: bf16[256,256], index: 5, kind: input, shape index: {}]   ;;  %s6856_s6 = inlined_call_operand.vmem [shape: f32[1,256], index: 6, kind: input, shape index: {}]   ;;  %s6857_s7 = inlined_call_operand.vmem [shape: bf16[256,128], index: 7, kind: input, shape index: {}]   ;;  %s6858_s8 = inlined_call_operand.vmem [shape: f32[1,128], index: 8, kind: input, shape index: {}]   ;;  %s6859_s9 = inlined_call_operand.vmem [shape: f32[1,128], index: 9, kind: input, shape index: {}]   ;;  %s6860_s10 = inlined_call_operand.<no memory space> [shape: f32[1,1], index: 10, kind: input, shape index: {}]   ;;  %s6861_s11 = inlined_call_operand.hbm [shape: f32[1,1024], index: 11, kind: output, shape index: {}]  }
   0x1   :  { %v16_v0 = vstv %s6860_s10 }
   0x2   :  { %17 = vst [vmem:[#allocation2] sm:$0x1] %v16_v0 }
   0x3   :  { %18 = vsyncpa [#allocation4], 0 }
   0x4   :  { %20 = vsyncpa [#allocation4 + $0x1], 0  ;;  %s5001_s19 = smov 0   ;;  %s5003_s20 = smov 0  }
   0x5   :  { %s5005_s21 = smov 0   ;;  %s5007_s22 = smov 0  }
   0x6 LB: > { %s3794_s10 = sadd.s32 4294967295, %s4932_s22   ;;  %s3795_s23 = sadd.s32 4294967294, %s4932_s22   ;;  %s4932_s22 = sphi %s5007_s22, %s6912_s22   ;;  %s4928_s21 = sphi %s5005_s21, %s6911_s21   ;;  %s4924_s20 = sphi %s5003_s20, %s6910_s20   ;;  %s4920_s19 = sphi %s5001_s19, %s6909_s19  }
   0x7   : > { %s5024_s24 = sadd.s32 1, %s4932_s22   ;;  %s269_s25 = sadd.s32 1, %s4928_s21 }
   0x8   : > { %s266_s26 = ssub.s32 %s4932_s22, %s5024_s24  ;;  %p279_p0 = scmp.ne.s32.totalorder %s4928_s21, %s4924_s20 }
   0x9   : > { %p267_p1 = scmp.eq.s32.totalorder %s266_s26, 0  ;;  %p280_p2 = scmp.eq.s32.totalorder %s3794_s10, 1 }
   0xa   : > { %p285_p3 = scmp.ne.s32.totalorder %s4924_s20, %s4920_s19  ;;  %p286_p4 = scmp.eq.s32.totalorder %s3795_s23, 1 }
   0xb   : > { %s5034_s27 = scalar_select %p267_p1, %s4928_s21, %s269_s25  }
   0xc   : > { %p5036_p5 = por %p280_p2, %p279_p0  ;;  %p5040_p6 = por %p286_p4, %p285_p3 }
   0xd   : > { %p3798_p7 = scmp.ge.s32.totalorder %s4932_s22, 1  ;;  %p343_p8 = scmp.lt.s32.totalorder %s4932_s22, 3 }
   0xf   : > { %p344_p9 = pnand %p3798_p7, %p343_p8 }
  0x11   : > { %347 = sbr.rel (%p344_p9) target bundleno = 1648 (0x670), region = 64 }
  0x18   : > { %s5046_s30 = sshll.u32 %s3794_s10, 6  ;;  %v4934_v1 = vmov 1   ;;  %v6863_v2 = vmov 0   ;;  %v4011_v3 = vld [vmem:[%s6853_s3 + $0x4] ss:$8 sps:$4 sm:$0xff]   ;;  %v6862_v49 = vlaneseq  ;;  %s380_s16 = sand.u32 1, %s4924_s20  }
  0x19   : > { %3935 = vset.pattern.permute.xlu1 %v4934_v1  ;;  %3934 = vset.pattern.permute.xlu0 %v6863_v2  ;;  %p384_p10 = scmp.lt.s32.totalorder %s5046_s30, 127  ;;  %v4013_v4 = vld [vmem:[%s6853_s3] ss:$8 sps:$4 sm:$0xff]   ;;  %v4014_v9 = vld [vmem:[%s6853_s3 + $0x14] ss:$8 sps:$4 sm:$0xff]   ;;  %s3722_s13 = scalar_lea.sflag [#allocation4], %s380_s16 }
  0x1a   : > { %1539 = vmatprep.mubr.bf16.mxu0 %v6863_v2  ;;  %1699 = vmatprep.mubr.bf16.mxu1 %v6863_v2  ;;  %v4016_v10 = vld [vmem:[%s6853_s3 + $0x10] ss:$8 sps:$4 sm:$0xff]   ;;  %v4017_v11 = vld [vmem:[%s6853_s3 + $0x24] ss:$8 sps:$4 sm:$0xff]   ;;  %v4019_v12 = vld [vmem:[%s6853_s3 + $0x20] ss:$8 sps:$4 sm:$0xff]  }
  0x1b   : > { %s385_s12 = scalar_select %p384_p10, %s5046_s30, 127  ;;  %1507 = vmatprep.subr.bf16.mxu0 %v4011_v3  ;;  %3876 = vmatprep.subr.bf16.mxu1 %v4011_v3  ;;  %v4020_v13 = vld [vmem:[%s6853_s3 + $0x34] ss:$8 sps:$4 sm:$0xff]   ;;  %v4022_v16 = vld [vmem:[%s6853_s3 + $0x30] ss:$8 sps:$4 sm:$0xff]   ;;  %v5174_v50 = vshrl.u32 %v6862_v49, 7 }
  0x1c   : > { %1508 = vmatpush1.bf16.msra.mxu0 %v4013_v4  ;;  %3884 = vmatpush1.bf16.msra.mxu1 %v4013_v4  ;;  %v4023_v17 = vld [vmem:[%s6853_s3 + $0x44] ss:$8 sps:$4 sm:$0xff]   ;;  %v4025_v19 = vld [vmem:[%s6853_s3 + $0x40] ss:$8 sps:$4 sm:$0xff]   ;;  %v4026_v20 = vld [vmem:[%s6853_s3 + $0x54] ss:$8 sps:$4 sm:$0xff]  }
  0x1d   : > { %s3801_s17 = sshll.u32 %s385_s12, 3  ;;  %1509 = vmatprep.subr.bf16.mxu0 %v4014_v9  ;;  %3877 = vmatprep.subr.bf16.mxu1 %v4014_v9  ;;  %v4028_v21 = vld [vmem:[%s6853_s3 + $0x50] ss:$8 sps:$4 sm:$0xff]   ;;  %v4029_v22 = vld [vmem:[%s6853_s3 + $0x64] ss:$8 sps:$4 sm:$0xff]   ;;  %6872 = vst [vmem:[#allocation6_spill] sm:$0xff] %v5174_v50  ;;  %s6808_s12 = scalar_lea.hbm %s6861_s11, %s5046_s30 }
  0x1e   : > { %s5063_s23 = scalar_lea.vmem %s6850_s0, %s3801_s17  ;;  %v4031_v23 = vld [vmem:[%s6853_s3 + $0x60] ss:$8 sps:$4 sm:$0xff]   ;;  %v4032_v25 = vld [vmem:[%s6853_s3 + $0x74] ss:$8 sps:$4 sm:$0xff]   ;;  %v4034_v27 = vld [vmem:[%s6853_s3 + $0x70] ss:$8 sps:$4 sm:$0xff]  }
  0x1f   : > { %v391_v5 = vld [vmem:[%s5063_s23] sm:$0xff]  ;;  %v392_v6 = vld [vmem:[%s5063_s23 + $0x8] sm:$0xff]  ;;  %v393_v7 = vld [vmem:[%s5063_s23 + $0x10] sm:$0xff]  ;;  %v5181_v52 = vsub.s32 1, %v5174_v50  ;;  %v5184_v53 = vsub.s32 0, %v5174_v50  ;;  %s3799_s17 = sshll.u32 %s380_s16, 2 }
  0x20   : > { %845 = vperm.xlu1 %3935, %v391_v5   ;;  %458 = vperm.xlu0 %3934, %v391_v5   ;;  %v394_v8 = vld [vmem:[%s5063_s23 + $0x18] sm:$0xff]  ;;  %v396_v14 = vld [vmem:[%s5063_s23 + $0x28] sm:$0xff]  ;;  %v395_v15 = vld [vmem:[%s5063_s23 + $0x20] sm:$0xff]  ;;  %s382_s18 = scalar_lea.vmem [#allocation3], %s3799_s17  ;;  %s4937_s14 = smov [#allocation3]  }
  0x21   : > { %1510 = vmatpush1.bf16.msra.mxu0 %v4016_v10  ;;  %3885 = vmatpush1.bf16.msra.mxu1 %v4016_v10  ;;  %v397_v18 = vld [vmem:[%s5063_s23 + $0x30] sm:$0xff]  ;;  %v398_v26 = vld [vmem:[%s5063_s23 + $0x38] sm:$0xff]  ;;  %v400_v29 = vld [vmem:[%s5063_s23 + $0x48] sm:$0xff]  ;;  %6873 = vst [vmem:[#allocation7_spill] sm:$0xff] %v5181_v52  ;;  %s3736_s10 = sshll.u32 %s382_s18, 4  ;;  %s4874_s15 = sshll.u32 %s4937_s14, 4  ;;  %s6810_s10 = int_to_ptr.vmem [resolvable:$true] %s3736_s10  ;;  %s4875_s15 = int_to_ptr.vmem [resolvable:$false] %s4874_s15 }
  0x22   : > { %1511 = vmatprep.subr.bf16.mxu0 %v4017_v11  ;;  %3878 = vmatprep.subr.bf16.mxu1 %v4017_v11  ;;  %v401_v24 = vld [vmem:[%s5063_s23 + $0x50] sm:$0xff]  ;;  %v399_v30 = vld [vmem:[%s5063_s23 + $0x40] sm:$0xff]  ;;  %v404_v31 = vld [vmem:[%s5063_s23 + $0x68] sm:$0xff]  ;;  %6874 = vst [vmem:[#allocation8_spill] sm:$0xff] %v5184_v53  ;;  %s4876_s17 = scalar_lea.vmem %s4875_s15, 128  ;;  %p4877_p0 = scmp.lt.s32.totalorder %s6810_s10, %s4875_s15 }
  0x23   : > { %v405_v28 = vld [vmem:[%s5063_s23 + $0x70] sm:$0xff]  ;;  %v408_v32 = vld [vmem:[%s5063_s23 + $0x88] sm:$0xff]  ;;  %v402_v33 = vld [vmem:[%s5063_s23 + $0x58] sm:$0xff] }
  0x24   : > { %849 = vperm.xlu1 %3935, %v392_v6   ;;  %3937 = vset.pattern.permute.xlu0 %v4934_v1  ;;  %v409_v34 = vld [vmem:[%s5063_s23 + $0x90] sm:$0xff]  ;;  %v412_v35 = vld [vmem:[%s5063_s23 + $0xa8] sm:$0xff]  ;;  %v403_v36 = vld [vmem:[%s5063_s23 + $0x60] sm:$0xff] }
  0x25   : > { %853 = vperm.xlu0 %3937, %v393_v7   ;;  %1512 = vmatpush1.bf16.msra.mxu0 %v4019_v12  ;;  %v413_v37 = vld [vmem:[%s5063_s23 + $0xb0] sm:$0xff]  ;;  %v406_v38 = vld [vmem:[%s5063_s23 + $0x78] sm:$0xff]  ;;  %v423_v39 = vld [vmem:[%s5063_s23 + $0x100] sm:$0xff] }
  0x26   : > { %1513 = vmatprep.subr.bf16.mxu0 %v4020_v13  ;;  %3886 = vmatpush1.bf16.msra.mxu1 %v4019_v12  ;;  %v425_v40 = vld [vmem:[%s5063_s23 + $0x110] sm:$0xff]  ;;  %v427_v41 = vld [vmem:[%s5063_s23 + $0x120] sm:$0xff]  ;;  %v5155_v44 = vld [vmem:[%s5063_s23 + $0xc8] sm:$0xff] }
  0x27   : > { %3879 = vmatprep.subr.bf16.mxu1 %v4020_v13  ;;  %v407_v42 = vld [vmem:[%s5063_s23 + $0x80] sm:$0xff]  ;;  %v429_v43 = vld [vmem:[%s5063_s23 + $0x130] sm:$0xff]  ;;  %v410_v45 = vld [vmem:[%s5063_s23 + $0x98] sm:$0xff] }
  0x28   : > { %3936 = vset.pattern.permute.xlu1 %v6863_v2  ;;  %v5161_v46 = vld [vmem:[%s5063_s23 + $0xd8] sm:$0xff]  ;;  %v5167_v47 = vld [vmem:[%s5063_s23 + $0xe8] sm:$0xff]  ;;  %v411_v48 = vld [vmem:[%s5063_s23 + $0xa0] sm:$0xff] }
  0x29   : > { %473 = vperm.xlu1 %3936, %v394_v8   ;;  %3938 = vset.pattern.permute.xlu0 %v6863_v2  ;;  %v5177_v51 = vld [vmem:[%s5063_s23 + $0xf8] sm:$0xff]  ;;  %v455_v54 = vld [vmem:[%s6851_s1] sm:$0x3]  ;;  %v5197_v59 = vld [vmem:[%s5063_s23 + $0x148] sm:$0xff] }
  0x2a   : > { %463 = vperm.xlu0 %3938, %v392_v6   ;;  %1514 = vmatpush1.bf16.msra.mxu0 %v4022_v16  ;;  %v414_v55 = vld [vmem:[%s5063_s23 + $0xb8] sm:$0xff]  ;;  %v5191_v56 = vrot.slane %v455_v54, %v5181_v52  ;;  %v5194_v58 = vrot.slane %v455_v54, %v5184_v53  ;;  %v433_v0 = vld [vmem:[%s5063_s23 + $0x150] sm:$0xff]  ;;  %v5208_v5 = vld [vmem:[%s6852_s2] ss:$0 sm:$0xff] }
  0x2b   : > { %1515 = vmatprep.subr.bf16.mxu0 %v4023_v17  ;;  %3887 = vmatpush1.bf16.msra.mxu1 %v4022_v16 }
  0x2c   : > { %3880 = vmatprep.subr.bf16.mxu1 %v4023_v17 }
  0x2d   : > { %3939 = vset.pattern.permute.xlu1 %v4934_v1 }
  0x2e   : > { %857 = vperm.xlu1 %3939, %v394_v8   ;;  %468 = vperm.xlu0 %3938, %v393_v7   ;;  %v415_v7 = vld [vmem:[%s5063_s23 + $0xc0] sm:$0xff] }
  0x2f   : > { %1516 = vmatpush1.bf16.msra.mxu0 %v4025_v19  ;;  %3888 = vmatpush1.bf16.msra.mxu1 %v4025_v19 }
  0x30   : > { %1517 = vmatprep.subr.bf16.mxu0 %v4026_v20  ;;  %3881 = vmatprep.subr.bf16.mxu1 %v4026_v20 }
  0x32   : > { %3940 = vset.pattern.permute.xlu1 %v6863_v2  ;;  %483 = vperm.xlu0 %3938, %v396_v14  }
  0x33   : > { %478 = vperm.xlu1 %3940, %v395_v15   ;;  %1518 = vmatpush1.bf16.msra.mxu0 %v4028_v21 }
  0x34   : > { %1519 = vmatprep.subr.bf16.mxu0 %v4029_v22  ;;  %3889 = vmatpush1.bf16.msra.mxu1 %v4028_v21 }
  0x35   : > { %3882 = vmatprep.subr.bf16.mxu1 %v4029_v22 }
  0x36   : > { %488 = vperm.xlu0 %3938, %v397_v18  }
  0x37   : > { %3941 = vset.pattern.permute.xlu1 %v4934_v1  ;;  %1520 = vmatpush1.bf16.msra.mxu0 %v4031_v23 }
  0x38   : > { %861 = vperm.xlu1 %3941, %v395_v15   ;;  %1521 = vmatprep.subr.bf16.mxu0 %v4032_v25 }
  0x39   : > { %3890 = vmatpush1.bf16.msra.mxu1 %v4031_v23 }
  0x3a   : > { %3943 = vset.pattern.permute.xlu0 %v4934_v1  ;;  %3883 = vmatprep.subr.bf16.mxu1 %v4032_v25 }
  0x3b   : > { %869 = vperm.xlu0 %3943, %v397_v18   ;;  %1522 = vmatpush1.bf16.msra.mxu0 %v4034_v27 }
  0x3c   : > { %865 = vperm.xlu1 %3941, %v396_v14   ;;  %2936 = vmatprep.subr.bf16.mxu0 %v6863_v2  ;;  %v437_v14 = vld [vmem:[%s5063_s23 + $0x170] sm:$0xff] }
  0x3d   : > { %3891 = vmatpush1.bf16.msra.mxu1 %v4034_v27 }
  0x3f   : > { %885 = vperm.xlu0 %3943, %v401_v24  }
  0x40   : > { %3942 = vset.pattern.permute.xlu1 %v6863_v2 }
  0x41   : > { %493 = vperm.xlu1 %3942, %v398_v26  }
  0x43   : > { %901 = vperm.xlu0 %3943, %v405_v28  }
  0x45   : > { %3944 = vset.pattern.permute.xlu1 %v4934_v1 }
  0x46   : > { %873 = vperm.xlu1 %3944, %v398_v26  }
  0x47   : > { %3952 = vset.pattern.permute.xlu0 %v6863_v2 }
  0x48   : > { %503 = vperm.xlu0 %3952, %v400_v29  }
  0x4a   : > { %3945 = vset.pattern.permute.xlu1 %v6863_v2 }
  0x4b   : > { %498 = vperm.xlu1 %3945, %v399_v30  }
  0x4c   : > { %508 = vperm.xlu0 %3952, %v401_v24   ;;  %v5224_v24 = vld [vmem:[%s5063_s23 + $0x168] sm:$0xff] }
  0x4f   : > { %3946 = vset.pattern.permute.xlu1 %v4934_v1 }
  0x50   : > { %877 = vperm.xlu1 %3946, %v399_v30   ;;  %523 = vperm.xlu0 %3952, %v404_v31  }
  0x54   : > { %881 = vperm.xlu1 %3946, %v400_v29   ;;  %528 = vperm.xlu0 %3952, %v405_v28   ;;  %v424_v29 = vld [vmem:[%s5063_s23 + $0x108] sm:$0xff] }
  0x58   : > { %3947 = vset.pattern.permute.xlu1 %v6863_v2  ;;  %543 = vperm.xlu0 %3952, %v408_v32  }
  0x59   : > { %513 = vperm.xlu1 %3947, %v402_v33  }
  0x5c   : > { %548 = vperm.xlu0 %3952, %v409_v34  }
  0x5d   : > { %3948 = vset.pattern.permute.xlu1 %v4934_v1 }
  0x5e   : > { %889 = vperm.xlu1 %3948, %v402_v33  }
  0x60   : > { %563 = vperm.xlu0 %3952, %v412_v35  }
  0x62   : > { %3949 = vset.pattern.permute.xlu1 %v6863_v2 }
  0x63   : > { %518 = vperm.xlu1 %3949, %v403_v36  }
  0x64   : > { %568 = vperm.xlu0 %3952, %v413_v37  }
  0x67   : > { %3950 = vset.pattern.permute.xlu1 %v4934_v1 }
  0x68   : > { %893 = vperm.xlu1 %3950, %v403_v36   ;;  %3960 = vset.pattern.permute.xlu0 %v4934_v1 }
  0x69   : > { %917 = vperm.xlu0 %3960, %v409_v34  }
  0x6c   : > { %897 = vperm.xlu1 %3950, %v404_v31  }
  0x6d   : > { %933 = vperm.xlu0 %3960, %v413_v37  }
  0x70   : > { %3951 = vset.pattern.permute.xlu1 %v6863_v2 }
  0x71   : > { %533 = vperm.xlu1 %3951, %v406_v38   ;;  %973 = vperm.xlu0 %3960, %v423_v39  }
  0x75   : > { %3953 = vset.pattern.permute.xlu1 %v4934_v1  ;;  %981 = vperm.xlu0 %3960, %v425_v40  }
  0x76   : > { %905 = vperm.xlu1 %3953, %v406_v38  }
  0x79   : > { %989 = vperm.xlu0 %3960, %v427_v41  }
  0x7a   : > { %3954 = vset.pattern.permute.xlu1 %v6863_v2 }
  0x7b   : > { %538 = vperm.xlu1 %3954, %v407_v42  }
  0x7d   : > { %997 = vperm.xlu0 %3960, %v429_v43  }
  0x7f   : > { %3955 = vset.pattern.permute.xlu1 %v4934_v1 }
  0x80   : > { %909 = vperm.xlu1 %3955, %v407_v42  }
  0x81   : > { %3978 = vset.pattern.permute.xlu0 %v6863_v2 }
  0x82   : > { %583 = vperm.xlu0 %3978, %v5155_v44  }
  0x84   : > { %913 = vperm.xlu1 %3955, %v408_v32  }
  0x86   : > { %618 = vperm.xlu0 %3978, %v423_v39  }
  0x88   : > { %3956 = vset.pattern.permute.xlu1 %v6863_v2 }
  0x89   : > { %553 = vperm.xlu1 %3956, %v410_v45  }
  0x8a   : > { %593 = vperm.xlu0 %3978, %v5161_v46  }
  0x8d   : > { %3957 = vset.pattern.permute.xlu1 %v4934_v1 }
  0x8e   : > { %921 = vperm.xlu1 %3957, %v410_v45   ;;  %628 = vperm.xlu0 %3978, %v425_v40  }
  0x92   : > { %3958 = vset.pattern.permute.xlu1 %v6863_v2  ;;  %603 = vperm.xlu0 %3978, %v5167_v47  }
  0x93   : > { %558 = vperm.xlu1 %3958, %v411_v48  }
  0x96   : > { %638 = vperm.xlu0 %3978, %v427_v41  }
  0x97   : > { %3959 = vset.pattern.permute.xlu1 %v4934_v1 }
  0x98   : > { %925 = vperm.xlu1 %3959, %v411_v48  }
  0x9a   : > { %613 = vperm.xlu0 %3978, %v5177_v51  }
  0x9c   : > { %929 = vperm.xlu1 %3959, %v412_v35  }
  0x9e   : > { %648 = vperm.xlu0 %3978, %v429_v43  }
  0x9f   : > { %v846_v57 = vpop.permute.xlu1 %845  ;;  %v459_v60 = vpop.permute.xlu0 %458 }
  0xa0   : > { %3961 = vset.pattern.permute.xlu1 %v6863_v2  ;;  %v1104_v61 = vmul.f32 %v5191_v56, %v846_v57  ;;  %v780_v62 = vmul.f32 %v5194_v58, %v459_v60  ;;  %v417_v57 = vld [vmem:[%s5063_s23 + $0xd0] sm:$0xff] }
  0xa1   : > { %573 = vperm.xlu1 %3961, %v414_v55  }
  0xa2   : > { %663 = vperm.xlu0 %3978, %v5197_v59   ;;  %v1168_v4 = vadd.f32 %v1104_v61, %v780_v62 }
  0xa3   : > { %v850_v63 = vpop.permute.xlu1 %849 }
  0xa4   : > { %v854_v3 = vpop.permute.xlu0 %853  ;;  %v1105_v9 = vmul.f32 %v5191_v56, %v850_v63  ;;  %v1239_v11 = vadd.f32 %v5208_v5, %v1168_v4  ;;  %v5246_v63 = vld [vmem:[%s5063_s23 + $0x188] sm:$0xff] }
  0xa5   : > { %3962 = vset.pattern.permute.xlu1 %v4934_v1  ;;  %v1106_v12 = vmul.f32 %v5191_v56, %v854_v3 }
  0xa6   : > { %937 = vperm.xlu1 %3962, %v414_v55   ;;  %668 = vperm.xlu0 %3978, %v433_v0   ;;  %4099 = vtanh.f32 %v1239_v11 }
  0xa8   : > { %v474_v6 = vpop.permute.xlu1 %473 }
  0xa9   : > { %v464_v8 = vpop.permute.xlu0 %463  ;;  %v783_v17 = vmul.f32 %v5194_v58, %v474_v6 }
  0xaa   : > { %v781_v10 = vmul.f32 %v5194_v58, %v464_v8  ;;  %3963 = vset.pattern.permute.xlu1 %v6863_v2  ;;  %3983 = vset.pattern.permute.xlu0 %v4934_v1 }
  0xab   : > { %578 = vperm.xlu1 %3963, %v415_v7   ;;  %1013 = vperm.xlu0 %3983, %v433_v0  }
  0xac   : > { %v1169_v13 = vadd.f32 %v1105_v9, %v781_v10  ;;  %v441_v9 = vld [vmem:[%s5063_s23 + $0x190] sm:$0xff] }
  0xad   : > { %v858_v15 = vpop.permute.xlu1 %857  ;;  %v469_v16 = vpop.permute.xlu0 %468 }
  0xae   : > { %v1240_v18 = vadd.f32 %v5208_v5, %v1169_v13  ;;  %v1107_v19 = vmul.f32 %v5191_v56, %v858_v15  ;;  %v782_v20 = vmul.f32 %v5194_v58, %v469_v16  ;;  %v426_v15 = vld [vmem:[%s5063_s23 + $0x118] sm:$0xff] }
  0xaf   : > { %3964 = vset.pattern.permute.xlu1 %v4934_v1  ;;  %1029 = vperm.xlu0 %3983, %v437_v14  }
  0xb0   : > { %4101 = vtanh.f32 %v1240_v18  ;;  %v1171_v21 = vadd.f32 %v1107_v19, %v783_v17  ;;  %v1170_v22 = vadd.f32 %v1106_v12, %v782_v20  ;;  %941 = vperm.xlu1 %3964, %v415_v7   ;;  %v4100_v33 = vpop.eup %4099 }
  0xb1   : > { %v484_v23 = vpop.permute.xlu0 %483 }
  0xb2   : > { %v1242_v25 = vadd.f32 %v5208_v5, %v1171_v21  ;;  %v1241_v26 = vadd.f32 %v5208_v5, %v1170_v22  ;;  %v479_v27 = vpop.permute.xlu1 %478  ;;  %v785_v36 = vmul.f32 %v5194_v58, %v484_v23 }
  0xb3   : > { %3988 = vset.pattern.permute.xlu0 %v6863_v2  ;;  %v784_v31 = vmul.f32 %v5194_v58, %v479_v27 }
  0xb4   : > { %945 = vperm.xlu1 %3964, %v5155_v44   ;;  %683 = vperm.xlu0 %3988, %v5224_v24   ;;  %4103 = vtanh.f32 %v1242_v25 }
  0xb5   : > { %v489_v28 = vpop.permute.xlu0 %488  ;;  %4105 = vtanh.f32 %v1241_v26 }
  0xb6   : > { %v786_v43 = vmul.f32 %v5194_v58, %v489_v28 }
  0xb7   : > { %v862_v30 = vpop.permute.xlu1 %861 }
  0xb8   : > { %v1108_v32 = vmul.f32 %v5191_v56, %v862_v30  ;;  %3965 = vset.pattern.permute.xlu1 %v6863_v2  ;;  %688 = vperm.xlu0 %3988, %v437_v14  }
  0xb9   : > { %623 = vperm.xlu1 %3965, %v424_v29  }
  0xba   : > { %v4102_v34 = vpop.eup %4101  ;;  %v1172_v35 = vadd.f32 %v1108_v32, %v784_v31  ;;  %v870_v39 = vpop.permute.xlu0 %869  ;;  %v445_v32 = vld [vmem:[%s5063_s23 + $0x1b0] sm:$0xff] }
  0xbb   : > { %v866_v37 = vpop.permute.xlu1 %865  ;;  %v1367_v38 = vpack.c.bf16 %v4102_v34, %v4100_v33  ;;  %v1110_v44 = vmul.f32 %v5191_v56, %v870_v39 }
  0xbc   : > { %v1109_v40 = vmul.f32 %v5191_v56, %v866_v37  ;;  %v1243_v41 = vadd.f32 %v5208_v5, %v1172_v35  ;;  %703 = vperm.xlu0 %3988, %v5246_v63   ;;  %v419_v35 = vld [vmem:[%s5063_s23 + $0xe0] sm:$0xff]  ;;  %v5278_v37 = vld [vmem:[%s5063_s23 + $0x1a8] sm:$0xff] }
  0xbd   : > { %3966 = vset.pattern.permute.xlu1 %v4934_v1  ;;  %1540 = vmatmul.mubr.bf16.vlgmr.msra.gmra.mrb[0].mxu0 %v1367_v38  ;;  %v1174_v60 = vadd.f32 %v1110_v44, %v786_v43 }
  0xbe   : > { %v1173_v42 = vadd.f32 %v1109_v40, %v785_v36  ;;  %977 = vperm.xlu1 %3966, %v424_v29   ;;  %1549 = vmatprep.mubr.bf16.mxu0 %v6863_v2  ;;  %v4104_v45 = vpop.eup %4103  ;;  %4107 = vtanh.f32 %v1243_v41  ;;  %v886_v62 = vpop.permute.xlu0 %885 }
  0xbf   : > { %v4106_v48 = vpop.eup %4105  ;;  %v1245_v6 = vadd.f32 %v5208_v5, %v1174_v60  ;;  %v1114_v28 = vmul.f32 %v5191_v56, %v886_v62 }
  0xc0   : > { %v1244_v54 = vadd.f32 %v5208_v5, %v1173_v42  ;;  %v494_v55 = vpop.permute.xlu1 %493  ;;  %v1368_v61 = vpack.c.bf16 %v4104_v45, %v4106_v48  ;;  %708 = vperm.xlu0 %3988, %v441_v9  }
  0xc1   : > { %v787_v3 = vmul.f32 %v5194_v58, %v494_v55 }
  0xc2   : > { %4109 = vtanh.f32 %v1244_v54  ;;  %3967 = vset.pattern.permute.xlu1 %v6863_v2  ;;  %v5254_v8 = vpop.permute.xlu0 %901 }
  0xc3   : > { %588 = vperm.xlu1 %3967, %v417_v57   ;;  %4111 = vtanh.f32 %v1245_v6 }
  0xc4   : > { %3993 = vset.pattern.permute.xlu0 %v4934_v1 }
  0xc5   : > { %v874_v0 = vpop.permute.xlu1 %873  ;;  %1550 = vmatmul.mubr.bf16.gmra.mrb[4].mxu0 %v1368_v61  ;;  %1045 = vperm.xlu0 %3993, %v441_v9  }
  0xc6   : > { %v1111_v4 = vmul.f32 %v5191_v56, %v874_v0  ;;  %1559 = vmatprep.mubr.bf16.mxu0 %v6863_v2 }
  0xc7   : > { %3968 = vset.pattern.permute.xlu1 %v4934_v1  ;;  %v504_v17 = vpop.permute.xlu0 %503 }
  0xc8   : > { %v1175_v7 = vadd.f32 %v1111_v4, %v787_v3  ;;  %949 = vperm.xlu1 %3968, %v417_v57   ;;  %v4108_v12 = vpop.eup %4107  ;;  %v428_v57 = vld [vmem:[%s5063_s23 + $0x128] sm:$0xff] }
  0xc9   : > { %1061 = vperm.xlu0 %3993, %v445_v32  }
  0xca   : > { %v1246_v10 = vadd.f32 %v5208_v5, %v1175_v7  ;;  %v499_v11 = vpop.permute.xlu1 %498 }
  0xcb   : > { %v788_v18 = vmul.f32 %v5194_v58, %v499_v11  ;;  %v509_v22 = vpop.permute.xlu0 %508 }
  0xcc   : > { %v4110_v13 = vpop.eup %4109  ;;  %4113 = vtanh.f32 %v1246_v10  ;;  %953 = vperm.xlu1 %3968, %v5161_v46   ;;  %v789_v46 = vmul.f32 %v5194_v58, %v504_v17  ;;  %v790_v30 = vmul.f32 %v5194_v58, %v509_v22 }
  0xcd   : > { %v1369_v14 = vpack.c.bf16 %v4110_v13, %v4108_v12  ;;  %v4112_v23 = vpop.eup %4111  ;;  %3998 = vset.pattern.permute.xlu0 %v6863_v2  ;;  %v1118_v12 = vmul.f32 %v5191_v56, %v5254_v8 }
  0xce   : > { %v1178_v36 = vadd.f32 %v1114_v28, %v790_v30  ;;  %723 = vperm.xlu0 %3998, %v5278_v37  }
  0xcf   : > { %v878_v16 = vpop.permute.xlu1 %877  ;;  %1560 = vmatmul.mubr.bf16.gmra.mrb[8].mxu0 %v1369_v14  ;;  %v524_v48 = vpop.permute.xlu0 %523 }
  0xd0   : > { %v1112_v19 = vmul.f32 %v5191_v56, %v878_v16  ;;  %3969 = vset.pattern.permute.xlu1 %v6863_v2  ;;  %1569 = vmatprep.mubr.bf16.mxu0 %v6863_v2  ;;  %v1249_v41 = vadd.f32 %v5208_v5, %v1178_v36  ;;  %v793_v4 = vmul.f32 %v5194_v58, %v524_v48 }
  0xd1   : > { %633 = vperm.xlu1 %3969, %v426_v15  }
  0xd2   : > { %v1176_v20 = vadd.f32 %v1112_v19, %v788_v18  ;;  %728 = vperm.xlu0 %3998, %v445_v32   ;;  %v421_v19 = vld [vmem:[%s5063_s23 + $0xf0] sm:$0xff] }
  0xd3   : > { %v882_v21 = vpop.permute.xlu1 %881  ;;  %v529_v61 = vpop.permute.xlu0 %528 }
  0xd4   : > { %v1113_v25 = vmul.f32 %v5191_v56, %v882_v21  ;;  %v1247_v26 = vadd.f32 %v5208_v5, %v1176_v20  ;;  %v794_v14 = vmul.f32 %v5194_v58, %v529_v61 }
  0xd5   : > { %3970 = vset.pattern.permute.xlu1 %v4934_v1 }
  0xd6   : > { %v4114_v27 = vpop.eup %4113  ;;  %v1177_v29 = vadd.f32 %v1113_v25, %v789_v46  ;;  %985 = vperm.xlu1 %3970, %v426_v15   ;;  %4115 = vtanh.f32 %v1247_v26  ;;  %v5300_v15 = vld [vmem:[%s5063_s23 + $0x1c8] sm:$0xff]  ;;  %v1182_v8 = vadd.f32 %v1118_v12, %v794_v14  ;;  %v449_v46 = vld [vmem:[%s5063_s23 + $0x1d0] sm:$0xff] }
  0xd7   : > { %v1370_v31 = vpack.c.bf16 %v4114_v27, %v4112_v23  ;;  %743 = vperm.xlu0 %3998, %v5300_v15  }
  0xd8   : > { %v1248_v33 = vadd.f32 %v5208_v5, %v1177_v29  ;;  %v514_v34 = vpop.permute.xlu1 %513  ;;  %v1253_v25 = vadd.f32 %v5208_v5, %v1182_v8 }
  0xd9   : > { %1570 = vmatmul.mubr.bf16.gmra.mrb[12].mxu0 %v1370_v31  ;;  %v791_v39 = vmul.f32 %v5194_v58, %v514_v34  ;;  %v5321_v34 = vld [vmem:[%s5063_s23 + $0x1e8] sm:$0xff] }
  0xda   : > { %4117 = vtanh.f32 %v1248_v33  ;;  %3971 = vset.pattern.permute.xlu1 %v6863_v2  ;;  %1579 = vmatprep.mubr.bf16.mxu0 %v6863_v2 }
  0xdb   : > { %598 = vperm.xlu1 %3971, %v419_v35   ;;  %4119 = vtanh.f32 %v1249_v41  ;;  %4003 = vset.pattern.permute.xlu0 %v4934_v1 }
  0xdc   : > { %1077 = vperm.xlu0 %4003, %v449_v46  }
  0xdd   : > { %v890_v38 = vpop.permute.xlu1 %889 }
  0xde   : > { %v1115_v40 = vmul.f32 %v5191_v56, %v890_v38 }
  0xdf   : > { %3972 = vset.pattern.permute.xlu1 %v4934_v1 }
  0xe0   : > { %v1179_v42 = vadd.f32 %v1115_v40, %v791_v39  ;;  %957 = vperm.xlu1 %3972, %v419_v35   ;;  %v4116_v45 = vpop.eup %4115  ;;  %4004 = vset.pattern.permute.xlu0 %v6863_v2  ;;  %v430_v35 = vld [vmem:[%s5063_s23 + $0x138] sm:$0xff] }
  0xe1   : > { %748 = vperm.xlu0 %4004, %v449_v46  }
  0xe2   : > { %v1250_v43 = vadd.f32 %v5208_v5, %v1179_v42  ;;  %v519_v44 = vpop.permute.xlu1 %518 }
  0xe3   : > { %v792_v62 = vmul.f32 %v5194_v58, %v519_v44 }
  0xe4   : > { %v4118_v54 = vpop.eup %4117  ;;  %4121 = vtanh.f32 %v1250_v43  ;;  %961 = vperm.xlu1 %3972, %v5167_v47   ;;  %v544_v47 = vpop.permute.xlu0 %543 }
  0xe5   : > { %v1371_v55 = vpack.c.bf16 %v4118_v54, %v4116_v45  ;;  %v4120_v7 = vpop.eup %4119  ;;  %763 = vperm.xlu0 %4004, %v5321_v34   ;;  %v797_v40 = vmul.f32 %v5194_v58, %v544_v47 }
  0xe7   : > { %v894_v60 = vpop.permute.xlu1 %893  ;;  %1580 = vmatmul.mubr.bf16.gmra.mrb[16].mxu0 %v1371_v55 }
  0xe8   : > { %v1116_v0 = vmul.f32 %v5191_v56, %v894_v60  ;;  %3973 = vset.pattern.permute.xlu1 %v6863_v2  ;;  %1589 = vmatprep.mubr.bf16.mxu0 %v6863_v2  ;;  %v549_v20 = vpop.permute.xlu0 %548 }
  0xe9   : > { %643 = vperm.xlu1 %3973, %v428_v57   ;;  %v798_v55 = vmul.f32 %v5194_v58, %v549_v20 }
  0xea   : > { %v1180_v3 = vadd.f32 %v1116_v0, %v792_v62 }
  0xeb   : > { %v898_v6 = vpop.permute.xlu1 %897 }
  0xec   : > { %v1117_v9 = vmul.f32 %v5191_v56, %v898_v6  ;;  %v1251_v10 = vadd.f32 %v5208_v5, %v1180_v3  ;;  %v5313_v26 = vpop.permute.xlu0 %563  ;;  %v431_v3 = vld [vmem:[%s5063_s23 + $0x140] sm:$0xff] }
  0xed   : > { %3974 = vset.pattern.permute.xlu1 %v4934_v1 }
  0xee   : > { %v4122_v11 = vpop.eup %4121  ;;  %v1181_v13 = vadd.f32 %v1117_v9, %v793_v4  ;;  %993 = vperm.xlu1 %3974, %v428_v57   ;;  %4123 = vtanh.f32 %v1251_v10 }
  0xef   : > { %v1372_v16 = vpack.c.bf16 %v4122_v11, %v4120_v7 }
  0xf0   : > { %v1252_v17 = vadd.f32 %v5208_v5, %v1181_v13  ;;  %v534_v18 = vpop.permute.xlu1 %533  ;;  %v5318_v33 = vpop.permute.xlu0 %568 }
  0xf1   : > { %1590 = vmatmul.mubr.bf16.gmra.mrb[20].mxu0 %v1372_v16  ;;  %v795_v22 = vmul.f32 %v5194_v58, %v534_v18  ;;  %v434_v18 = vld [vmem:[%s5063_s23 + $0x158] sm:$0xff] }
  0xf2   : > { %4125 = vtanh.f32 %v1252_v17  ;;  %3975 = vset.pattern.permute.xlu1 %v6863_v2  ;;  %1599 = vmatprep.mubr.bf16.mxu0 %v6863_v2 }
  0xf3   : > { %608 = vperm.xlu1 %3975, %v421_v19   ;;  %4127 = vtanh.f32 %v1253_v25 }
  0xf4   : > { %v918_v43 = vpop.permute.xlu0 %917 }
  0xf5   : > { %v906_v21 = vpop.permute.xlu1 %905  ;;  %v1122_v60 = vmul.f32 %v5191_v56, %v918_v43 }
  0xf6   : > { %v1119_v23 = vmul.f32 %v5191_v56, %v906_v21  ;;  %v801_v21 = vmul.f32 %v5194_v58, %v5313_v26 }
  0xf7   : > { %3976 = vset.pattern.permute.xlu1 %v4934_v1  ;;  %v1186_v4 = vadd.f32 %v1122_v60, %v798_v55  ;;  %v438_v60 = vld [vmem:[%s5063_s23 + $0x178] sm:$0xff] }
  0xf8   : > { %v1183_v27 = vadd.f32 %v1119_v23, %v795_v22  ;;  %965 = vperm.xlu1 %3976, %v421_v19   ;;  %v4124_v30 = vpop.eup %4123  ;;  %v934_v11 = vpop.permute.xlu0 %933 }
  0xf9   : > { %v1257_v9 = vadd.f32 %v5208_v5, %v1186_v4  ;;  %v1126_v26 = vmul.f32 %v5191_v56, %v934_v11 }
  0xfa   : > { %v1254_v28 = vadd.f32 %v5208_v5, %v1183_v27  ;;  %v539_v29 = vpop.permute.xlu1 %538 }
  0xfb   : > { %v796_v38 = vmul.f32 %v5194_v58, %v539_v29 }
  0xfc   : > { %v4126_v31 = vpop.eup %4125  ;;  %4129 = vtanh.f32 %v1254_v28  ;;  %969 = vperm.xlu1 %3976, %v5177_v51   ;;  %v453_v51 = vld [vmem:[%s5063_s23 + $0x1f0] sm:$0xff]  ;;  %v5348_v20 = vpop.permute.xlu0 %973 }
  0xfd   : > { %v1373_v32 = vpack.c.bf16 %v4126_v31, %v4124_v30  ;;  %768 = vperm.xlu0 %4004, %v453_v51   ;;  %v4128_v44 = vpop.eup %4127  ;;  %v802_v30 = vmul.f32 %v5194_v58, %v5318_v33 }
  0xff   : > { %v910_v36 = vpop.permute.xlu1 %909  ;;  %1600 = vmatmul.mubr.bf16.gmra.mrb[24].mxu0 %v1373_v32 }
 0x100   : > { %v1120_v39 = vmul.f32 %v5191_v56, %v910_v36  ;;  %3977 = vset.pattern.permute.xlu1 %v6863_v2  ;;  %1609 = vmatprep.mubr.bf16.mxu0 %v6863_v2  ;;  %v5359_v28 = vpop.permute.xlu0 %981 }
 0x101   : > { %653 = vperm.xlu1 %3977, %v430_v35   ;;  %4009 = vset.pattern.permute.xlu0 %v4934_v1 }
 0x102   : > { %v1184_v41 = vadd.f32 %v1120_v39, %v796_v38  ;;  %1093 = vperm.xlu0 %4009, %v453_v51   ;;  %v435_v38 = vld [vmem:[%s5063_s23 + $0x160] sm:$0xff]  ;;  %v1190_v39 = vadd.f32 %v1126_v26, %v802_v30  ;;  %v442_v26 = vld [vmem:[%s5063_s23 + $0x198] sm:$0xff] }
 0x103   : > { %v914_v42 = vpop.permute.xlu1 %913 }
 0x104   : > { %v1121_v45 = vmul.f32 %v5191_v56, %v914_v42  ;;  %v1255_v48 = vadd.f32 %v5208_v5, %v1184_v41  ;;  %v5368_v51 = vpop.permute.xlu0 %989 }
 0x105   : > { %3979 = vset.pattern.permute.xlu1 %v4934_v1 }
 0x106   : > { %v4130_v54 = vpop.eup %4129  ;;  %v1185_v57 = vadd.f32 %v1121_v45, %v797_v40  ;;  %1001 = vperm.xlu1 %3979, %v430_v35   ;;  %4131 = vtanh.f32 %v1255_v48  ;;  %v1261_v40 = vadd.f32 %v5208_v5, %v1190_v39 }
 0x107   : > { %v1374_v61 = vpack.c.bf16 %v4130_v54, %v4128_v44 }
 0x108   : > { %v1256_v62 = vadd.f32 %v5208_v5, %v1185_v57  ;;  %v554_v0 = vpop.permute.xlu1 %553  ;;  %v5374_v44 = vpop.permute.xlu0 %997 }
 0x109   : > { %1610 = vmatmul.mubr.bf16.gmra.mrb[28].mxu0 %v1374_v61  ;;  %v799_v47 = vmul.f32 %v5194_v58, %v554_v0 }
 0x10a   : > { %4133 = vtanh.f32 %v1256_v62  ;;  %3980 = vset.pattern.permute.xlu1 %v6863_v2  ;;  %1619 = vmatprep.mubr.bf16.mxu0 %v6863_v2 }
 0x10b   : > { %658 = vperm.xlu1 %3980, %v431_v3   ;;  %4135 = vtanh.f32 %v1257_v9 }
 0x10c   : > { %v584_v62 = vpop.permute.xlu0 %583 }
 0x10d   : > { %v922_v6 = vpop.permute.xlu1 %921 }
 0x10e   : > { %v1123_v7 = vmul.f32 %v5191_v56, %v922_v6  ;;  %v805_v6 = vmul.f32 %v5194_v58, %v584_v62 }
 0x10f   : > { %3981 = vset.pattern.permute.xlu1 %v4934_v1 }
 0x110   : > { %v1187_v10 = vadd.f32 %v1123_v7, %v799_v47  ;;  %1005 = vperm.xlu1 %3981, %v431_v3   ;;  %v4132_v14 = vpop.eup %4131  ;;  %v4037_v7 = vld [vmem:[%s6855_s5 + $0x4] ss:$8 sps:$4 sm:$0xff]  }
 0x111   : > { %2256 = vmatprep.subr.bf16.mxu1 %v4037_v7 }
 0x112   : > { %v1258_v12 = vadd.f32 %v5208_v5, %v1187_v10  ;;  %v559_v13 = vpop.permute.xlu1 %558 }
 0x113   : > { %v800_v8 = vmul.f32 %v5194_v58, %v559_v13  ;;  %v1136_v13 = vmul.f32 %v5191_v56, %v5348_v20 }
 0x114   : > { %v4134_v16 = vpop.eup %4133  ;;  %4137 = vtanh.f32 %v1258_v12  ;;  %1009 = vperm.xlu1 %3981, %v5197_v59  }
 0x115   : > { %v1375_v17 = vpack.c.bf16 %v4134_v16, %v4132_v14  ;;  %v4136_v23 = vpop.eup %4135 }
 0x117   : > { %v926_v19 = vpop.permute.xlu1 %925  ;;  %1620 = vmatmul.mubr.bf16.gmra.mrb[32].mxu0 %v1375_v17 }
 0x118   : > { %v1124_v46 = vmul.f32 %v5191_v56, %v926_v19  ;;  %3982 = vset.pattern.permute.xlu1 %v6863_v2  ;;  %1629 = vmatprep.mubr.bf16.mxu0 %v6863_v2 }
 0x119   : > { %673 = vperm.xlu1 %3982, %v434_v18  }
 0x11a   : > { %v1188_v59 = vadd.f32 %v1124_v46, %v800_v8  ;;  %v439_v8 = vld [vmem:[%s5063_s23 + $0x180] sm:$0xff] }
 0x11b   : > { %v930_v22 = vpop.permute.xlu1 %929 }
 0x11c   : > { %v1125_v25 = vmul.f32 %v5191_v56, %v930_v22  ;;  %v1259_v27 = vadd.f32 %v5208_v5, %v1188_v59 }
 0x11d   : > { %3984 = vset.pattern.permute.xlu1 %v4934_v1 }
 0x11e   : > { %v4138_v29 = vpop.eup %4137  ;;  %v1189_v31 = vadd.f32 %v1125_v25, %v801_v21  ;;  %1017 = vperm.xlu1 %3984, %v434_v18   ;;  %4139 = vtanh.f32 %v1259_v27 }
 0x11f   : > { %v1376_v32 = vpack.c.bf16 %v4138_v29, %v4136_v23 }
 0x120   : > { %v1260_v35 = vadd.f32 %v5208_v5, %v1189_v31  ;;  %v574_v36 = vpop.permute.xlu1 %573 }
 0x121   : > { %1630 = vmatmul.mubr.bf16.gmra.mrb[36].mxu0 %v1376_v32  ;;  %v803_v41 = vmul.f32 %v5194_v58, %v574_v36 }
 0x122   : > { %4141 = vtanh.f32 %v1260_v35  ;;  %3985 = vset.pattern.permute.xlu1 %v6863_v2  ;;  %1639 = vmatprep.mubr.bf16.mxu0 %v6863_v2 }
 0x123   : > { %678 = vperm.xlu1 %3985, %v435_v38   ;;  %4143 = vtanh.f32 %v1261_v40 }
 0x125   : > { %v938_v33 = vpop.permute.xlu1 %937 }
 0x126   : > { %v1127_v42 = vmul.f32 %v5191_v56, %v938_v33 }
 0x127   : > { %3986 = vset.pattern.permute.xlu1 %v4934_v1 }
 0x128   : > { %v1191_v43 = vadd.f32 %v1127_v42, %v803_v41  ;;  %1021 = vperm.xlu1 %3986, %v435_v38   ;;  %v4140_v54 = vpop.eup %4139 }
 0x12a   : > { %v1262_v45 = vadd.f32 %v5208_v5, %v1191_v43  ;;  %v579_v48 = vpop.permute.xlu1 %578 }
 0x12b   : > { %v804_v0 = vmul.f32 %v5194_v58, %v579_v48  ;;  %v1138_v48 = vmul.f32 %v5191_v56, %v5359_v28 }
 0x12c   : > { %v4142_v55 = vpop.eup %4141  ;;  %4145 = vtanh.f32 %v1262_v45  ;;  %1025 = vperm.xlu1 %3986, %v5224_v24   ;;  %v619_v24 = vpop.permute.xlu0 %618 }
 0x12d   : > { %v1377_v57 = vpack.c.bf16 %v4142_v55, %v4140_v54  ;;  %v4144_v9 = vpop.eup %4143  ;;  %v812_v16 = vmul.f32 %v5194_v58, %v619_v24 }
 0x12f   : > { %v942_v61 = vpop.permute.xlu1 %941  ;;  %1640 = vmatmul.mubr.bf16.gmra.mrb[40].mxu0 %v1377_v57  ;;  %v1200_v46 = vadd.f32 %v1136_v13, %v812_v16 }
 0x130   : > { %v1128_v3 = vmul.f32 %v5191_v56, %v942_v61  ;;  %3987 = vset.pattern.permute.xlu1 %v6863_v2  ;;  %1649 = vmatprep.mubr.bf16.mxu0 %v6863_v2  ;;  %v594_v35 = vpop.permute.xlu0 %593 }
 0x131   : > { %693 = vperm.xlu1 %3987, %v438_v60   ;;  %v1271_v22 = vadd.f32 %v5208_v5, %v1200_v46  ;;  %v807_v33 = vmul.f32 %v5194_v58, %v594_v35  ;;  %v446_v46 = vld [vmem:[%s5063_s23 + $0x1b8] sm:$0xff]  ;;  %v4055_v35 = vld [vmem:[%s6855_s5 + $0x64] ss:$8 sps:$4 sm:$0xff]  }
 0x132   : > { %v1192_v4 = vadd.f32 %v1128_v3, %v804_v0  ;;  %v443_v0 = vld [vmem:[%s5063_s23 + $0x1a0] sm:$0xff]  ;;  %v4040_v3 = vld [vmem:[%s6855_s5 + $0x14] ss:$8 sps:$4 sm:$0xff]  }
 0x133   : > { %v946_v47 = vpop.permute.xlu1 %945 }
 0x134   : > { %v1129_v10 = vmul.f32 %v5191_v56, %v946_v47  ;;  %v1263_v11 = vadd.f32 %v5208_v5, %v1192_v4  ;;  %v4038_v4 = vld [vmem:[%s6855_s5 + $0x10] ss:$8 sps:$4 sm:$0xff]  }
 0x135   : > { %3989 = vset.pattern.permute.xlu1 %v4934_v1 }
 0x136   : > { %v4146_v12 = vpop.eup %4145  ;;  %v1193_v14 = vadd.f32 %v1129_v10, %v805_v6  ;;  %1033 = vperm.xlu1 %3989, %v438_v60   ;;  %4147 = vtanh.f32 %v1263_v11  ;;  %v4035_v60 = vld [vmem:[%s6855_s5] ss:$8 sps:$4 sm:$0xff]   ;;  %v4043_v6 = vld [vmem:[%s6855_s5 + $0x24] ss:$8 sps:$4 sm:$0xff]  }
 0x137   : > { %v1378_v17 = vpack.c.bf16 %v4146_v12, %v4144_v9  ;;  %v4041_v10 = vld [vmem:[%s6855_s5 + $0x20] ss:$8 sps:$4 sm:$0xff]   ;;  %v4046_v12 = vld [vmem:[%s6855_s5 + $0x34] ss:$8 sps:$4 sm:$0xff]  }
 0x138   : > { %v1264_v18 = vadd.f32 %v5208_v5, %v1193_v14  ;;  %v624_v19 = vpop.permute.xlu1 %623 }
 0x139   : > { %1650 = vmatmul.mubr.bf16.gmra.mrb[44].mxu0 %v1378_v17  ;;  %v813_v21 = vmul.f32 %v5194_v58, %v624_v19  ;;  %v4044_v17 = vld [vmem:[%s6855_s5 + $0x30] ss:$8 sps:$4 sm:$0xff]  }
 0x13a   : > { %4149 = vtanh.f32 %v1264_v18  ;;  %3990 = vset.pattern.permute.xlu1 %v6863_v2  ;;  %1659 = vmatprep.mubr.bf16.mxu0 %v6863_v2 }
 0x13b   : > { %698 = vperm.xlu1 %3990, %v439_v8   ;;  %4151 = vtanh.f32 %v1271_v22 }
 0x13d   : > { %v978_v20 = vpop.permute.xlu1 %977 }
 0x13e   : > { %v1137_v59 = vmul.f32 %v5191_v56, %v978_v20 }
 0x13f   : > { %3991 = vset.pattern.permute.xlu1 %v4934_v1 }
 0x140   : > { %v1201_v23 = vadd.f32 %v1137_v59, %v813_v21  ;;  %1037 = vperm.xlu1 %3991, %v439_v8   ;;  %v4148_v29 = vpop.eup %4147  ;;  %v4049_v8 = vld [vmem:[%s6855_s5 + $0x44] ss:$8 sps:$4 sm:$0xff]   ;;  %v4047_v59 = vld [vmem:[%s6855_s5 + $0x40] ss:$8 sps:$4 sm:$0xff]  }
 0x142   : > { %v1272_v25 = vadd.f32 %v5208_v5, %v1201_v23  ;;  %v589_v27 = vpop.permute.xlu1 %588 }
 0x143   : > { %v806_v36 = vmul.f32 %v5194_v58, %v589_v27 }
 0x144   : > { %v4150_v30 = vpop.eup %4149  ;;  %4153 = vtanh.f32 %v1272_v25  ;;  %1041 = vperm.xlu1 %3991, %v5246_v63   ;;  %v629_v63 = vpop.permute.xlu0 %628 }
 0x145   : > { %v1379_v31 = vpack.c.bf16 %v4150_v30, %v4148_v29  ;;  %v4152_v41 = vpop.eup %4151  ;;  %v814_v55 = vmul.f32 %v5194_v58, %v629_v63 }
 0x147   : > { %v950_v32 = vpop.permute.xlu1 %949  ;;  %1660 = vmatmul.mubr.bf16.gmra.mrb[48].mxu0 %v1379_v31  ;;  %v1202_v28 = vadd.f32 %v1138_v48, %v814_v55  ;;  %v4050_v31 = vld [vmem:[%s6855_s5 + $0x50] ss:$8 sps:$4 sm:$0xff]  }
 0x148   : > { %v1130_v38 = vmul.f32 %v5191_v56, %v950_v32  ;;  %3992 = vset.pattern.permute.xlu1 %v6863_v2  ;;  %1669 = vmatprep.mubr.bf16.mxu0 %v6863_v2  ;;  %v604_v21 = vpop.permute.xlu0 %603  ;;  %v4056_v48 = vld [vmem:[%s6855_s5 + $0x70] ss:$8 sps:$4 sm:$0xff]  }
 0x149   : > { %713 = vperm.xlu1 %3992, %v442_v26   ;;  %v1273_v9 = vadd.f32 %v5208_v5, %v1202_v28  ;;  %v809_v27 = vmul.f32 %v5194_v58, %v604_v21 }
 0x14a   : > { %v1194_v39 = vadd.f32 %v1130_v38, %v806_v36 }
 0x14b   : > { %v954_v40 = vpop.permute.xlu1 %953 }
 0x14c   : > { %v1131_v42 = vmul.f32 %v5191_v56, %v954_v40  ;;  %v1265_v43 = vadd.f32 %v5208_v5, %v1194_v39  ;;  %v639_v30 = vpop.permute.xlu0 %638  ;;  %v1140_v39 = vmul.f32 %v5191_v56, %v5368_v51 }
 0x14d   : > { %3994 = vset.pattern.permute.xlu1 %v4934_v1  ;;  %v816_v40 = vmul.f32 %v5194_v58, %v639_v30  ;;  %v4067_v30 = vld [vmem:[%s6855_s5 + $0xa4] ss:$8 sps:$4 sm:$0xff]  }
 0x14e   : > { %v4154_v45 = vpop.eup %4153  ;;  %v1195_v54 = vadd.f32 %v1131_v42, %v807_v33  ;;  %1049 = vperm.xlu1 %3994, %v442_v26   ;;  %4155 = vtanh.f32 %v1265_v43 }
 0x14f   : > { %v1383_v57 = vpack.c.bf16 %v4154_v45, %v4152_v41  ;;  %v4053_v41 = vld [vmem:[%s6855_s5 + $0x60] ss:$8 sps:$4 sm:$0xff]   ;;  %v1204_v51 = vadd.f32 %v1140_v39, %v816_v40 }
 0x150   : > { %v1266_v61 = vadd.f32 %v5208_v5, %v1195_v54  ;;  %v634_v62 = vpop.permute.xlu1 %633  ;;  %v447_v45 = vld [vmem:[%s5063_s23 + $0x1c0] sm:$0xff]  ;;  %v4058_v54 = vld [vmem:[%s6855_s5 + $0x74] ss:$8 sps:$4 sm:$0xff]  }
 0x151   : > { %1700 = vmatmul.mubr.bf16.vlgmr.msra.gmra.mrb[0].mxu1 %v1383_v57  ;;  %v815_v24 = vmul.f32 %v5194_v58, %v634_v62  ;;  %v1415_v40 = vld [vmem:[%s6854_s4] sm:$0x3] }
 0x152   : > { %4157 = vtanh.f32 %v1266_v61  ;;  %3995 = vset.pattern.permute.xlu1 %v6863_v2  ;;  %1709 = vmatprep.mubr.bf16.mxu1 %v6863_v2  ;;  %v1275_v61 = vadd.f32 %v5208_v5, %v1204_v51  ;;  %v5545_v51 = vrot.slane %v1415_v40, %v5181_v52 }
 0x153   : > { %718 = vperm.xlu1 %3995, %v443_v0   ;;  %2257 = vmatpush1.bf16.msra.mxu1 %v4035_v60  ;;  %4159 = vtanh.f32 %v1273_v9  ;;  %v4061_v9 = vld [vmem:[%s6855_s5 + $0x84] ss:$8 sps:$4 sm:$0xff]  }
 0x154   : > { %2258 = vmatprep.subr.bf16.mxu1 %v4040_v3 }
 0x155   : > { %v986_v47 = vpop.permute.xlu1 %985 }
 0x156   : > { %v1139_v7 = vmul.f32 %v5191_v56, %v986_v47  ;;  %v450_v47 = vld [vmem:[%s5063_s23 + $0x1d8] sm:$0xff] }
 0x157   : > { %3996 = vset.pattern.permute.xlu1 %v4934_v1  ;;  %2259 = vmatpush1.bf16.msra.mxu1 %v4038_v4 }
 0x158   : > { %v1203_v11 = vadd.f32 %v1139_v7, %v815_v24  ;;  %1053 = vperm.xlu1 %3996, %v443_v0   ;;  %2260 = vmatprep.subr.bf16.mxu1 %v4043_v6  ;;  %v4156_v16 = vpop.eup %4155  ;;  %v614_v24 = vpop.permute.xlu0 %613  ;;  %v4059_v7 = vld [vmem:[%s6855_s5 + $0x80] ss:$8 sps:$4 sm:$0xff]  }
 0x15a   : > { %v1274_v13 = vadd.f32 %v5208_v5, %v1203_v11  ;;  %v599_v14 = vpop.permute.xlu1 %598 }
 0x15b   : > { %2261 = vmatpush1.bf16.msra.mxu1 %v4041_v10  ;;  %v808_v22 = vmul.f32 %v5194_v58, %v599_v14 }
 0x15c   : > { %v4158_v18 = vpop.eup %4157  ;;  %4161 = vtanh.f32 %v1274_v13  ;;  %1057 = vperm.xlu1 %3996, %v5278_v37   ;;  %2262 = vmatprep.subr.bf16.mxu1 %v4046_v12  ;;  %v4052_v37 = vld [vmem:[%s6855_s5 + $0x54] ss:$8 sps:$4 sm:$0xff]   ;;  %v811_v13 = vmul.f32 %v5194_v58, %v614_v24 }
 0x15d   : > { %v1380_v19 = vpack.c.bf16 %v4158_v18, %v4156_v16  ;;  %v4160_v26 = vpop.eup %4159  ;;  %v4062_v16 = vld [vmem:[%s6855_s5 + $0x90] ss:$8 sps:$4 sm:$0xff]  }
 0x15f   : > { %v958_v20 = vpop.permute.xlu1 %957  ;;  %1670 = vmatmul.mubr.bf16.gmra.mrb[52].mxu0 %v1380_v19  ;;  %2263 = vmatpush1.bf16.msra.mxu1 %v4044_v17  ;;  %v4064_v17 = vld [vmem:[%s6855_s5 + $0x94] ss:$8 sps:$4 sm:$0xff]  }
 0x160   : > { %v1132_v23 = vmul.f32 %v5191_v56, %v958_v20  ;;  %3997 = vset.pattern.permute.xlu1 %v6863_v2  ;;  %1679 = vmatprep.mubr.bf16.mxu0 %v6863_v2 }
 0x161   : > { %733 = vperm.xlu1 %3997, %v446_v46   ;;  %2264 = vmatprep.subr.bf16.mxu1 %v4049_v8  ;;  %v649_v8 = vpop.permute.xlu0 %648 }
 0x162   : > { %v1196_v25 = vadd.f32 %v1132_v23, %v808_v22  ;;  %v818_v22 = vmul.f32 %v5194_v58, %v649_v8 }
 0x163   : > { %v962_v29 = vpop.permute.xlu1 %961  ;;  %2265 = vmatpush1.bf16.msra.mxu1 %v4047_v59  ;;  %v1142_v59 = vmul.f32 %v5191_v56, %v5374_v44 }
 0x164   : > { %v1133_v32 = vmul.f32 %v5191_v56, %v962_v29  ;;  %2266 = vmatprep.subr.bf16.mxu1 %v4052_v37  ;;  %v1267_v36 = vadd.f32 %v5208_v5, %v1196_v25  ;;  %v5519_v37 = vld [vmem:[%s6852_s2] ss:$0 sm:$0xff] }
 0x165   : > { %3999 = vset.pattern.permute.xlu1 %v4934_v1  ;;  %v1206_v44 = vadd.f32 %v1142_v59, %v818_v22  ;;  %v4065_v29 = vld [vmem:[%s6855_s5 + $0xa0] ss:$8 sps:$4 sm:$0xff]  }
 0x166   : > { %v4162_v38 = vpop.eup %4161  ;;  %v1197_v33 = vadd.f32 %v1133_v32, %v809_v27  ;;  %1065 = vperm.xlu1 %3999, %v446_v46   ;;  %4163 = vtanh.f32 %v1267_v36  ;;  %v451_v27 = vld [vmem:[%s5063_s23 + $0x1e0] sm:$0xff] }
 0x167   : > { %v1384_v63 = vpack.c.bf16 %v4162_v38, %v4160_v26  ;;  %2267 = vmatpush1.bf16.msra.mxu1 %v4050_v31  ;;  %v664_v38 = vpop.permute.xlu0 %663 }
 0x168   : > { %v1268_v42 = vadd.f32 %v5208_v5, %v1197_v33  ;;  %v644_v43 = vpop.permute.xlu1 %643  ;;  %2268 = vmatprep.subr.bf16.mxu1 %v4055_v35  ;;  %v1277_v35 = vadd.f32 %v5519_v37, %v1206_v44 }
 0x169   : > { %1710 = vmatmul.mubr.bf16.gmra.mrb[4].mxu1 %v1384_v63  ;;  %v817_v57 = vmul.f32 %v5194_v58, %v644_v43  ;;  %v5541_v43 = vrot.slane %v1415_v40, %v5184_v53  ;;  %v4077_v40 = vld [vmem:[%s6855_s5 + $0xe0] ss:$8 sps:$4 sm:$0xff]  }
 0x16a   : > { %4165 = vtanh.f32 %v1268_v42  ;;  %4000 = vset.pattern.permute.xlu1 %v6863_v2  ;;  %1719 = vmatprep.mubr.bf16.mxu1 %v6863_v2 }
 0x16b   : > { %738 = vperm.xlu1 %4000, %v447_v45   ;;  %2269 = vmatpush1.bf16.msra.mxu1 %v4053_v41  ;;  %4167 = vtanh.f32 %v1275_v61 }
 0x16c   : > { %2270 = vmatprep.subr.bf16.mxu1 %v4058_v54  ;;  %v4068_v54 = vld [vmem:[%s6855_s5 + $0xb0] ss:$8 sps:$4 sm:$0xff]  }
 0x16d   : > { %v994_v55 = vpop.permute.xlu1 %993 }
 0x16e   : > { %v1141_v60 = vmul.f32 %v5191_v56, %v994_v55  ;;  %v4070_v55 = vld [vmem:[%s6855_s5 + $0xb4] ss:$8 sps:$4 sm:$0xff]  }
 0x16f   : > { %4001 = vset.pattern.permute.xlu1 %v4934_v1  ;;  %2271 = vmatpush1.bf16.msra.mxu1 %v4056_v48  ;;  %v669_v48 = vpop.permute.xlu0 %668 }
 0x170   : > { %v1205_v62 = vadd.f32 %v1141_v60, %v817_v57  ;;  %1069 = vperm.xlu1 %4001, %v447_v45   ;;  %v4164_v28 = vpop.eup %4163  ;;  %2272 = vmatprep.subr.bf16.mxu1 %v4061_v9  ;;  %v454_v45 = vld [vmem:[%s5063_s23 + $0x1f8] sm:$0xff]  ;;  %v4071_v9 = vld [vmem:[%s6855_s5 + $0xc0] ss:$8 sps:$4 sm:$0xff]   ;;  %s4870_s23 = scalar_lea.vmem %s6810_s10, 64 }
 0x171   : > { %p4871_p11 = scmp.ne.s32.totalorder %s6810_s10, %s4870_s23  ;;  %p4878_p1 = scmp.lt.s32.totalorder %s4876_s17, %s4870_s23 }
 0x172   : > { %v1276_v0 = vadd.f32 %v5208_v5, %v1205_v62  ;;  %v609_v3 = vpop.permute.xlu1 %608 }
 0x173   : > { %v810_v11 = vmul.f32 %v5194_v58, %v609_v3  ;;  %2273 = vmatpush1.bf16.msra.mxu1 %v4059_v7  ;;  %v821_v3 = vmul.f32 %v5194_v58, %v664_v38  ;;  %p4872_p12 = pnand %p4871_p11, %p5036_p5  ;;  %p4879_p2 = por %p4878_p1, %p4877_p0 }
 0x174   : > { %v4166_v4 = vpop.eup %4165  ;;  %4169 = vtanh.f32 %v1276_v0  ;;  %1073 = vperm.xlu1 %4001, %v5300_v15   ;;  %2274 = vmatprep.subr.bf16.mxu1 %v4064_v17 }
 0x175   : > { %v1381_v6 = vpack.c.bf16 %v4166_v4, %v4164_v28  ;;  %v4168_v18 = vpop.eup %4167  ;;  %p4873_p13 = pneg %p4872_p12 }
 0x177   : > { %v966_v10 = vpop.permute.xlu1 %965  ;;  %1680 = vmatmul.mubr.bf16.gmra.mrb[56].mxu0 %v1381_v6  ;;  %2275 = vmatpush1.bf16.msra.mxu1 %v4062_v16  ;;  %p4880_p3 = pnand %p4879_p2, %p4873_p13 }
 0x178   : > { %v1134_v12 = vmul.f32 %v5191_v56, %v966_v10  ;;  %4002 = vset.pattern.permute.xlu1 %v6863_v2  ;;  %1689 = vmatprep.mubr.bf16.mxu0 %v6863_v2  ;;  %v4073_v10 = vld [vmem:[%s6855_s5 + $0xc4] ss:$8 sps:$4 sm:$0xff]  }
 0x179   : > { %753 = vperm.xlu1 %4002, %v450_v47   ;;  %2276 = vmatprep.subr.bf16.mxu1 %v4067_v30  ;;  %v4076_v30 = vld [vmem:[%s6855_s5 + $0xd4] ss:$8 sps:$4 sm:$0xff]  }
 0x17a   : > { %v1198_v15 = vadd.f32 %v1134_v12, %v810_v11 }
 0x17b   : > { %v970_v14 = vpop.permute.xlu1 %969  ;;  %2277 = vmatpush1.bf16.msra.mxu1 %v4065_v29  ;;  %v4074_v29 = vld [vmem:[%s6855_s5 + $0xd0] ss:$8 sps:$4 sm:$0xff]  }
 0x17c   : > { %v1135_v19 = vmul.f32 %v5191_v56, %v970_v14  ;;  %v1269_v46 = vadd.f32 %v5208_v5, %v1198_v15  ;;  %2278 = vmatprep.subr.bf16.mxu1 %v4070_v55  ;;  %v1014_v15 = vpop.permute.xlu0 %1013 }
 0x17d   : > { %4005 = vset.pattern.permute.xlu1 %v4934_v1 }
 0x17e   : > { %v4170_v20 = vpop.eup %4169  ;;  %v1199_v21 = vadd.f32 %v1135_v19, %v811_v13  ;;  %1081 = vperm.xlu1 %4005, %v450_v47   ;;  %4171 = vtanh.f32 %v1269_v46  ;;  %v1146_v19 = vmul.f32 %v5191_v56, %v1014_v15 }
 0x17f   : > { %v1385_v23 = vpack.c.bf16 %v4170_v20, %v4168_v18  ;;  %2279 = vmatpush1.bf16.msra.mxu1 %v4068_v54  ;;  %v822_v18 = vmul.f32 %v5194_v58, %v669_v48 }
 0x180   : > { %v1270_v5 = vadd.f32 %v5519_v37, %v1199_v21  ;;  %v654_v25 = vpop.permute.xlu1 %653  ;;  %2280 = vmatprep.subr.bf16.mxu1 %v4073_v10 }
 0x181   : > { %1720 = vmatmul.mubr.bf16.gmra.mrb[8].mxu1 %v1385_v23  ;;  %v819_v26 = vmul.f32 %v5194_v58, %v654_v25 }
 0x182   : > { %4173 = vtanh.f32 %v1270_v5  ;;  %4006 = vset.pattern.permute.xlu1 %v6863_v2  ;;  %1729 = vmatprep.mubr.bf16.mxu1 %v6863_v2  ;;  %v1210_v5 = vadd.f32 %v1146_v19, %v822_v18  ;;  %v4080_v19 = vld [vmem:[%s6855_s5 + $0xf0] ss:$8 sps:$4 sm:$0xff]  }
 0x183   : > { %758 = vperm.xlu1 %4006, %v451_v27   ;;  %4175 = vtanh.f32 %v1277_v35  ;;  %2281 = vmatpush1.bf16.msra.mxu1 %v4071_v9 }
 0x184   : > { %2282 = vmatprep.subr.bf16.mxu1 %v4076_v30  ;;  %v1281_v38 = vadd.f32 %v5519_v37, %v1210_v5 }
 0x185   : > { %v1002_v31 = vpop.permute.xlu1 %1001 }
 0x186   : > { %v1143_v32 = vmul.f32 %v5191_v56, %v1002_v31 }
 0x187   : > { %4007 = vset.pattern.permute.xlu1 %v4934_v1  ;;  %2283 = vmatpush1.bf16.msra.mxu1 %v4074_v29 }
 0x188   : > { %v1207_v36 = vadd.f32 %v1143_v32, %v819_v26  ;;  %1085 = vperm.xlu1 %4007, %v451_v27   ;;  %v4172_v63 = vpop.eup %4171 }
 0x18a   : > { %v1278_v39 = vadd.f32 %v5519_v37, %v1207_v36  ;;  %v659_v33 = vpop.permute.xlu1 %658 }
 0x18c   : > { %v4174_v41 = vpop.eup %4173  ;;  %4177 = vtanh.f32 %v1278_v39  ;;  %1089 = vperm.xlu1 %4007, %v5321_v34   ;;  %v820_v34 = vmul.f32 %v5194_v58, %v659_v33 }
 0x18d   : > { %v1382_v42 = vpack.c.bf16 %v4174_v41, %v4172_v63  ;;  %v4176_v13 = vpop.eup %4175  ;;  %v4079_v63 = vld [vmem:[%s6855_s5 + $0xe4] ss:$8 sps:$4 sm:$0xff]  }
 0x18e   : > { %2284 = vmatprep.subr.bf16.mxu1 %v4079_v63 }
 0x18f   : > { %v1006_v57 = vpop.permute.xlu1 %1005  ;;  %1690 = vmatmul.mubr.bf16.gmra.mrb[60].mxu0 %v1382_v42  ;;  %2285 = vmatpush1.bf16.msra.mxu1 %v4077_v40 }
 0x190   : > { %v1144_v60 = vmul.f32 %v5191_v56, %v1006_v57  ;;  %4008 = vset.pattern.permute.xlu1 %v6863_v2  ;;  %v1541_v61 = vpop.f32.mrb[0].mxu0 }
 0x191   : > { %v1542_v62 = vadd.f32 %v1541_v61, %v5541_v43  ;;  %773 = vperm.xlu1 %4008, %v454_v45   ;;  %v1543_v0 = vpop.f32.mrb[1].mxu0 }
 0x192   : > { %v1208_v28 = vadd.f32 %v1144_v60, %v820_v34  ;;  %v1544_v4 = vadd.f32 %v1543_v0, %v5545_v51  ;;  %v1545_v6 = vpop.f32.mrb[2].mxu0 }
 0x193   : > { %v1546_v47 = vadd.f32 %v1545_v6, %v5541_v43  ;;  %v1010_v24 = vpop.permute.xlu1 %1009  ;;  %v1547_v7 = vpop.f32.mrb[3].mxu0  ;;  %4179 = vtanh.f32 %v1542_v62 }
 0x194   : > { %v1145_v11 = vmul.f32 %v5191_v56, %v1010_v24  ;;  %v1548_v12 = vadd.f32 %v1547_v7, %v5545_v51  ;;  %v1279_v14 = vadd.f32 %v5519_v37, %v1208_v28 }
 0x195   : > { %4181 = vtanh.f32 %v1546_v47  ;;  %4010 = vset.pattern.permute.xlu1 %v4934_v1 }
 0x196   : > { %v4178_v16 = vpop.eup %4177  ;;  %4183 = vtanh.f32 %v1544_v4  ;;  %v1209_v17 = vadd.f32 %v1145_v11, %v821_v3  ;;  %1097 = vperm.xlu1 %4010, %v454_v45   ;;  %v1030_v45 = vpop.permute.xlu0 %1029 }
 0x197   : > { %4185 = vtanh.f32 %v1548_v12  ;;  %v1386_v8 = vpack.c.bf16 %v4178_v16, %v4176_v13 }
 0x198   : > { %v1280_v46 = vadd.f32 %v5519_v37, %v1209_v17  ;;  %v674_v20 = vpop.permute.xlu1 %673  ;;  %v1551_v21 = vpop.f32.mrb[4].mxu0  ;;  %4187 = vtanh.f32 %v1279_v14 }
 0x199   : > { %v1552_v59 = vadd.f32 %v1551_v21, %v5541_v43  ;;  %v1553_v1 = vpop.f32.mrb[5].mxu0  ;;  %1730 = vmatmul.mubr.bf16.gmra.mrb[12].mxu1 %v1386_v8  ;;  %v823_v32 = vmul.f32 %v5194_v58, %v674_v20  ;;  %v4082_v8 = vld [vmem:[%s6855_s5 + $0xf4] ss:$8 sps:$4 sm:$0xff]  }
 0x19a   : > { %4189 = vtanh.f32 %v1280_v46  ;;  %v1554_v22 = vadd.f32 %v1553_v1, %v5545_v51  ;;  %v1555_v23 = vpop.f32.mrb[6].mxu0  ;;  %1739 = vmatprep.mubr.bf16.mxu1 %v6863_v2  ;;  %v684_v11 = vpop.permute.xlu0 %683  ;;  %2286 = vmatprep.subr.bf16.mxu1 %v4082_v8 }
 0x19b   : > { %4191 = vtanh.f32 %v1552_v59  ;;  %v1556_v25 = vadd.f32 %v1555_v23, %v5541_v43  ;;  %v1557_v27 = vpop.f32.mrb[7].mxu0  ;;  %v825_v18 = vmul.f32 %v5194_v58, %v684_v11  ;;  %v1150_v23 = vmul.f32 %v5191_v56, %v1030_v45  ;;  %2287 = vmatpush1.bf16.msra.mxu1 %v4080_v19 }
 0x19c   : > { %4193 = vtanh.f32 %v1554_v22  ;;  %v1558_v44 = vadd.f32 %v1557_v27, %v5545_v51 }
 0x19d   : > { %4195 = vtanh.f32 %v1556_v25  ;;  %v1018_v31 = vpop.permute.xlu1 %1017  ;;  %v5584_v26 = vpop.eup %4179 }
 0x19e   : > { %4197 = vtanh.f32 %v1558_v44  ;;  %v1147_v35 = vmul.f32 %v5191_v56, %v1018_v31  ;;  %v689_v20 = vpop.permute.xlu0 %688 }
 0x19f   : > { %v5588_v36 = vpop.eup %4181  ;;  %4199 = vtanh.f32 %v1281_v38  ;;  %v826_v31 = vmul.f32 %v5194_v58, %v689_v20 }
 0x1a0   : > { %v5591_v39 = vpop.eup %4183  ;;  %v1211_v33 = vadd.f32 %v1147_v35, %v823_v32 }
 0x1a1   : > { %v5601_v42 = vpop.eup %4185 }
 0x1a2   : > { %v1282_v48 = vadd.f32 %v5519_v37, %v1211_v33  ;;  %v679_v54 = vpop.permute.xlu1 %678  ;;  %v1561_v55 = vpop.f32.mrb[8].mxu0 }
 0x1a3   : > { %v4188_v34 = vpop.eup %4187  ;;  %v1562_v60 = vadd.f32 %v1561_v55, %v5541_v43  ;;  %v1563_v61 = vpop.f32.mrb[9].mxu0  ;;  %v824_v15 = vmul.f32 %v5194_v58, %v679_v54 }
 0x1a4   : > { %v4190_v62 = vpop.eup %4189  ;;  %4201 = vtanh.f32 %v1282_v48  ;;  %v1564_v0 = vadd.f32 %v1563_v61, %v5545_v51  ;;  %v1565_v3 = vpop.f32.mrb[10].mxu0 }
 0x1a5   : > { %v5608_v28 = vpop.eup %4191  ;;  %4203 = vtanh.f32 %v1562_v60  ;;  %v1566_v4 = vadd.f32 %v1565_v3, %v5541_v43  ;;  %v1567_v6 = vpop.f32.mrb[11].mxu0  ;;  %v1387_v47 = vpack.c.bf16 %v4190_v62, %v4188_v34  ;;  %v1214_v34 = vadd.f32 %v1150_v23, %v826_v31 }
 0x1a6   : > { %v5611_v24 = vpop.eup %4193  ;;  %4205 = vtanh.f32 %v1564_v0  ;;  %v1568_v7 = vadd.f32 %v1567_v6, %v5545_v51 }
 0x1a7   : > { %v5614_v9 = vpop.eup %4195  ;;  %4207 = vtanh.f32 %v1566_v4  ;;  %v1022_v10 = vpop.permute.xlu1 %1021  ;;  %1740 = vmatmul.mubr.bf16.gmra.mrb[16].mxu1 %v1387_v47  ;;  %v1285_v4 = vadd.f32 %v5519_v37, %v1214_v34 }
 0x1a8   : > { %v5616_v12 = vpop.eup %4197  ;;  %4209 = vtanh.f32 %v1568_v7  ;;  %v1148_v13 = vmul.f32 %v5191_v56, %v1022_v10  ;;  %1749 = vmatprep.mubr.bf16.mxu1 %v6863_v2  ;;  %v704_v10 = vpop.permute.xlu0 %703 }
 0x1a9   : > { %v4200_v22 = vpop.eup %4199 }
 0x1aa   : > { %v1212_v17 = vadd.f32 %v1148_v13, %v824_v15 }
 0x1ab   : > { %v1026_v46 = vpop.permute.xlu1 %1025 }
 0x1ac   : > { %v1283_v21 = vadd.f32 %v5519_v37, %v1212_v17  ;;  %v1149_v59 = vmul.f32 %v5191_v56, %v1026_v46  ;;  %v1571_v1 = vpop.f32.mrb[12].mxu0 }
 0x1ad   : > { %v1572_v5 = vadd.f32 %v1571_v1, %v5541_v43  ;;  %v1573_v25 = vpop.f32.mrb[13].mxu0 }
 0x1ae   : > { %v4202_v27 = vpop.eup %4201  ;;  %4211 = vtanh.f32 %v1283_v21  ;;  %v1213_v44 = vadd.f32 %v1149_v59, %v825_v18  ;;  %v1574_v29 = vadd.f32 %v1573_v25, %v5545_v51  ;;  %v1575_v30 = vpop.f32.mrb[14].mxu0 }
 0x1af   : > { %v5638_v32 = vpop.eup %4203  ;;  %4213 = vtanh.f32 %v1572_v5  ;;  %v1576_v35 = vadd.f32 %v1575_v30, %v5541_v43  ;;  %v1577_v38 = vpop.f32.mrb[15].mxu0  ;;  %v1388_v33 = vpack.c.bf16 %v4202_v27, %v4200_v22 }
 0x1b0   : > { %v5641_v40 = vpop.eup %4205  ;;  %v1284_v63 = vadd.f32 %v5519_v37, %v1213_v44  ;;  %4215 = vtanh.f32 %v1574_v29  ;;  %v1578_v45 = vadd.f32 %v1577_v38, %v5545_v51  ;;  %v694_v48 = vpop.permute.xlu1 %693  ;;  %v829_v38 = vmul.f32 %v5194_v58, %v704_v10 }
 0x1b1   : > { %v5645_v54 = vpop.eup %4207  ;;  %4217 = vtanh.f32 %v1576_v35  ;;  %1750 = vmatmul.mubr.bf16.gmra.mrb[20].mxu1 %v1388_v33  ;;  %v827_v0 = vmul.f32 %v5194_v58, %v694_v48  ;;  %v709_v25 = vpop.permute.xlu0 %708 }
 0x1b2   : > { %v5647_v55 = vpop.eup %4209  ;;  %4219 = vtanh.f32 %v1284_v63  ;;  %1759 = vmatprep.mubr.bf16.mxu1 %v6863_v2 }
 0x1b3   : > { %4221 = vtanh.f32 %v1578_v45 }
 0x1b4   : > { %4223 = vtanh.f32 %v1285_v4  ;;  %v830_v4 = vmul.f32 %v5194_v58, %v709_v25 }
 0x1b5   : > { %v1034_v62 = vpop.permute.xlu1 %1033  ;;  %v1046_v63 = vpop.permute.xlu0 %1045 }
 0x1b6   : > { %v1151_v3 = vmul.f32 %v5191_v56, %v1034_v62  ;;  %v1154_v10 = vmul.f32 %v5191_v56, %v1046_v63 }
 0x1b8   : > { %v4212_v6 = vpop.eup %4211  ;;  %v1215_v47 = vadd.f32 %v1151_v3, %v827_v0 }
 0x1b9   : > { %v5657_v7 = vpop.eup %4213 }
 0x1ba   : > { %v5659_v11 = vpop.eup %4215  ;;  %v1286_v15 = vadd.f32 %v5519_v37, %v1215_v47  ;;  %v699_v13 = vpop.permute.xlu1 %698 }
 0x1bb   : > { %v1581_v17 = vpop.f32.mrb[16].mxu0  ;;  %v5662_v18 = vpop.eup %4217  ;;  %v828_v30 = vmul.f32 %v5194_v58, %v699_v13 }
 0x1bc   : > { %v1582_v19 = vadd.f32 %v1581_v17, %v5541_v43  ;;  %v1583_v8 = vpop.f32.mrb[17].mxu0  ;;  %v4220_v46 = vpop.eup %4219  ;;  %4225 = vtanh.f32 %v1286_v15 }
 0x1bd   : > { %v1584_v20 = vadd.f32 %v1583_v8, %v5545_v51  ;;  %v1585_v21 = vpop.f32.mrb[18].mxu0  ;;  %v5668_v1 = vpop.eup %4221  ;;  %v1389_v5 = vpack.c.bf16 %v4220_v46, %v4212_v6 }
 0x1be   : > { %4227 = vtanh.f32 %v1582_v19  ;;  %v1586_v22 = vadd.f32 %v1585_v21, %v5541_v43  ;;  %v1587_v23 = vpop.f32.mrb[19].mxu0  ;;  %v4224_v45 = vpop.eup %4223 }
 0x1bf   : > { %4229 = vtanh.f32 %v1584_v20  ;;  %v1588_v27 = vadd.f32 %v1587_v23, %v5545_v51  ;;  %v1038_v29 = vpop.permute.xlu1 %1037  ;;  %1760 = vmatmul.mubr.bf16.gmra.mrb[24].mxu1 %v1389_v5 }
 0x1c0   : > { %4231 = vtanh.f32 %v1586_v22  ;;  %v1152_v31 = vmul.f32 %v5191_v56, %v1038_v29  ;;  %1769 = vmatprep.mubr.bf16.mxu1 %v6863_v2 }
 0x1c1   : > { %4233 = vtanh.f32 %v1588_v27  ;;  %v1218_v27 = vadd.f32 %v1154_v10, %v830_v4 }
 0x1c2   : > { %v1216_v35 = vadd.f32 %v1152_v31, %v828_v30 }
 0x1c3   : > { %v1042_v33 = vpop.permute.xlu1 %1041 }
 0x1c4   : > { %v1287_v48 = vadd.f32 %v5519_v37, %v1216_v35  ;;  %v1153_v34 = vmul.f32 %v5191_v56, %v1042_v33  ;;  %v1591_v62 = vpop.f32.mrb[20].mxu0  ;;  %v1289_v33 = vadd.f32 %v5519_v37, %v1218_v27 }
 0x1c5   : > { %v1592_v0 = vadd.f32 %v1591_v62, %v5541_v43  ;;  %v1593_v3 = vpop.f32.mrb[21].mxu0 }
 0x1c6   : > { %v4226_v6 = vpop.eup %4225  ;;  %4235 = vtanh.f32 %v1287_v48  ;;  %v1217_v47 = vadd.f32 %v1153_v34, %v829_v38  ;;  %v1594_v15 = vadd.f32 %v1593_v3, %v5545_v51  ;;  %v1595_v13 = vpop.f32.mrb[22].mxu0 }
 0x1c7   : > { %4237 = vtanh.f32 %v1592_v0  ;;  %v1596_v19 = vadd.f32 %v1595_v13, %v5541_v43  ;;  %v1597_v8 = vpop.f32.mrb[23].mxu0  ;;  %v1390_v46 = vpack.c.bf16 %v4226_v6, %v4224_v45  ;;  %v1062_v34 = vpop.permute.xlu0 %1061 }
 0x1c8   : > { %v5684_v17 = vpop.eup %4227  ;;  %v1288_v21 = vadd.f32 %v5519_v37, %v1217_v47  ;;  %4239 = vtanh.f32 %v1594_v15  ;;  %v1598_v22 = vadd.f32 %v1597_v8, %v5545_v51  ;;  %v714_v23 = vpop.permute.xlu1 %713 }
 0x1c9   : > { %v5687_v20 = vpop.eup %4229  ;;  %4241 = vtanh.f32 %v1596_v19  ;;  %1770 = vmatmul.mubr.bf16.gmra.mrb[28].mxu1 %v1390_v46  ;;  %v831_v35 = vmul.f32 %v5194_v58, %v714_v23 }
 0x1ca   : > { %v5691_v5 = vpop.eup %4231  ;;  %4243 = vtanh.f32 %v1288_v21  ;;  %1779 = vmatprep.mubr.bf16.mxu1 %v6863_v2 }
 0x1cb   : > { %v5693_v25 = vpop.eup %4233  ;;  %4245 = vtanh.f32 %v1598_v22 }
 0x1cc   : > { %4247 = vtanh.f32 %v1289_v33 }
 0x1cd   : > { %v1050_v31 = vpop.permute.xlu1 %1049 }
 0x1ce   : > { %v1155_v38 = vmul.f32 %v5191_v56, %v1050_v31 }
 0x1d0   : > { %v4236_v63 = vpop.eup %4235  ;;  %v1219_v45 = vadd.f32 %v1155_v38, %v831_v35  ;;  %v724_v38 = vpop.permute.xlu0 %723 }
 0x1d1   : > { %v5703_v48 = vpop.eup %4237 }
 0x1d2   : > { %v5705_v62 = vpop.eup %4239  ;;  %v1290_v0 = vadd.f32 %v5519_v37, %v1219_v45  ;;  %v719_v3 = vpop.permute.xlu1 %718 }
 0x1d3   : > { %v1601_v4 = vpop.f32.mrb[24].mxu0  ;;  %v5708_v6 = vpop.eup %4241  ;;  %v832_v33 = vmul.f32 %v5194_v58, %v719_v3 }
 0x1d4   : > { %v1602_v47 = vadd.f32 %v1601_v4, %v5541_v43  ;;  %v1603_v15 = vpop.f32.mrb[25].mxu0  ;;  %v4244_v13 = vpop.eup %4243  ;;  %4249 = vtanh.f32 %v1290_v0 }
 0x1d5   : > { %v1604_v10 = vadd.f32 %v1603_v15, %v5545_v51  ;;  %v1605_v19 = vpop.f32.mrb[26].mxu0  ;;  %v5714_v46 = vpop.eup %4245  ;;  %v1391_v23 = vpack.c.bf16 %v4244_v13, %v4236_v63  ;;  %v833_v63 = vmul.f32 %v5194_v58, %v724_v38 }
 0x1d6   : > { %4251 = vtanh.f32 %v1602_v47  ;;  %v1606_v21 = vadd.f32 %v1605_v19, %v5541_v43  ;;  %v1607_v22 = vpop.f32.mrb[27].mxu0  ;;  %v729_v47 = vpop.permute.xlu0 %728 }
 0x1d7   : > { %4253 = vtanh.f32 %v1604_v10  ;;  %v1608_v27 = vadd.f32 %v1607_v22, %v5545_v51  ;;  %v1054_v35 = vpop.permute.xlu1 %1053  ;;  %1780 = vmatmul.mubr.bf16.gmra.mrb[32].mxu1 %v1391_v23  ;;  %v4248_v15 = vpop.eup %4247  ;;  %v834_v38 = vmul.f32 %v5194_v58, %v729_v47 }
 0x1d8   : > { %4255 = vtanh.f32 %v1606_v21  ;;  %v1156_v45 = vmul.f32 %v5191_v56, %v1054_v35  ;;  %1789 = vmatprep.mubr.bf16.mxu1 %v6863_v2  ;;  %v1158_v21 = vmul.f32 %v5191_v56, %v1062_v34 }
 0x1d9   : > { %4257 = vtanh.f32 %v1608_v27 }
 0x1da   : > { %v1220_v0 = vadd.f32 %v1156_v45, %v832_v33 }
 0x1db   : > { %v1058_v4 = vpop.permute.xlu1 %1057 }
 0x1dc   : > { %v1291_v13 = vadd.f32 %v5519_v37, %v1220_v0  ;;  %v1157_v10 = vmul.f32 %v5191_v56, %v1058_v4  ;;  %v1611_v19 = vpop.f32.mrb[28].mxu0 }
 0x1dd   : > { %v1612_v3 = vadd.f32 %v1611_v19, %v5541_v43  ;;  %v1613_v22 = vpop.f32.mrb[29].mxu0  ;;  %v1222_v19 = vadd.f32 %v1158_v21, %v834_v38 }
 0x1de   : > { %v4250_v23 = vpop.eup %4249  ;;  %4259 = vtanh.f32 %v1291_v13  ;;  %v1221_v27 = vadd.f32 %v1157_v10, %v833_v63  ;;  %v1614_v35 = vadd.f32 %v1613_v22, %v5545_v51  ;;  %v1615_v33 = vpop.f32.mrb[30].mxu0 }
 0x1df   : > { %4261 = vtanh.f32 %v1612_v3  ;;  %v1616_v0 = vadd.f32 %v1615_v33, %v5541_v43  ;;  %v1617_v4 = vpop.f32.mrb[31].mxu0  ;;  %v1392_v49 = vpack.c.bf16 %v4250_v23, %v4248_v15  ;;  %v744_v3 = vpop.permute.xlu0 %743 }
 0x1e0   : > { %v5730_v45 = vpop.eup %4251  ;;  %v1292_v34 = vadd.f32 %v5519_v37, %v1221_v27  ;;  %4263 = vtanh.f32 %v1614_v35  ;;  %v1618_v13 = vadd.f32 %v1617_v4, %v5545_v51  ;;  %v734_v63 = vpop.permute.xlu1 %733  ;;  %v1293_v27 = vadd.f32 %v5519_v37, %v1222_v19 }
 0x1e1   : > { %v5733_v8 = vpop.eup %4253  ;;  %4265 = vtanh.f32 %v1616_v0  ;;  %1790 = vmatmul.mubr.bf16.gmra.mrb[36].mxu1 %v1392_v49  ;;  %v835_v23 = vmul.f32 %v5194_v58, %v734_v63 }
 0x1e2   : > { %v5737_v10 = vpop.eup %4255  ;;  %4267 = vtanh.f32 %v1292_v34  ;;  %1799 = vmatprep.mubr.bf16.mxu1 %v6863_v2 }
 0x1e3   : > { %v5739_v47 = vpop.eup %4257  ;;  %4269 = vtanh.f32 %v1618_v13 }
 0x1e4   : > { %4271 = vtanh.f32 %v1293_v27 }
 0x1e5   : > { %v1066_v22 = vpop.permute.xlu1 %1065 }
 0x1e6   : > { %v1159_v49 = vmul.f32 %v5191_v56, %v1066_v22 }
 0x1e8   : > { %v4260_v35 = vpop.eup %4259  ;;  %v1223_v33 = vadd.f32 %v1159_v49, %v835_v23 }
 0x1e9   : > { %v5749_v0 = vpop.eup %4261 }
 0x1ea   : > { %v5751_v21 = vpop.eup %4263  ;;  %v1294_v38 = vadd.f32 %v5519_v37, %v1223_v33  ;;  %v739_v4 = vpop.permute.xlu1 %738 }
 0x1eb   : > { %v1621_v34 = vpop.f32.mrb[32].mxu0  ;;  %v5754_v13 = vpop.eup %4265  ;;  %v836_v59 = vmul.f32 %v5194_v58, %v739_v4 }
 0x1ec   : > { %v1622_v15 = vadd.f32 %v1621_v34, %v5541_v43  ;;  %v1623_v63 = vpop.f32.mrb[33].mxu0  ;;  %v4268_v19 = vpop.eup %4267  ;;  %4273 = vtanh.f32 %v1294_v38 }
 0x1ed   : > { %v1624_v22 = vadd.f32 %v1623_v63, %v5545_v51  ;;  %v1625_v23 = vpop.f32.mrb[34].mxu0  ;;  %v5760_v31 = vpop.eup %4269  ;;  %v1393_v29 = vpack.c.bf16 %v4268_v19, %v4260_v35  ;;  %v837_v19 = vmul.f32 %v5194_v58, %v744_v3 }
 0x1ee   : > { %4275 = vtanh.f32 %v1622_v15  ;;  %v1626_v27 = vadd.f32 %v1625_v23, %v5541_v43  ;;  %v1627_v33 = vpop.f32.mrb[35].mxu0  ;;  %v1078_v63 = vpop.permute.xlu0 %1077 }
 0x1ef   : > { %4277 = vtanh.f32 %v1624_v22  ;;  %v1628_v34 = vadd.f32 %v1627_v33, %v5545_v51  ;;  %v1070_v38 = vpop.permute.xlu1 %1069  ;;  %1800 = vmatmul.mubr.bf16.gmra.mrb[40].mxu1 %v1393_v29  ;;  %v4272_v35 = vpop.eup %4271  ;;  %v1162_v4 = vmul.f32 %v5191_v56, %v1078_v63 }
 0x1f0   : > { %4279 = vtanh.f32 %v1626_v27  ;;  %v1160_v49 = vmul.f32 %v5191_v56, %v1070_v38  ;;  %1809 = vmatprep.mubr.bf16.mxu1 %v6863_v2 }
 0x1f1   : > { %4281 = vtanh.f32 %v1628_v34 }
 0x1f2   : > { %v1224_v15 = vadd.f32 %v1160_v49, %v836_v59  ;;  %v749_v34 = vpop.permute.xlu0 %748 }
 0x1f3   : > { %v1074_v23 = vpop.permute.xlu1 %1073  ;;  %v838_v60 = vmul.f32 %v5194_v58, %v749_v34 }
 0x1f4   : > { %v1295_v22 = vadd.f32 %v5519_v37, %v1224_v15  ;;  %v1161_v33 = vmul.f32 %v5191_v56, %v1074_v23  ;;  %v1631_v27 = vpop.f32.mrb[36].mxu0 }
 0x1f5   : > { %v1632_v29 = vadd.f32 %v1631_v27, %v5541_v43  ;;  %v1633_v30 = vpop.f32.mrb[37].mxu0 }
 0x1f6   : > { %v4274_v44 = vpop.eup %4273  ;;  %4283 = vtanh.f32 %v1295_v22  ;;  %v1225_v38 = vadd.f32 %v1161_v33, %v837_v19  ;;  %v1634_v59 = vadd.f32 %v1633_v30, %v5545_v51  ;;  %v1635_v49 = vpop.f32.mrb[38].mxu0 }
 0x1f7   : > { %4285 = vtanh.f32 %v1632_v29  ;;  %v1636_v15 = vadd.f32 %v1635_v49, %v5541_v43  ;;  %v1637_v23 = vpop.f32.mrb[39].mxu0  ;;  %v1394_v61 = vpack.c.bf16 %v4274_v44, %v4272_v35  ;;  %v1226_v29 = vadd.f32 %v1162_v4, %v838_v60 }
 0x1f8   : > { %v5776_v3 = vpop.eup %4275  ;;  %v1296_v63 = vadd.f32 %v5519_v37, %v1225_v38  ;;  %4287 = vtanh.f32 %v1634_v59  ;;  %v1638_v22 = vadd.f32 %v1637_v23, %v5545_v51  ;;  %v754_v19 = vpop.permute.xlu1 %753 }
 0x1f9   : > { %v5779_v27 = vpop.eup %4277  ;;  %4289 = vtanh.f32 %v1636_v15  ;;  %1810 = vmatmul.mubr.bf16.gmra.mrb[44].mxu1 %v1394_v61  ;;  %v839_v38 = vmul.f32 %v5194_v58, %v754_v19  ;;  %v1297_v59 = vadd.f32 %v5519_v37, %v1226_v29  ;;  %v764_v23 = vpop.permute.xlu0 %763 }
 0x1fa   : > { %v5783_v33 = vpop.eup %4279  ;;  %4291 = vtanh.f32 %v1296_v63  ;;  %1819 = vmatprep.mubr.bf16.mxu1 %v6863_v2 }
 0x1fb   : > { %v5785_v30 = vpop.eup %4281  ;;  %4293 = vtanh.f32 %v1638_v22 }
 0x1fc   : > { %4295 = vtanh.f32 %v1297_v59 }
 0x1fd   : > { %v1082_v34 = vpop.permute.xlu1 %1081  ;;  %v769_v57 = vpop.permute.xlu0 %768 }
 0x1fe   : > { %v1163_v61 = vmul.f32 %v5191_v56, %v1082_v34 }
 0x200   : > { %v4284_v49 = vpop.eup %4283  ;;  %v1227_v15 = vadd.f32 %v1163_v61, %v839_v38 }
 0x201   : > { %v5795_v60 = vpop.eup %4285 }
 0x202   : > { %6875 = vst [vmem:[#allocation9_spill] sm:$0xff] %v5795_v60  ;;  %v5797_v4 = vpop.eup %4287  ;;  %v1298_v63 = vadd.f32 %v5519_v37, %v1227_v15  ;;  %v759_v22 = vpop.permute.xlu1 %758 }
 0x203   : > { %v1641_v44 = vpop.f32.mrb[40].mxu0  ;;  %v5800_v35 = vpop.eup %4289  ;;  %v840_v2 = vmul.f32 %v5194_v58, %v759_v22 }
 0x204   : > { %6876 = vst [vmem:[#allocation10_spill] sm:$0xff] %v5800_v35  ;;  %v1642_v19 = vadd.f32 %v1641_v44, %v5541_v43  ;;  %v1643_v14 = vpop.f32.mrb[41].mxu0  ;;  %v4292_v29 = vpop.eup %4291  ;;  %4297 = vtanh.f32 %v1298_v63 }
 0x205   : > { %v1644_v34 = vadd.f32 %v1643_v14, %v5545_v51  ;;  %v1645_v38 = vpop.f32.mrb[42].mxu0  ;;  %v5806_v16 = vpop.eup %4293  ;;  %v1395_v41 = vpack.c.bf16 %v4292_v29, %v4284_v49  ;;  %v841_v29 = vmul.f32 %v5194_v58, %v764_v23 }
 0x206   : > { %4299 = vtanh.f32 %v1642_v19  ;;  %v1646_v59 = vadd.f32 %v1645_v38, %v5541_v43  ;;  %v1647_v15 = vpop.f32.mrb[43].mxu0  ;;  %v6877_v19 = vmov 0   ;;  %v4296_v49 = vpop.eup %4295 }
 0x207   : > { %4301 = vtanh.f32 %v1644_v34  ;;  %v1648_v44 = vadd.f32 %v1647_v15, %v5545_v51  ;;  %v1086_v14 = vpop.permute.xlu1 %1085  ;;  %1820 = vmatmul.mubr.bf16.gmra.mrb[48].mxu1 %v1395_v41  ;;  %v1094_v34 = vpop.permute.xlu0 %1093 }
 0x208   : > { %4303 = vtanh.f32 %v1646_v59  ;;  %v1164_v61 = vmul.f32 %v5191_v56, %v1086_v14  ;;  %1829 = vmatprep.mubr.bf16.mxu1 %v6877_v19  ;;  %v1166_v23 = vmul.f32 %v5191_v56, %v1094_v34 }
 0x209   : > { %4305 = vtanh.f32 %v1648_v44  ;;  %v842_v44 = vmul.f32 %v5194_v58, %v769_v57 }
 0x20a   : > { %v1228_v38 = vadd.f32 %v1164_v61, %v840_v2 }
 0x20b   : > { %v1090_v50 = vpop.permute.xlu1 %1089  ;;  %v1230_v34 = vadd.f32 %v1166_v23, %v842_v44 }
 0x20c   : > { %v1299_v15 = vadd.f32 %v5519_v37, %v1228_v38  ;;  %v1165_v63 = vmul.f32 %v5191_v56, %v1090_v50  ;;  %v1651_v59 = vpop.f32.mrb[44].mxu0 }
 0x20d   : > { %v1652_v41 = vadd.f32 %v1651_v59, %v5541_v43  ;;  %v1653_v52 = vpop.f32.mrb[45].mxu0 }
 0x20e   : > { %v4298_v22 = vpop.eup %4297  ;;  %4307 = vtanh.f32 %v1299_v15  ;;  %v1229_v14 = vadd.f32 %v1165_v63, %v841_v29  ;;  %v1654_v2 = vadd.f32 %v1653_v52, %v5545_v51  ;;  %v1655_v61 = vpop.f32.mrb[46].mxu0 }
 0x20f   : > { %4309 = vtanh.f32 %v1652_v41  ;;  %v1656_v38 = vadd.f32 %v1655_v61, %v5541_v43  ;;  %v1657_v50 = vpop.f32.mrb[47].mxu0  ;;  %v1396_v60 = vpack.c.bf16 %v4298_v22, %v4296_v49 }
 0x210   : > { %v5821_v53 = vpop.eup %4299  ;;  %v1300_v59 = vadd.f32 %v5519_v37, %v1229_v14  ;;  %4311 = vtanh.f32 %v1654_v2  ;;  %v1658_v57 = vadd.f32 %v1657_v50, %v5545_v51  ;;  %v774_v63 = vpop.permute.xlu1 %773 }
 0x211   : > { %v5825_v35 = vpop.eup %4301  ;;  %4313 = vtanh.f32 %v1656_v38  ;;  %1830 = vmatmul.mubr.bf16.gmra.mrb[52].mxu1 %v1396_v60  ;;  %v843_v22 = vmul.f32 %v5194_v58, %v774_v63  ;;  %v1301_v60 = vadd.f32 %v5519_v37, %v1230_v34  ;;  %v4083_v38 = vld [vmem:[%s6857_s7] sm:$0xff]  }
 0x212   : > { %v5829_v29 = vpop.eup %4303  ;;  %4315 = vtanh.f32 %v1300_v59  ;;  %1839 = vmatprep.mubr.bf16.mxu1 %v6877_v19  ;;  %2937 = vmatpush1.bf16.msra.mxu0 %v4083_v38 }
 0x213   : > { %v5831_v52 = vpop.eup %4305  ;;  %4317 = vtanh.f32 %v1658_v57  ;;  %2938 = vmatprep.subr.bf16.mxu0 %v6877_v19 }
 0x214   : > { %v2009_v15 = vpack.c.bf16 %v5831_v52, %v5825_v35  ;;  %4319 = vtanh.f32 %v1301_v60 }
 0x215   : > { %v1098_v41 = vpop.permute.xlu1 %1097 }
 0x216   : > { %v1167_v14 = vmul.f32 %v5191_v56, %v1098_v41 }
 0x218   : > { %v4308_v2 = vpop.eup %4307  ;;  %v1231_v61 = vadd.f32 %v1167_v14, %v843_v22 }
 0x219   : > { %v5844_v50 = vpop.eup %4309 }
 0x21a   : > { %v5846_v44 = vpop.eup %4311  ;;  %v1302_v23 = vadd.f32 %v5519_v37, %v1231_v61  ;;  %v1661_v59 = vpop.f32.mrb[48].mxu0 }
 0x21b   : > { %v5849_v57 = vpop.eup %4313  ;;  %v1662_v56 = vadd.f32 %v1661_v59, %v5541_v43  ;;  %v1663_v58 = vpop.f32.mrb[49].mxu0 }
 0x21c   : > { %v4316_v63 = vpop.eup %4315  ;;  %4321 = vtanh.f32 %v1302_v23  ;;  %v1664_v34 = vadd.f32 %v1663_v58, %v5545_v51  ;;  %v1665_v41 = vpop.f32.mrb[50].mxu0  ;;  %v4084_v23 = vld [vmem:[%s6857_s7 + $0x8] sm:$0xff]  }
 0x21d   : > { %v5856_v14 = vpop.eup %4317  ;;  %4323 = vtanh.f32 %v1662_v56  ;;  %v1666_v37 = vadd.f32 %v1665_v41, %v5541_v43  ;;  %v1667_v61 = vpop.f32.mrb[51].mxu0  ;;  %v1397_v60 = vpack.c.bf16 %v4316_v63, %v4308_v2  ;;  %2939 = vmatpush1.bf16.msra.mxu0 %v4084_v23  ;;  %v4085_v2 = vld [vmem:[%s6857_s7 + $0x10] sm:$0xff]  }
 0x21e   : > { %4325 = vtanh.f32 %v1664_v34  ;;  %v1668_v38 = vadd.f32 %v1667_v61, %v5545_v51  ;;  %v4320_v58 = vpop.eup %4319  ;;  %2940 = vmatprep.subr.bf16.mxu0 %v6877_v19 }
 0x21f   : > { %4327 = vtanh.f32 %v1666_v37  ;;  %1840 = vmatmul.mubr.bf16.gmra.mrb[56].mxu1 %v1397_v60 }
 0x220   : > { %4329 = vtanh.f32 %v1668_v38  ;;  %1849 = vmatprep.mubr.bf16.mxu1 %v6877_v19 }
 0x221   : > { %2941 = vmatpush1.bf16.msra.mxu0 %v4085_v2  ;;  %v4086_v2 = vld [vmem:[%s6857_s7 + $0x18] sm:$0xff]  }
 0x222   : > { %2942 = vmatprep.subr.bf16.mxu0 %v6877_v19 }
 0x224   : > { %v1701_v56 = vpop.f32.mrb[0].mxu1 }
 0x225   : > { %v1702_v63 = vadd.f32 %v1701_v56, %v5541_v43  ;;  %v1703_v34 = vpop.f32.mrb[1].mxu1  ;;  %2943 = vmatpush1.bf16.msra.mxu0 %v4086_v2 }
 0x226   : > { %v4322_v41 = vpop.eup %4321  ;;  %v1704_v37 = vadd.f32 %v1703_v34, %v5545_v51  ;;  %v1705_v61 = vpop.f32.mrb[2].mxu1  ;;  %2944 = vmatprep.subr.bf16.mxu0 %v6877_v19 }
 0x227   : > { %v5872_v60 = vpop.eup %4323  ;;  %4331 = vtanh.f32 %v1702_v63  ;;  %v1706_v38 = vadd.f32 %v1705_v61, %v5541_v43  ;;  %v1707_v23 = vpop.f32.mrb[3].mxu1  ;;  %v1398_v22 = vpack.c.bf16 %v4322_v41, %v4320_v58  ;;  %v6878_v63 = vpack.c.bf16 %v5601_v42, %v5591_v39 }
 0x228   : > { %v5875_v59 = vpop.eup %4325  ;;  %4333 = vtanh.f32 %v1704_v37  ;;  %v1708_v49 = vadd.f32 %v1707_v23, %v5545_v51  ;;  %v6879_v37 = vpack.c.bf16 %v5588_v36, %v5584_v26  ;;  %v6880_v42 = vpack.c.bf16 %v5616_v12, %v5611_v24 }
 0x229   : > { %v5878_v56 = vpop.eup %4327  ;;  %4335 = vtanh.f32 %v1706_v38  ;;  %1850 = vmatmul.mubr.bf16.gmra.mrb[60].mxu1 %v1398_v22 }
 0x22a   : > { %v5881_v34 = vpop.eup %4329  ;;  %4337 = vtanh.f32 %v1708_v49  ;;  %2288 = vmatprep.mubr.bf16.mxu1 %v6878_v63  ;;  %v2012_v58 = vpack.c.bf16 %v5878_v56, %v5872_v60 }
 0x22b   : > { %v2013_v41 = vpack.c.bf16 %v5881_v34, %v5875_v59  ;;  %v4098_v34 = vld [vmem:[%s6857_s7 + $0x78] sm:$0xff]  }
 0x231   : > { %v5893_v22 = vpop.eup %4331  ;;  %2289 = vmatmul.mubr.bf16.vlgmr.msra.gmra.mrb[64].mxu1 %v6879_v37 }
 0x232   : > { %v5898_v49 = vpop.eup %4333  ;;  %v1671_v39 = vpop.f32.mrb[52].mxu0  ;;  %2298 = vmatprep.mubr.bf16.mxu1 %v6880_v42  ;;  %v6881_v42 = vpack.c.bf16 %v5614_v9, %v5608_v28 }
 0x233   : > { %v5903_v61 = vpop.eup %4335  ;;  %v1672_v38 = vadd.f32 %v1671_v39, %v5541_v43  ;;  %v1673_v23 = vpop.f32.mrb[53].mxu0 }
 0x234   : > { %v5907_v63 = vpop.eup %4337  ;;  %v1674_v26 = vadd.f32 %v1673_v23, %v5545_v51  ;;  %v1675_v36 = vpop.f32.mrb[54].mxu0  ;;  %v2020_v37 = vpack.c.bf16 %v5903_v61, %v5893_v22  ;;  %v6882_v23 = vpack.c.bf16 %v5647_v55, %v5641_v40 }
 0x235   : > { %4339 = vtanh.f32 %v1672_v38  ;;  %v1676_v24 = vadd.f32 %v1675_v36, %v5541_v43  ;;  %v1677_v12 = vpop.f32.mrb[55].mxu0  ;;  %v2021_v2 = vpack.c.bf16 %v5907_v63, %v5898_v49  ;;  %v4087_v38 = vld [vmem:[%s6857_s7 + $0x20] sm:$0xff]  }
 0x236   : > { %4341 = vtanh.f32 %v1674_v26  ;;  %v1678_v39 = vadd.f32 %v1677_v12, %v5545_v51  ;;  %2945 = vmatpush1.bf16.msra.mxu0 %v4087_v38  ;;  %v4088_v26 = vld [vmem:[%s6857_s7 + $0x28] sm:$0xff]  }
 0x237   : > { %4343 = vtanh.f32 %v1676_v24  ;;  %2946 = vmatprep.subr.bf16.mxu0 %v6877_v19 }
 0x238   : > { %4345 = vtanh.f32 %v1678_v39 }
 0x239   : > { %2299 = vmatmul.mubr.bf16.gmra.mrb[68].mxu1 %v6881_v42 }
 0x23a   : > { %2308 = vmatprep.mubr.bf16.mxu1 %v6882_v23  ;;  %2947 = vmatpush1.bf16.msra.mxu0 %v4088_v26 }
 0x23b   : > { %2948 = vmatprep.subr.bf16.mxu0 %v6877_v19 }
 0x23c   : > { %v1711_v36 = vpop.f32.mrb[4].mxu1 }
 0x23d   : > { %v1712_v24 = vadd.f32 %v1711_v36, %v5541_v43  ;;  %v1713_v12 = vpop.f32.mrb[5].mxu1  ;;  %v6883_v36 = vpack.c.bf16 %v5645_v54, %v5638_v32  ;;  %v4089_v32 = vld [vmem:[%s6857_s7 + $0x30] sm:$0xff]  }
 0x23e   : > { %v1714_v28 = vadd.f32 %v1713_v12, %v5545_v51  ;;  %v1715_v9 = vpop.f32.mrb[6].mxu1  ;;  %2949 = vmatpush1.bf16.msra.mxu0 %v4089_v32 }
 0x23f   : > { %v5931_v40 = vpop.eup %4339  ;;  %4347 = vtanh.f32 %v1712_v24  ;;  %v1716_v55 = vadd.f32 %v1715_v9, %v5541_v43  ;;  %v1717_v39 = vpop.f32.mrb[7].mxu1  ;;  %v6884_v24 = vpack.c.bf16 %v5668_v1, %v5659_v11  ;;  %v6885_v9 = vpack.c.bf16 %v5662_v18, %v5657_v7  ;;  %2950 = vmatprep.subr.bf16.mxu0 %v6877_v19 }
 0x240   : > { %v5934_v42 = vpop.eup %4341  ;;  %4349 = vtanh.f32 %v1714_v28  ;;  %v1718_v23 = vadd.f32 %v1717_v39, %v5545_v51  ;;  %v6886_v1 = vpack.c.bf16 %v5693_v25, %v5687_v20 }
 0x241   : > { %v5937_v38 = vpop.eup %4343  ;;  %4351 = vtanh.f32 %v1716_v55  ;;  %2309 = vmatmul.mubr.bf16.gmra.mrb[72].mxu1 %v6883_v36 }
 0x242   : > { %v5943_v12 = vpop.eup %4345  ;;  %4353 = vtanh.f32 %v1718_v23  ;;  %2318 = vmatprep.mubr.bf16.mxu1 %v6884_v24  ;;  %v2014_v28 = vpack.c.bf16 %v5937_v38, %v5931_v40 }
 0x243   : > { %v2015_v26 = vpack.c.bf16 %v5943_v12, %v5934_v42 }
 0x249   : > { %v5955_v54 = vpop.eup %4347  ;;  %2319 = vmatmul.mubr.bf16.gmra.mrb[76].mxu1 %v6885_v9 }
 0x24a   : > { %v5960_v55 = vpop.eup %4349  ;;  %v1681_v11 = vpop.f32.mrb[56].mxu0  ;;  %2328 = vmatprep.mubr.bf16.mxu1 %v6886_v1  ;;  %v6887_v1 = vpack.c.bf16 %v5691_v5, %v5684_v17 }
 0x24b   : > { %v5965_v39 = vpop.eup %4351  ;;  %v1682_v23 = vadd.f32 %v1681_v11, %v5541_v43  ;;  %v1683_v36 = vpop.f32.mrb[57].mxu0 }
 0x24c   : > { %v5969_v24 = vpop.eup %4353  ;;  %v1684_v7 = vadd.f32 %v1683_v36, %v5545_v51  ;;  %v1685_v18 = vpop.f32.mrb[58].mxu0  ;;  %v2022_v9 = vpack.c.bf16 %v5965_v39, %v5955_v54  ;;  %v6888_v36 = vpack.c.bf16 %v5714_v46, %v5705_v62 }
 0x24d   : > { %4355 = vtanh.f32 %v1682_v23  ;;  %v1686_v20 = vadd.f32 %v1685_v18, %v5541_v43  ;;  %v1687_v25 = vpop.f32.mrb[59].mxu0  ;;  %v2023_v32 = vpack.c.bf16 %v5969_v24, %v5960_v55  ;;  %v4090_v23 = vld [vmem:[%s6857_s7 + $0x38] sm:$0xff]  }
 0x24e   : > { %4357 = vtanh.f32 %v1684_v7  ;;  %v1688_v11 = vadd.f32 %v1687_v25, %v5545_v51  ;;  %2951 = vmatpush1.bf16.msra.mxu0 %v4090_v23  ;;  %v4091_v7 = vld [vmem:[%s6857_s7 + $0x40] sm:$0xff]  }
 0x24f   : > { %4359 = vtanh.f32 %v1686_v20  ;;  %2952 = vmatprep.subr.bf16.mxu0 %v6877_v19 }
 0x250   : > { %4361 = vtanh.f32 %v1688_v11 }
 0x251   : > { %2329 = vmatmul.mubr.bf16.gmra.mrb[80].mxu1 %v6887_v1 }
 0x252   : > { %2338 = vmatprep.mubr.bf16.mxu1 %v6888_v36  ;;  %2953 = vmatpush1.bf16.msra.mxu0 %v4091_v7 }
 0x253   : > { %2954 = vmatprep.subr.bf16.mxu0 %v6877_v19 }
 0x254   : > { %v1721_v18 = vpop.f32.mrb[8].mxu1 }
 0x255   : > { %v1722_v20 = vadd.f32 %v1721_v18, %v5541_v43  ;;  %v1723_v25 = vpop.f32.mrb[9].mxu1  ;;  %v6889_v18 = vpack.c.bf16 %v5708_v6, %v5703_v48  ;;  %v4092_v48 = vld [vmem:[%s6857_s7 + $0x48] sm:$0xff]  }
 0x256   : > { %v1724_v17 = vadd.f32 %v1723_v25, %v5545_v51  ;;  %v1725_v5 = vpop.f32.mrb[10].mxu1  ;;  %2955 = vmatpush1.bf16.msra.mxu0 %v4092_v48 }
 0x257   : > { %v5993_v62 = vpop.eup %4355  ;;  %4363 = vtanh.f32 %v1722_v20  ;;  %v1726_v46 = vadd.f32 %v1725_v5, %v5541_v43  ;;  %v1727_v11 = vpop.f32.mrb[11].mxu1  ;;  %v6890_v20 = vpack.c.bf16 %v5739_v47, %v5733_v8  ;;  %v6891_v5 = vpack.c.bf16 %v5737_v10, %v5730_v45  ;;  %2956 = vmatprep.subr.bf16.mxu0 %v6877_v19 }
 0x258   : > { %v5996_v1 = vpop.eup %4357  ;;  %4365 = vtanh.f32 %v1724_v17  ;;  %v1728_v36 = vadd.f32 %v1727_v11, %v5545_v51  ;;  %v6892_v47 = vpack.c.bf16 %v5760_v31, %v5751_v21 }
 0x259   : > { %v5999_v23 = vpop.eup %4359  ;;  %4367 = vtanh.f32 %v1726_v46  ;;  %2339 = vmatmul.mubr.bf16.gmra.mrb[84].mxu1 %v6889_v18 }
 0x25a   : > { %v6005_v25 = vpop.eup %4361  ;;  %4369 = vtanh.f32 %v1728_v36  ;;  %2348 = vmatprep.mubr.bf16.mxu1 %v6890_v20  ;;  %v2016_v17 = vpack.c.bf16 %v5999_v23, %v5993_v62 }
 0x25b   : > { %v2017_v7 = vpack.c.bf16 %v6005_v25, %v5996_v1 }
 0x261   : > { %v6017_v6 = vpop.eup %4363  ;;  %2349 = vmatmul.mubr.bf16.gmra.mrb[88].mxu1 %v6891_v5 }
 0x262   : > { %v6022_v46 = vpop.eup %4365  ;;  %v1691_v8 = vpop.f32.mrb[60].mxu0  ;;  %2358 = vmatprep.mubr.bf16.mxu1 %v6892_v47  ;;  %v6893_v47 = vpack.c.bf16 %v5754_v13, %v5749_v0 }
 0x263   : > { %v6027_v11 = vpop.eup %4367  ;;  %v1692_v36 = vadd.f32 %v1691_v8, %v5541_v43  ;;  %v1693_v18 = vpop.f32.mrb[61].mxu0 }
 0x264   : > { %v6031_v20 = vpop.eup %4369  ;;  %v1694_v45 = vadd.f32 %v1693_v18, %v5545_v51  ;;  %v1695_v10 = vpop.f32.mrb[62].mxu0  ;;  %v6894_v18 = vpack.c.bf16 %v5785_v30, %v5779_v27 }
 0x265   : > { %4371 = vtanh.f32 %v1692_v36  ;;  %v1696_v31 = vadd.f32 %v1695_v10, %v5541_v43  ;;  %v1697_v21 = vpop.f32.mrb[63].mxu0  ;;  %v2025_v48 = vpack.c.bf16 %v6031_v20, %v6022_v46  ;;  %v4093_v36 = vld [vmem:[%s6857_s7 + $0x50] sm:$0xff]  }
 0x266   : > { %4373 = vtanh.f32 %v1694_v45  ;;  %v1698_v8 = vadd.f32 %v1697_v21, %v5545_v51  ;;  %2957 = vmatpush1.bf16.msra.mxu0 %v4093_v36  ;;  %v4094_v45 = vld [vmem:[%s6857_s7 + $0x58] sm:$0xff]  }
 0x267   : > { %4375 = vtanh.f32 %v1696_v31  ;;  %2958 = vmatprep.subr.bf16.mxu0 %v6877_v19 }
 0x268   : > { %4377 = vtanh.f32 %v1698_v8 }
 0x269   : > { %2359 = vmatmul.mubr.bf16.gmra.mrb[92].mxu1 %v6893_v47 }
 0x26a   : > { %2368 = vmatprep.mubr.bf16.mxu1 %v6894_v18  ;;  %2959 = vmatpush1.bf16.msra.mxu0 %v4094_v45 }
 0x26b   : > { %2960 = vmatprep.subr.bf16.mxu0 %v6877_v19 }
 0x26c   : > { %v1731_v10 = vpop.f32.mrb[12].mxu1 }
 0x26d   : > { %v1732_v31 = vadd.f32 %v1731_v10, %v5541_v43  ;;  %v1733_v21 = vpop.f32.mrb[13].mxu1  ;;  %v6895_v10 = vpack.c.bf16 %v5783_v33, %v5776_v3  ;;  %v4095_v3 = vld [vmem:[%s6857_s7 + $0x60] sm:$0xff]  }
 0x26e   : > { %v1734_v0 = vadd.f32 %v1733_v21, %v5545_v51  ;;  %v1735_v13 = vpop.f32.mrb[14].mxu1  ;;  %2961 = vmatpush1.bf16.msra.mxu0 %v4095_v3 }
 0x26f   : > { %v6055_v27 = vpop.eup %4371  ;;  %4379 = vtanh.f32 %v1732_v31  ;;  %v1736_v30 = vadd.f32 %v1735_v13, %v5541_v43  ;;  %v1737_v8 = vpop.f32.mrb[15].mxu1  ;;  %v6896_v31 = vpack.c.bf16 %v5806_v16, %v5797_v4  ;;  %v6897_v13 = vld [vmem:[#allocation10_spill] sm:$0xff]  ;;  %2962 = vmatprep.subr.bf16.mxu0 %v6877_v19 }
 0x270   : > { %v6058_v47 = vpop.eup %4373  ;;  %4381 = vtanh.f32 %v1734_v0  ;;  %v1738_v18 = vadd.f32 %v1737_v8, %v5545_v51 }
 0x271   : > { %v6061_v36 = vpop.eup %4375  ;;  %4383 = vtanh.f32 %v1736_v30  ;;  %2369 = vmatmul.mubr.bf16.gmra.mrb[96].mxu1 %v6895_v10  ;;  %v6898_v30 = vld [vmem:[#allocation9_spill] sm:$0xff] }
 0x272   : > { %v6067_v21 = vpop.eup %4377  ;;  %4385 = vtanh.f32 %v1738_v18  ;;  %2378 = vmatprep.mubr.bf16.mxu1 %v6896_v31  ;;  %v2018_v0 = vpack.c.bf16 %v6061_v36, %v6055_v27  ;;  %v6899_v8 = vpack.c.bf16 %v6897_v13, %v6898_v30 }
 0x273   : > { %v2019_v45 = vpack.c.bf16 %v6067_v21, %v6058_v47 }
 0x279   : > { %v6079_v33 = vpop.eup %4379  ;;  %2379 = vmatmul.mubr.bf16.gmra.mrb[100].mxu1 %v6899_v8 }
 0x27a   : > { %v6084_v18 = vpop.eup %4381  ;;  %v1741_v16 = vpop.f32.mrb[16].mxu1  ;;  %2388 = vmatprep.mubr.bf16.mxu1 %v2009_v15 }
 0x27b   : > { %v6089_v4 = vpop.eup %4383  ;;  %v1742_v10 = vadd.f32 %v1741_v16, %v5541_v43  ;;  %v1743_v31 = vpop.f32.mrb[17].mxu1  ;;  %v6900_v16 = vpack.c.bf16 %v5829_v29, %v5821_v53 }
 0x27c   : > { %v6093_v5 = vpop.eup %4385  ;;  %v1744_v13 = vadd.f32 %v1743_v31, %v5545_v51  ;;  %v1745_v30 = vpop.f32.mrb[18].mxu1  ;;  %v6901_v31 = vpack.c.bf16 %v5856_v14, %v5846_v44 }
 0x27d   : > { %4387 = vtanh.f32 %v1742_v10  ;;  %v1746_v35 = vadd.f32 %v1745_v30, %v5541_v43  ;;  %v1747_v52 = vpop.f32.mrb[19].mxu1  ;;  %v2027_v15 = vpack.c.bf16 %v6093_v5, %v6084_v18  ;;  %v4096_v10 = vld [vmem:[%s6857_s7 + $0x68] sm:$0xff]  }
 0x27e   : > { %4389 = vtanh.f32 %v1744_v13  ;;  %v1748_v3 = vadd.f32 %v1747_v52, %v5545_v51  ;;  %2963 = vmatpush1.bf16.msra.mxu0 %v4096_v10 }
 0x27f   : > { %4391 = vtanh.f32 %v1746_v35  ;;  %2964 = vmatprep.subr.bf16.mxu0 %v6877_v19 }
 0x280   : > { %4393 = vtanh.f32 %v1748_v3 }
 0x281   : > { %2389 = vmatmul.mubr.bf16.gmra.mrb[104].mxu1 %v6900_v16 }
 0x282   : > { %2398 = vmatprep.mubr.bf16.mxu1 %v6901_v31  ;;  %v6902_v31 = vpack.c.bf16 %v5849_v57, %v5844_v50 }
 0x284   : > { %v1751_v30 = vpop.f32.mrb[20].mxu1 }
 0x285   : > { %v1752_v13 = vadd.f32 %v1751_v30, %v5541_v43  ;;  %v1753_v8 = vpop.f32.mrb[21].mxu1  ;;  %v4097_v30 = vld [vmem:[%s6857_s7 + $0x70] sm:$0xff]  }
 0x286   : > { %v1754_v35 = vadd.f32 %v1753_v8, %v5545_v51  ;;  %v1755_v52 = vpop.f32.mrb[22].mxu1  ;;  %2965 = vmatpush1.bf16.msra.mxu0 %v4097_v30 }
 0x287   : > { %v6114_v53 = vpop.eup %4387  ;;  %4395 = vtanh.f32 %v1752_v13  ;;  %v1756_v29 = vadd.f32 %v1755_v52, %v5541_v43  ;;  %v1757_v44 = vpop.f32.mrb[23].mxu1  ;;  %2966 = vmatprep.subr.bf16.mxu0 %v6877_v19 }
 0x288   : > { %v6117_v14 = vpop.eup %4389  ;;  %4397 = vtanh.f32 %v1754_v35  ;;  %v1758_v3 = vadd.f32 %v1757_v44, %v5545_v51 }
 0x289   : > { %v6120_v16 = vpop.eup %4391  ;;  %4399 = vtanh.f32 %v1756_v29  ;;  %2399 = vmatmul.mubr.bf16.gmra.mrb[108].mxu1 %v6902_v31 }
 0x28a   : > { %v6125_v8 = vpop.eup %4393  ;;  %4401 = vtanh.f32 %v1758_v3  ;;  %2408 = vmatprep.mubr.bf16.mxu1 %v2013_v41  ;;  %v2028_v10 = vpack.c.bf16 %v6120_v16, %v6114_v53  ;;  %2967 = vmatpush1.bf16.msra.mxu0 %v4098_v34 }
 0x28b   : > { %v2029_v13 = vpack.c.bf16 %v6125_v8, %v6117_v14 }
 0x291   : > { %v6138_v50 = vpop.eup %4395  ;;  %2409 = vmatmul.mubr.bf16.gmra.mrb[112].mxu1 %v2012_v58 }
 0x292   : > { %v6143_v57 = vpop.eup %4397  ;;  %v1761_v59 = vpop.f32.mrb[24].mxu1  ;;  %2418 = vmatprep.mubr.bf16.mxu1 %v2015_v26 }
 0x293   : > { %v6151_v41 = vpop.eup %4399  ;;  %v1762_v19 = vadd.f32 %v1761_v59, %v5541_v43  ;;  %v1763_v35 = vpop.f32.mrb[25].mxu1 }
 0x294   : > { %v6154_v52 = vpop.eup %4401  ;;  %v1764_v60 = vadd.f32 %v1763_v35, %v5545_v51  ;;  %v1765_v56 = vpop.f32.mrb[26].mxu1  ;;  %v2030_v58 = vpack.c.bf16 %v6151_v41, %v6138_v50 }
 0x295   : > { %4403 = vtanh.f32 %v1762_v19  ;;  %v1766_v42 = vadd.f32 %v1765_v56, %v5541_v43  ;;  %v1767_v12 = vpop.f32.mrb[27].mxu1  ;;  %v2031_v26 = vpack.c.bf16 %v6154_v52, %v6143_v57 }
 0x296   : > { %4405 = vtanh.f32 %v1764_v60  ;;  %v1768_v29 = vadd.f32 %v1767_v12, %v5545_v51 }
 0x297   : > { %4407 = vtanh.f32 %v1766_v42 }
 0x298   : > { %4409 = vtanh.f32 %v1768_v29 }
 0x299   : > { %2419 = vmatmul.mubr.bf16.gmra.mrb[116].mxu1 %v2014_v28 }
 0x29a   : > { %2428 = vmatprep.mubr.bf16.mxu1 %v2017_v7 }
 0x29c   : > { %v1771_v44 = vpop.f32.mrb[28].mxu1 }
 0x29d   : > { %v1772_v3 = vadd.f32 %v1771_v44, %v5541_v43  ;;  %v1773_v31 = vpop.f32.mrb[29].mxu1 }
 0x29e   : > { %v1774_v30 = vadd.f32 %v1773_v31, %v5545_v51  ;;  %v1775_v59 = vpop.f32.mrb[30].mxu1 }
 0x29f   : > { %v6171_v34 = vpop.eup %4403  ;;  %4411 = vtanh.f32 %v1772_v3  ;;  %v1776_v19 = vadd.f32 %v1775_v59, %v5541_v43  ;;  %v1777_v35 = vpop.f32.mrb[31].mxu1 }
 0x2a0   : > { %v6174_v60 = vpop.eup %4405  ;;  %4413 = vtanh.f32 %v1774_v30  ;;  %v1778_v40 = vadd.f32 %v1777_v35, %v5545_v51  ;;  %v6903_v35 = vpack.c.bf16 %v6027_v11, %v6017_v6 }
 0x2a1   : > { %v6177_v38 = vpop.eup %4407  ;;  %4415 = vtanh.f32 %v1776_v19  ;;  %2429 = vmatmul.mubr.bf16.gmra.mrb[120].mxu1 %v2016_v17 }
 0x2a2   : > { %v6182_v28 = vpop.eup %4409  ;;  %4417 = vtanh.f32 %v1778_v40  ;;  %2438 = vmatprep.mubr.bf16.mxu1 %v2019_v45  ;;  %v2032_v1 = vpack.c.bf16 %v6177_v38, %v6171_v34 }
 0x2a3   : > { %v2033_v25 = vpack.c.bf16 %v6182_v28, %v6174_v60 }
 0x2a9   : > { %v6191_v7 = vpop.eup %4411  ;;  %2439 = vmatmul.mubr.bf16.gmra.mrb[124].mxu1 %v2018_v0 }
 0x2aa   : > { %v6196_v62 = vpop.eup %4413  ;;  %v1781_v23 = vpop.f32.mrb[32].mxu1  ;;  %2448 = vmatprep.mubr.bf16.mxu1 %v2021_v2 }
 0x2ab   : > { %v6201_v17 = vpop.eup %4415  ;;  %v1782_v47 = vadd.f32 %v1781_v23, %v5541_v43  ;;  %v1783_v21 = vpop.f32.mrb[33].mxu1 }
 0x2ac   : > { %v6204_v45 = vpop.eup %4417  ;;  %v1784_v56 = vadd.f32 %v1783_v21, %v5545_v51  ;;  %v1785_v42 = vpop.f32.mrb[34].mxu1  ;;  %v2034_v27 = vpack.c.bf16 %v6201_v17, %v6191_v7 }
 0x2ad   : > { %4419 = vtanh.f32 %v1782_v47  ;;  %v1786_v36 = vadd.f32 %v1785_v42, %v5541_v43  ;;  %v1787_v0 = vpop.f32.mrb[35].mxu1  ;;  %v2035_v49 = vpack.c.bf16 %v6204_v45, %v6196_v62 }
 0x2ae   : > { %4421 = vtanh.f32 %v1784_v56  ;;  %v1788_v63 = vadd.f32 %v1787_v0, %v5545_v51 }
 0x2af   : > { %4423 = vtanh.f32 %v1786_v36 }
 0x2b0   : > { %4425 = vtanh.f32 %v1788_v63 }
 0x2b1   : > { %2449 = vmatmul.mubr.bf16.gmra.mrb[128].mxu1 %v2020_v37 }
 0x2b2   : > { %2458 = vmatprep.mubr.bf16.mxu1 %v2023_v32 }
 0x2b4   : > { %v1791_v2 = vpop.f32.mrb[36].mxu1 }
 0x2b5   : > { %v1792_v12 = vadd.f32 %v1791_v2, %v5541_v43  ;;  %v1793_v29 = vpop.f32.mrb[37].mxu1 }
 0x2b6   : > { %v1794_v44 = vadd.f32 %v1793_v29, %v5545_v51  ;;  %v1795_v3 = vpop.f32.mrb[38].mxu1 }
 0x2b7   : > { %v6221_v31 = vpop.eup %4419  ;;  %4427 = vtanh.f32 %v1792_v12  ;;  %v1796_v30 = vadd.f32 %v1795_v3, %v5541_v43  ;;  %v1797_v59 = vpop.f32.mrb[39].mxu1 }
 0x2b8   : > { %v6224_v19 = vpop.eup %4421  ;;  %4429 = vtanh.f32 %v1794_v44  ;;  %v1798_v22 = vadd.f32 %v1797_v59, %v5545_v51 }
 0x2b9   : > { %v6227_v61 = vpop.eup %4423  ;;  %4431 = vtanh.f32 %v1796_v30  ;;  %2459 = vmatmul.mubr.bf16.gmra.mrb[132].mxu1 %v2022_v9 }
 0x2ba   : > { %v6232_v37 = vpop.eup %4425  ;;  %4433 = vtanh.f32 %v1798_v22  ;;  %2468 = vmatprep.mubr.bf16.mxu1 %v2025_v48  ;;  %v2036_v55 = vpack.c.bf16 %v6227_v61, %v6221_v31 }
 0x2bb   : > { %v2037_v24 = vpack.c.bf16 %v6232_v37, %v6224_v19 }
 0x2c1   : > { %v6241_v32 = vpop.eup %4427  ;;  %2469 = vmatmul.mubr.bf16.gmra.mrb[136].mxu1 %v6903_v35 }
 0x2c2   : > { %v6246_v54 = vpop.eup %4429  ;;  %v1801_v39 = vpop.f32.mrb[40].mxu1  ;;  %2478 = vmatprep.mubr.bf16.mxu1 %v2027_v15  ;;  %v6904_v15 = vpack.c.bf16 %v6089_v4, %v6079_v33 }
 0x2c3   : > { %v6251_v9 = vpop.eup %4431  ;;  %v1802_v46 = vadd.f32 %v1801_v39, %v5541_v43  ;;  %v1803_v20 = vpop.f32.mrb[41].mxu1 }
 0x2c4   : > { %v6254_v48 = vpop.eup %4433  ;;  %v1804_v40 = vadd.f32 %v1803_v20, %v5545_v51  ;;  %v1805_v23 = vpop.f32.mrb[42].mxu1  ;;  %v2038_v6 = vpack.c.bf16 %v6251_v9, %v6241_v32 }
 0x2c5   : > { %4435 = vtanh.f32 %v1802_v46  ;;  %v1806_v11 = vadd.f32 %v1805_v23, %v5541_v43  ;;  %v1807_v47 = vpop.f32.mrb[43].mxu1  ;;  %v2039_v5 = vpack.c.bf16 %v6254_v48, %v6246_v54 }
 0x2c6   : > { %4437 = vtanh.f32 %v1804_v40  ;;  %v1808_v18 = vadd.f32 %v1807_v47, %v5545_v51 }
 0x2c7   : > { %4439 = vtanh.f32 %v1806_v11 }
 0x2c8   : > { %4441 = vtanh.f32 %v1808_v18 }
 0x2c9   : > { %2479 = vmatmul.mubr.bf16.gmra.mrb[140].mxu1 %v6904_v15 }
 0x2ca   : > { %2488 = vmatprep.mubr.bf16.mxu1 %v2029_v13 }
 0x2cc   : > { %v1811_v21 = vpop.f32.mrb[44].mxu1 }
 0x2cd   : > { %v1812_v56 = vadd.f32 %v1811_v21, %v5541_v43  ;;  %v1813_v42 = vpop.f32.mrb[45].mxu1 }
 0x2ce   : > { %v1814_v36 = vadd.f32 %v1813_v42, %v5545_v51  ;;  %v1815_v0 = vpop.f32.mrb[46].mxu1  ;;  %v2084_v42 = vld [vmem:[%s6856_s6] sm:$0x3] }
 0x2cf   : > { %v6271_v63 = vpop.eup %4435  ;;  %4443 = vtanh.f32 %v1812_v56  ;;  %v1816_v2 = vadd.f32 %v1815_v0, %v5541_v43  ;;  %v1817_v12 = vpop.f32.mrb[47].mxu1 }
 0x2d0   : > { %v6274_v29 = vpop.eup %4437  ;;  %4445 = vtanh.f32 %v1814_v36  ;;  %v1818_v33 = vadd.f32 %v1817_v12, %v5545_v51  ;;  %v6905_v12 = vld [vmem:[#allocation8_spill] sm:$0xff] }
 0x2d1   : > { %v6277_v4 = vpop.eup %4439  ;;  %4447 = vtanh.f32 %v1816_v2  ;;  %2489 = vmatmul.mubr.bf16.gmra.mrb[144].mxu1 %v2028_v10 }
 0x2d2   : > { %v6282_v14 = vpop.eup %4441  ;;  %4449 = vtanh.f32 %v1818_v33  ;;  %2498 = vmatprep.mubr.bf16.mxu1 %v2031_v26  ;;  %v2040_v8 = vpack.c.bf16 %v6277_v4, %v6271_v63 }
 0x2d3   : > { %v2041_v13 = vpack.c.bf16 %v6282_v14, %v6274_v29  ;;  %v6386_v29 = vrot.slane %v2084_v42, %v6905_v12 }
 0x2d9   : > { %v6291_v44 = vpop.eup %4443  ;;  %2499 = vmatmul.mubr.bf16.gmra.mrb[148].mxu1 %v2030_v58 }
 0x2da   : > { %v6296_v53 = vpop.eup %4445  ;;  %v1821_v16 = vpop.f32.mrb[48].mxu1  ;;  %2508 = vmatprep.mubr.bf16.mxu1 %v2033_v25 }
 0x2db   : > { %v6301_v10 = vpop.eup %4447  ;;  %v1822_v57 = vadd.f32 %v1821_v16, %v5541_v43  ;;  %v1823_v52 = vpop.f32.mrb[49].mxu1 }
 0x2dc   : > { %v6304_v26 = vpop.eup %4449  ;;  %v1824_v3 = vadd.f32 %v1823_v52, %v5545_v51  ;;  %v1825_v30 = vpop.f32.mrb[50].mxu1  ;;  %v2042_v50 = vpack.c.bf16 %v6301_v10, %v6291_v44 }
 0x2dd   : > { %4451 = vtanh.f32 %v1822_v57  ;;  %v1826_v41 = vadd.f32 %v1825_v30, %v5541_v43  ;;  %v1827_v58 = vpop.f32.mrb[51].mxu1  ;;  %v2043_v60 = vpack.c.bf16 %v6304_v26, %v6296_v53 }
 0x2de   : > { %4453 = vtanh.f32 %v1824_v3  ;;  %v1828_v28 = vadd.f32 %v1827_v58, %v5545_v51 }
 0x2df   : > { %4455 = vtanh.f32 %v1826_v41 }
 0x2e0   : > { %4457 = vtanh.f32 %v1828_v28 }
 0x2e1   : > { %2509 = vmatmul.mubr.bf16.gmra.mrb[152].mxu1 %v2032_v1 }
 0x2e2   : > { %2518 = vmatprep.mubr.bf16.mxu1 %v2035_v49 }
 0x2e4   : > { %v1831_v25 = vpop.f32.mrb[52].mxu1 }
 0x2e5   : > { %v1832_v59 = vadd.f32 %v1831_v25, %v5541_v43  ;;  %v1833_v22 = vpop.f32.mrb[53].mxu1 }
 0x2e6   : > { %v1834_v35 = vadd.f32 %v1833_v22, %v5545_v51  ;;  %v1835_v39 = vpop.f32.mrb[54].mxu1 }
 0x2e7   : > { %v6321_v46 = vpop.eup %4451  ;;  %4459 = vtanh.f32 %v1832_v59  ;;  %v1836_v20 = vadd.f32 %v1835_v39, %v5541_v43  ;;  %v1837_v40 = vpop.f32.mrb[55].mxu1 }
 0x2e8   : > { %v6324_v23 = vpop.eup %4453  ;;  %4461 = vtanh.f32 %v1834_v35  ;;  %v1838_v34 = vadd.f32 %v1837_v40, %v5545_v51 }
 0x2e9   : > { %v6327_v38 = vpop.eup %4455  ;;  %4463 = vtanh.f32 %v1836_v20  ;;  %2519 = vmatmul.mubr.bf16.gmra.mrb[156].mxu1 %v2034_v27 }
 0x2ea   : > { %v6332_v1 = vpop.eup %4457  ;;  %4465 = vtanh.f32 %v1838_v34  ;;  %2528 = vmatprep.mubr.bf16.mxu1 %v2037_v24  ;;  %v2044_v62 = vpack.c.bf16 %v6327_v38, %v6321_v46 }
 0x2eb   : > { %v2045_v45 = vpack.c.bf16 %v6332_v1, %v6324_v23 }
 0x2f1   : > { %v6341_v49 = vpop.eup %4459  ;;  %2529 = vmatmul.mubr.bf16.gmra.mrb[160].mxu1 %v2036_v55 }
 0x2f2   : > { %v6346_v7 = vpop.eup %4461  ;;  %v1841_v17 = vpop.f32.mrb[56].mxu1  ;;  %2538 = vmatprep.mubr.bf16.mxu1 %v2039_v5 }
 0x2f3   : > { %v6351_v27 = vpop.eup %4463  ;;  %v1842_v19 = vadd.f32 %v1841_v17, %v5541_v43  ;;  %v1843_v37 = vpop.f32.mrb[57].mxu1 }
 0x2f4   : > { %v6354_v24 = vpop.eup %4465  ;;  %v1844_v11 = vadd.f32 %v1843_v37, %v5545_v51  ;;  %v1845_v47 = vpop.f32.mrb[58].mxu1  ;;  %v2046_v31 = vpack.c.bf16 %v6351_v27, %v6341_v49 }
 0x2f5   : > { %4467 = vtanh.f32 %v1842_v19  ;;  %v1846_v61 = vadd.f32 %v1845_v47, %v5541_v43  ;;  %v1847_v55 = vpop.f32.mrb[59].mxu1  ;;  %v2047_v54 = vpack.c.bf16 %v6354_v24, %v6346_v7 }
 0x2f6   : > { %4469 = vtanh.f32 %v1844_v11  ;;  %v1848_v48 = vadd.f32 %v1847_v55, %v5545_v51 }
 0x2f7   : > { %4471 = vtanh.f32 %v1846_v61 }
 0x2f8   : > { %4473 = vtanh.f32 %v1848_v48 }
 0x2f9   : > { %2539 = vmatmul.mubr.bf16.gmra.mrb[164].mxu1 %v2038_v6 }
 0x2fa   : > { %2548 = vmatprep.mubr.bf16.mxu1 %v2041_v13 }
 0x2fc   : > { %v1851_v5 = vpop.f32.mrb[60].mxu1 }
 0x2fd   : > { %v1852_v18 = vadd.f32 %v1851_v5, %v5541_v43  ;;  %v1853_v15 = vpop.f32.mrb[61].mxu1 }
 0x2fe   : > { %v1854_v21 = vadd.f32 %v1853_v15, %v5545_v51  ;;  %v1855_v56 = vpop.f32.mrb[62].mxu1 }
 0x2ff   : > { %v6374_v36 = vpop.eup %4467  ;;  %4475 = vtanh.f32 %v1852_v18  ;;  %v1856_v32 = vadd.f32 %v1855_v56, %v5541_v43  ;;  %v1857_v9 = vpop.f32.mrb[63].mxu1  ;;  %v6906_v43 = vld [vmem:[#allocation7_spill] sm:$0xff] }
 0x300   : > { %v6377_v6 = vpop.eup %4469  ;;  %4477 = vtanh.f32 %v1854_v21  ;;  %v1858_v0 = vadd.f32 %v1857_v9, %v5545_v51  ;;  %v6394_v14 = vrot.slane %v2084_v42, %v6906_v43 }
 0x301   : > { %v6380_v2 = vpop.eup %4471  ;;  %4479 = vtanh.f32 %v1856_v32  ;;  %2549 = vmatmul.mubr.bf16.gmra.mrb[168].mxu1 %v2040_v8 }
 0x302   : > { %v6388_v33 = vpop.eup %4473  ;;  %4481 = vtanh.f32 %v1858_v0  ;;  %2558 = vmatprep.mubr.bf16.mxu1 %v2043_v60  ;;  %v2048_v51 = vpack.c.bf16 %v6380_v2, %v6374_v36 }
 0x303   : > { %v2049_v63 = vpack.c.bf16 %v6388_v33, %v6377_v6 }
 0x304   : > { %v2290_v4 = vpop.f32.mrb[64].mxu1 }
 0x305   : > { %v2291_v8 = vadd.f32 %v2290_v4, %v6386_v29  ;;  %v2292_v13 = vpop.f32.mrb[65].mxu1 }
 0x306   : > { %v2293_v16 = vadd.f32 %v2292_v13, %v6394_v14  ;;  %v2294_v57 = vpop.f32.mrb[66].mxu1 }
 0x307   : > { %4483 = vtanh.f32 %v2291_v8  ;;  %v2295_v53 = vadd.f32 %v2294_v57, %v6386_v29  ;;  %v2296_v52 = vpop.f32.mrb[67].mxu1 }
 0x308   : > { %4485 = vtanh.f32 %v2293_v16  ;;  %v2297_v26 = vadd.f32 %v2296_v52, %v6394_v14 }
 0x309   : > { %v6404_v3 = vpop.eup %4475  ;;  %4487 = vtanh.f32 %v2295_v53  ;;  %2559 = vmatmul.mubr.bf16.gmra.mrb[172].mxu1 %v2042_v50 }
 0x30a   : > { %v6409_v30 = vpop.eup %4477  ;;  %4489 = vtanh.f32 %v2297_v26  ;;  %2568 = vmatprep.mubr.bf16.mxu1 %v2045_v45 }
 0x30b   : > { %v6411_v41 = vpop.eup %4479 }
 0x30c   : > { %v4482_v58 = vpop.eup %4481  ;;  %v2300_v60 = vpop.f32.mrb[68].mxu1  ;;  %v2050_v28 = vpack.c.bf16 %v6411_v41, %v6404_v3 }
 0x30d   : > { %v2301_v25 = vadd.f32 %v2300_v60, %v6386_v29  ;;  %v2302_v59 = vpop.f32.mrb[69].mxu1  ;;  %v2051_v22 = vpack.c.bf16 %v4482_v58, %v6409_v30 }
 0x30e   : > { %v2303_v35 = vadd.f32 %v2302_v59, %v6394_v14  ;;  %v2304_v44 = vpop.f32.mrb[70].mxu1 }
 0x30f   : > { %4491 = vtanh.f32 %v2301_v25  ;;  %v2305_v10 = vadd.f32 %v2304_v44, %v6386_v29  ;;  %v2306_v50 = vpop.f32.mrb[71].mxu1 }
 0x310   : > { %4493 = vtanh.f32 %v2303_v35  ;;  %v2307_v39 = vadd.f32 %v2306_v50, %v6394_v14 }
 0x311   : > { %v4484_v20 = vpop.eup %4483  ;;  %4495 = vtanh.f32 %v2305_v10  ;;  %2569 = vmatmul.mubr.bf16.gmra.mrb[176].mxu1 %v2044_v62 }
 0x312   : > { %v4486_v40 = vpop.eup %4485  ;;  %4497 = vtanh.f32 %v2307_v39  ;;  %2578 = vmatprep.mubr.bf16.mxu1 %v2047_v54 }
 0x313   : > { %v4488_v23 = vpop.eup %4487 }
 0x314   : > { %v4490_v34 = vpop.eup %4489  ;;  %v2310_v1 = vpop.f32.mrb[72].mxu1  ;;  %v2737_v45 = vpack.c.bf16 %v4488_v23, %v4484_v20 }
 0x315   : > { %v2311_v17 = vadd.f32 %v2310_v1, %v6386_v29  ;;  %v2312_v19 = vpop.f32.mrb[73].mxu1  ;;  %v2738_v37 = vpack.c.bf16 %v4490_v34, %v4486_v40 }
 0x316   : > { %v2313_v11 = vadd.f32 %v2312_v19, %v6394_v14  ;;  %v2314_v47 = vpop.f32.mrb[74].mxu1 }
 0x317   : > { %4499 = vtanh.f32 %v2311_v17  ;;  %v2315_v46 = vadd.f32 %v2314_v47, %v6386_v29  ;;  %v2316_v38 = vpop.f32.mrb[75].mxu1  ;;  %2968 = vmatprep.mubr.bf16.mxu0 %v2738_v37 }
 0x318   : > { %4501 = vtanh.f32 %v2313_v11  ;;  %v2317_v62 = vadd.f32 %v2316_v38, %v6394_v14  ;;  %2969 = vmatmul.mubr.bf16.vlgmr.msra.gmra.mrb[64].mxu0 %v2737_v45 }
 0x319   : > { %v4492_v7 = vpop.eup %4491  ;;  %4503 = vtanh.f32 %v2315_v46  ;;  %2579 = vmatmul.mubr.bf16.gmra.mrb[180].mxu1 %v2046_v31 }
 0x31a   : > { %v4494_v24 = vpop.eup %4493  ;;  %4505 = vtanh.f32 %v2317_v62  ;;  %2588 = vmatprep.mubr.bf16.mxu1 %v2049_v63 }
 0x31b   : > { %v4496_v61 = vpop.eup %4495 }
 0x31c   : > { %v4498_v55 = vpop.eup %4497  ;;  %v2320_v54 = vpop.f32.mrb[76].mxu1  ;;  %v2739_v48 = vpack.c.bf16 %v4496_v61, %v4492_v7 }
 0x31d   : > { %v2321_v5 = vadd.f32 %v2320_v54, %v6386_v29  ;;  %v2322_v18 = vpop.f32.mrb[77].mxu1  ;;  %v2740_v15 = vpack.c.bf16 %v4498_v55, %v4494_v24 }
 0x31e   : > { %v2323_v21 = vadd.f32 %v2322_v18, %v6394_v14  ;;  %v2324_v56 = vpop.f32.mrb[78].mxu1 }
 0x31f   : > { %4507 = vtanh.f32 %v2321_v5  ;;  %v2325_v42 = vadd.f32 %v2324_v56, %v6386_v29  ;;  %v2326_v32 = vpop.f32.mrb[79].mxu1  ;;  %2976 = vmatprep.mubr.bf16.mxu0 %v2740_v15 }
 0x320   : > { %4509 = vtanh.f32 %v2323_v21  ;;  %v2327_v49 = vadd.f32 %v2326_v32, %v6394_v14  ;;  %2977 = vmatmul.mubr.bf16.gmra.mrb[68].mxu0 %v2739_v48 }
 0x321   : > { %v4500_v27 = vpop.eup %4499  ;;  %4511 = vtanh.f32 %v2325_v42  ;;  %2589 = vmatmul.mubr.bf16.gmra.mrb[184].mxu1 %v2048_v51 }
 0x322   : > { %v4502_v31 = vpop.eup %4501  ;;  %4513 = vtanh.f32 %v2327_v49  ;;  %2598 = vmatprep.mubr.bf16.mxu1 %v2051_v22 }
 0x323   : > { %v4504_v9 = vpop.eup %4503 }
 0x324   : > { %v4506_v6 = vpop.eup %4505  ;;  %v2330_v0 = vpop.f32.mrb[80].mxu1  ;;  %v2741_v12 = vpack.c.bf16 %v4504_v9, %v4500_v27 }
 0x325   : > { %v2331_v33 = vadd.f32 %v2330_v0, %v6386_v29  ;;  %v2332_v43 = vpop.f32.mrb[81].mxu1  ;;  %v2742_v63 = vpack.c.bf16 %v4506_v6, %v4502_v31 }
 0x326   : > { %v2333_v4 = vadd.f32 %v2332_v43, %v6394_v14  ;;  %v2334_v8 = vpop.f32.mrb[82].mxu1 }
 0x327   : > { %4515 = vtanh.f32 %v2331_v33  ;;  %v2335_v13 = vadd.f32 %v2334_v8, %v6386_v29  ;;  %v2336_v16 = vpop.f32.mrb[83].mxu1  ;;  %2984 = vmatprep.mubr.bf16.mxu0 %v2742_v63 }
 0x328   : > { %4517 = vtanh.f32 %v2333_v4  ;;  %v2337_v36 = vadd.f32 %v2336_v16, %v6394_v14  ;;  %2985 = vmatmul.mubr.bf16.gmra.mrb[72].mxu0 %v2741_v12 }
 0x329   : > { %v4508_v2 = vpop.eup %4507  ;;  %4519 = vtanh.f32 %v2335_v13  ;;  %2599 = vmatmul.mubr.bf16.gmra.mrb[188].mxu1 %v2050_v28 }
 0x32a   : > { %v4510_v51 = vpop.eup %4509  ;;  %4521 = vtanh.f32 %v2337_v36 }
 0x32b   : > { %v4512_v57 = vpop.eup %4511 }
 0x32c   : > { %v4514_v53 = vpop.eup %4513  ;;  %v2340_v52 = vpop.f32.mrb[84].mxu1  ;;  %v2743_v26 = vpack.c.bf16 %v4512_v57, %v4508_v2 }
 0x32d   : > { %v2341_v30 = vadd.f32 %v2340_v52, %v6386_v29  ;;  %v2342_v58 = vpop.f32.mrb[85].mxu1  ;;  %v2744_v60 = vpack.c.bf16 %v4514_v53, %v4510_v51 }
 0x32e   : > { %v2343_v25 = vadd.f32 %v2342_v58, %v6394_v14  ;;  %v2344_v59 = vpop.f32.mrb[86].mxu1 }
 0x32f   : > { %4523 = vtanh.f32 %v2341_v30  ;;  %v2345_v22 = vadd.f32 %v2344_v59, %v6386_v29  ;;  %v2346_v35 = vpop.f32.mrb[87].mxu1  ;;  %2992 = vmatprep.mubr.bf16.mxu0 %v2744_v60 }
 0x330   : > { %4525 = vtanh.f32 %v2343_v25  ;;  %v2347_v3 = vadd.f32 %v2346_v35, %v6394_v14  ;;  %2993 = vmatmul.mubr.bf16.gmra.mrb[76].mxu0 %v2743_v26 }
 0x331   : > { %v4516_v41 = vpop.eup %4515  ;;  %4527 = vtanh.f32 %v2345_v22 }
 0x332   : > { %v4518_v28 = vpop.eup %4517  ;;  %4529 = vtanh.f32 %v2347_v3 }
 0x333   : > { %v4520_v44 = vpop.eup %4519 }
 0x334   : > { %v4522_v10 = vpop.eup %4521  ;;  %v2350_v50 = vpop.f32.mrb[88].mxu1  ;;  %v2745_v39 = vpack.c.bf16 %v4520_v44, %v4516_v41 }
 0x335   : > { %v2351_v20 = vadd.f32 %v2350_v50, %v6386_v29  ;;  %v2352_v40 = vpop.f32.mrb[89].mxu1  ;;  %v2746_v23 = vpack.c.bf16 %v4522_v10, %v4518_v28 }
 0x336   : > { %v2353_v34 = vadd.f32 %v2352_v40, %v6394_v14  ;;  %v2354_v1 = vpop.f32.mrb[90].mxu1 }
 0x337   : > { %4531 = vtanh.f32 %v2351_v20  ;;  %v2355_v45 = vadd.f32 %v2354_v1, %v6386_v29  ;;  %v2356_v17 = vpop.f32.mrb[91].mxu1  ;;  %3000 = vmatprep.mubr.bf16.mxu0 %v2746_v23 }
 0x338   : > { %4533 = vtanh.f32 %v2353_v34  ;;  %v2357_v19 = vadd.f32 %v2356_v17, %v6394_v14  ;;  %3001 = vmatmul.mubr.bf16.gmra.mrb[80].mxu0 %v2745_v39 }
 0x339   : > { %v4524_v37 = vpop.eup %4523  ;;  %4535 = vtanh.f32 %v2355_v45 }
 0x33a   : > { %v4526_v11 = vpop.eup %4525  ;;  %4537 = vtanh.f32 %v2357_v19 }
 0x33b   : > { %v4528_v47 = vpop.eup %4527 }
 0x33c   : > { %v4530_v46 = vpop.eup %4529  ;;  %v2360_v38 = vpop.f32.mrb[92].mxu1  ;;  %v2747_v62 = vpack.c.bf16 %v4528_v47, %v4524_v37 }
 0x33d   : > { %v2361_v7 = vadd.f32 %v2360_v38, %v6386_v29  ;;  %v2362_v24 = vpop.f32.mrb[93].mxu1  ;;  %v2748_v61 = vpack.c.bf16 %v4530_v46, %v4526_v11 }
 0x33e   : > { %v2363_v55 = vadd.f32 %v2362_v24, %v6394_v14  ;;  %v2364_v54 = vpop.f32.mrb[94].mxu1 }
 0x33f   : > { %4539 = vtanh.f32 %v2361_v7  ;;  %v2365_v48 = vadd.f32 %v2364_v54, %v6386_v29  ;;  %v2366_v5 = vpop.f32.mrb[95].mxu1  ;;  %3008 = vmatprep.mubr.bf16.mxu0 %v2748_v61 }
 0x340   : > { %4541 = vtanh.f32 %v2363_v55  ;;  %v2367_v18 = vadd.f32 %v2366_v5, %v6394_v14  ;;  %3009 = vmatmul.mubr.bf16.gmra.mrb[84].mxu0 %v2747_v62 }
 0x341   : > { %v4532_v15 = vpop.eup %4531  ;;  %4543 = vtanh.f32 %v2365_v48 }
 0x342   : > { %v4534_v21 = vpop.eup %4533  ;;  %4545 = vtanh.f32 %v2367_v18 }
 0x343   : > { %v4536_v56 = vpop.eup %4535 }
 0x344   : > { %v4538_v42 = vpop.eup %4537  ;;  %v2370_v32 = vpop.f32.mrb[96].mxu1  ;;  %v2749_v49 = vpack.c.bf16 %v4536_v56, %v4532_v15 }
 0x345   : > { %v2371_v27 = vadd.f32 %v2370_v32, %v6386_v29  ;;  %v2372_v31 = vpop.f32.mrb[97].mxu1  ;;  %v2750_v9 = vpack.c.bf16 %v4538_v42, %v4534_v21 }
 0x346   : > { %v2373_v6 = vadd.f32 %v2372_v31, %v6394_v14  ;;  %v2374_v0 = vpop.f32.mrb[98].mxu1 }
 0x347   : > { %4547 = vtanh.f32 %v2371_v27  ;;  %v2375_v12 = vadd.f32 %v2374_v0, %v6386_v29  ;;  %v2376_v33 = vpop.f32.mrb[99].mxu1  ;;  %3016 = vmatprep.mubr.bf16.mxu0 %v2750_v9 }
 0x348   : > { %4549 = vtanh.f32 %v2373_v6  ;;  %v2377_v43 = vadd.f32 %v2376_v33, %v6394_v14  ;;  %3017 = vmatmul.mubr.bf16.gmra.mrb[88].mxu0 %v2749_v49 }
 0x349   : > { %v4540_v63 = vpop.eup %4539  ;;  %4551 = vtanh.f32 %v2375_v12 }
 0x34a   : > { %v4542_v4 = vpop.eup %4541  ;;  %4553 = vtanh.f32 %v2377_v43 }
 0x34b   : > { %v4544_v8 = vpop.eup %4543 }
 0x34c   : > { %v4546_v13 = vpop.eup %4545  ;;  %v2380_v16 = vpop.f32.mrb[100].mxu1  ;;  %v2751_v36 = vpack.c.bf16 %v4544_v8, %v4540_v63 }
 0x34d   : > { %v2381_v2 = vadd.f32 %v2380_v16, %v6386_v29  ;;  %v2382_v51 = vpop.f32.mrb[101].mxu1  ;;  %v2752_v57 = vpack.c.bf16 %v4546_v13, %v4542_v4 }
 0x34e   : > { %v2383_v53 = vadd.f32 %v2382_v51, %v6394_v14  ;;  %v2384_v52 = vpop.f32.mrb[102].mxu1 }
 0x34f   : > { %4555 = vtanh.f32 %v2381_v2  ;;  %v2385_v26 = vadd.f32 %v2384_v52, %v6386_v29  ;;  %v2386_v30 = vpop.f32.mrb[103].mxu1  ;;  %3024 = vmatprep.mubr.bf16.mxu0 %v2752_v57 }
 0x350   : > { %4557 = vtanh.f32 %v2383_v53  ;;  %v2387_v58 = vadd.f32 %v2386_v30, %v6394_v14  ;;  %3025 = vmatmul.mubr.bf16.gmra.mrb[92].mxu0 %v2751_v36 }
 0x351   : > { %v4548_v60 = vpop.eup %4547  ;;  %4559 = vtanh.f32 %v2385_v26 }
 0x352   : > { %v4550_v25 = vpop.eup %4549  ;;  %4561 = vtanh.f32 %v2387_v58 }
 0x353   : > { %v4552_v59 = vpop.eup %4551 }
 0x354   : > { %v4554_v22 = vpop.eup %4553  ;;  %v2390_v35 = vpop.f32.mrb[104].mxu1  ;;  %v2753_v3 = vpack.c.bf16 %v4552_v59, %v4548_v60 }
 0x355   : > { %v2391_v41 = vadd.f32 %v2390_v35, %v6386_v29  ;;  %v2392_v28 = vpop.f32.mrb[105].mxu1  ;;  %v2754_v44 = vpack.c.bf16 %v4554_v22, %v4550_v25 }
 0x356   : > { %v2393_v10 = vadd.f32 %v2392_v28, %v6394_v14  ;;  %v2394_v50 = vpop.f32.mrb[106].mxu1 }
 0x357   : > { %4563 = vtanh.f32 %v2391_v41  ;;  %v2395_v39 = vadd.f32 %v2394_v50, %v6386_v29  ;;  %v2396_v20 = vpop.f32.mrb[107].mxu1  ;;  %3032 = vmatprep.mubr.bf16.mxu0 %v2754_v44 }
 0x358   : > { %4565 = vtanh.f32 %v2393_v10  ;;  %v2397_v40 = vadd.f32 %v2396_v20, %v6394_v14  ;;  %3033 = vmatmul.mubr.bf16.gmra.mrb[96].mxu0 %v2753_v3 }
 0x359   : > { %v4556_v23 = vpop.eup %4555  ;;  %4567 = vtanh.f32 %v2395_v39 }
 0x35a   : > { %v4558_v34 = vpop.eup %4557  ;;  %4569 = vtanh.f32 %v2397_v40 }
 0x35b   : > { %v4560_v1 = vpop.eup %4559 }
 0x35c   : > { %v4562_v45 = vpop.eup %4561  ;;  %v2400_v17 = vpop.f32.mrb[108].mxu1  ;;  %v2755_v19 = vpack.c.bf16 %v4560_v1, %v4556_v23 }
 0x35d   : > { %v2401_v37 = vadd.f32 %v2400_v17, %v6386_v29  ;;  %v2402_v11 = vpop.f32.mrb[109].mxu1  ;;  %v2756_v47 = vpack.c.bf16 %v4562_v45, %v4558_v34 }
 0x35e   : > { %v2403_v46 = vadd.f32 %v2402_v11, %v6394_v14  ;;  %v2404_v38 = vpop.f32.mrb[110].mxu1 }
 0x35f   : > { %4571 = vtanh.f32 %v2401_v37  ;;  %v2405_v62 = vadd.f32 %v2404_v38, %v6386_v29  ;;  %v2406_v7 = vpop.f32.mrb[111].mxu1  ;;  %3040 = vmatprep.mubr.bf16.mxu0 %v2756_v47 }
 0x360   : > { %4573 = vtanh.f32 %v2403_v46  ;;  %v2407_v24 = vadd.f32 %v2406_v7, %v6394_v14  ;;  %3041 = vmatmul.mubr.bf16.gmra.mrb[100].mxu0 %v2755_v19 }
 0x361   : > { %v4564_v61 = vpop.eup %4563  ;;  %4575 = vtanh.f32 %v2405_v62 }
 0x362   : > { %v4566_v55 = vpop.eup %4565  ;;  %4577 = vtanh.f32 %v2407_v24 }
 0x363   : > { %v4568_v54 = vpop.eup %4567 }
 0x364   : > { %v4570_v48 = vpop.eup %4569  ;;  %v2410_v5 = vpop.f32.mrb[112].mxu1  ;;  %v2757_v18 = vpack.c.bf16 %v4568_v54, %v4564_v61 }
 0x365   : > { %v2411_v15 = vadd.f32 %v2410_v5, %v6386_v29  ;;  %v2412_v21 = vpop.f32.mrb[113].mxu1  ;;  %v2758_v56 = vpack.c.bf16 %v4570_v48, %v4566_v55 }
 0x366   : > { %v2413_v42 = vadd.f32 %v2412_v21, %v6394_v14  ;;  %v2414_v32 = vpop.f32.mrb[114].mxu1 }
 0x367   : > { %4579 = vtanh.f32 %v2411_v15  ;;  %v2415_v49 = vadd.f32 %v2414_v32, %v6386_v29  ;;  %v2416_v27 = vpop.f32.mrb[115].mxu1  ;;  %3048 = vmatprep.mubr.bf16.mxu0 %v2758_v56 }
 0x368   : > { %4581 = vtanh.f32 %v2413_v42  ;;  %v2417_v31 = vadd.f32 %v2416_v27, %v6394_v14  ;;  %3049 = vmatmul.mubr.bf16.gmra.mrb[104].mxu0 %v2757_v18 }
 0x369   : > { %v4572_v9 = vpop.eup %4571  ;;  %4583 = vtanh.f32 %v2415_v49 }
 0x36a   : > { %v4574_v6 = vpop.eup %4573  ;;  %4585 = vtanh.f32 %v2417_v31 }
 0x36b   : > { %v4576_v0 = vpop.eup %4575 }
 0x36c   : > { %v4578_v12 = vpop.eup %4577  ;;  %v2420_v33 = vpop.f32.mrb[116].mxu1  ;;  %v2759_v43 = vpack.c.bf16 %v4576_v0, %v4572_v9 }
 0x36d   : > { %v2421_v63 = vadd.f32 %v2420_v33, %v6386_v29  ;;  %v2422_v4 = vpop.f32.mrb[117].mxu1  ;;  %v2760_v8 = vpack.c.bf16 %v4578_v12, %v4574_v6 }
 0x36e   : > { %v2423_v13 = vadd.f32 %v2422_v4, %v6394_v14  ;;  %v2424_v16 = vpop.f32.mrb[118].mxu1 }
 0x36f   : > { %4587 = vtanh.f32 %v2421_v63  ;;  %v2425_v36 = vadd.f32 %v2424_v16, %v6386_v29  ;;  %v2426_v2 = vpop.f32.mrb[119].mxu1  ;;  %3056 = vmatprep.mubr.bf16.mxu0 %v2760_v8 }
 0x370   : > { %4589 = vtanh.f32 %v2423_v13  ;;  %v2427_v51 = vadd.f32 %v2426_v2, %v6394_v14  ;;  %3057 = vmatmul.mubr.bf16.gmra.mrb[108].mxu0 %v2759_v43 }
 0x371   : > { %v4580_v57 = vpop.eup %4579  ;;  %4591 = vtanh.f32 %v2425_v36 }
 0x372   : > { %v4582_v53 = vpop.eup %4581  ;;  %4593 = vtanh.f32 %v2427_v51 }
 0x373   : > { %v4584_v52 = vpop.eup %4583 }
 0x374   : > { %v4586_v26 = vpop.eup %4585  ;;  %v2430_v30 = vpop.f32.mrb[120].mxu1  ;;  %v2761_v58 = vpack.c.bf16 %v4584_v52, %v4580_v57 }
 0x375   : > { %v2431_v60 = vadd.f32 %v2430_v30, %v6386_v29  ;;  %v2432_v25 = vpop.f32.mrb[121].mxu1  ;;  %v2762_v59 = vpack.c.bf16 %v4586_v26, %v4582_v53 }
 0x376   : > { %v2433_v22 = vadd.f32 %v2432_v25, %v6394_v14  ;;  %v2434_v35 = vpop.f32.mrb[122].mxu1 }
 0x377   : > { %4595 = vtanh.f32 %v2431_v60  ;;  %v2435_v3 = vadd.f32 %v2434_v35, %v6386_v29  ;;  %v2436_v41 = vpop.f32.mrb[123].mxu1  ;;  %3064 = vmatprep.mubr.bf16.mxu0 %v2762_v59 }
 0x378   : > { %4597 = vtanh.f32 %v2433_v22  ;;  %v2437_v28 = vadd.f32 %v2436_v41, %v6394_v14  ;;  %3065 = vmatmul.mubr.bf16.gmra.mrb[112].mxu0 %v2761_v58 }
 0x379   : > { %v4588_v44 = vpop.eup %4587  ;;  %4599 = vtanh.f32 %v2435_v3 }
 0x37a   : > { %v4590_v10 = vpop.eup %4589  ;;  %4601 = vtanh.f32 %v2437_v28 }
 0x37b   : > { %v4592_v50 = vpop.eup %4591 }
 0x37c   : > { %v4594_v39 = vpop.eup %4593  ;;  %v2440_v20 = vpop.f32.mrb[124].mxu1  ;;  %v2763_v40 = vpack.c.bf16 %v4592_v50, %v4588_v44 }
 0x37d   : > { %v2441_v23 = vadd.f32 %v2440_v20, %v6386_v29  ;;  %v2442_v34 = vpop.f32.mrb[125].mxu1  ;;  %v2764_v1 = vpack.c.bf16 %v4594_v39, %v4590_v10 }
 0x37e   : > { %v2443_v45 = vadd.f32 %v2442_v34, %v6394_v14  ;;  %v2444_v17 = vpop.f32.mrb[126].mxu1 }
 0x37f   : > { %4603 = vtanh.f32 %v2441_v23  ;;  %v2445_v19 = vadd.f32 %v2444_v17, %v6386_v29  ;;  %v2446_v37 = vpop.f32.mrb[127].mxu1  ;;  %3072 = vmatprep.mubr.bf16.mxu0 %v2764_v1 }
 0x380   : > { %4605 = vtanh.f32 %v2443_v45  ;;  %v2447_v11 = vadd.f32 %v2446_v37, %v6394_v14  ;;  %3073 = vmatmul.mubr.bf16.gmra.mrb[116].mxu0 %v2763_v40 }
 0x381   : > { %v4596_v47 = vpop.eup %4595  ;;  %4607 = vtanh.f32 %v2445_v19 }
 0x382   : > { %v4598_v46 = vpop.eup %4597  ;;  %4609 = vtanh.f32 %v2447_v11 }
 0x383   : > { %v4600_v38 = vpop.eup %4599 }
 0x384   : > { %v4602_v62 = vpop.eup %4601  ;;  %v2450_v7 = vpop.f32.mrb[128].mxu1  ;;  %v2765_v24 = vpack.c.bf16 %v4600_v38, %v4596_v47 }
 0x385   : > { %v2451_v61 = vadd.f32 %v2450_v7, %v6386_v29  ;;  %v2452_v55 = vpop.f32.mrb[129].mxu1  ;;  %v2766_v54 = vpack.c.bf16 %v4602_v62, %v4598_v46 }
 0x386   : > { %v2453_v48 = vadd.f32 %v2452_v55, %v6394_v14  ;;  %v2454_v5 = vpop.f32.mrb[130].mxu1 }
 0x387   : > { %4611 = vtanh.f32 %v2451_v61  ;;  %v2455_v18 = vadd.f32 %v2454_v5, %v6386_v29  ;;  %v2456_v15 = vpop.f32.mrb[131].mxu1  ;;  %3080 = vmatprep.mubr.bf16.mxu0 %v2766_v54 }
 0x388   : > { %4613 = vtanh.f32 %v2453_v48  ;;  %v2457_v21 = vadd.f32 %v2456_v15, %v6394_v14  ;;  %3081 = vmatmul.mubr.bf16.gmra.mrb[120].mxu0 %v2765_v24 }
 0x389   : > { %v4604_v56 = vpop.eup %4603  ;;  %4615 = vtanh.f32 %v2455_v18 }
 0x38a   : > { %v4606_v42 = vpop.eup %4605  ;;  %4617 = vtanh.f32 %v2457_v21 }
 0x38b   : > { %v4608_v32 = vpop.eup %4607 }
 0x38c   : > { %v4610_v49 = vpop.eup %4609  ;;  %v2460_v27 = vpop.f32.mrb[132].mxu1  ;;  %v2767_v31 = vpack.c.bf16 %v4608_v32, %v4604_v56 }
 0x38d   : > { %v2461_v9 = vadd.f32 %v2460_v27, %v6386_v29  ;;  %v2462_v6 = vpop.f32.mrb[133].mxu1  ;;  %v2768_v0 = vpack.c.bf16 %v4610_v49, %v4606_v42 }
 0x38e   : > { %v2463_v12 = vadd.f32 %v2462_v6, %v6394_v14  ;;  %v2464_v33 = vpop.f32.mrb[134].mxu1 }
 0x38f   : > { %4619 = vtanh.f32 %v2461_v9  ;;  %v2465_v43 = vadd.f32 %v2464_v33, %v6386_v29  ;;  %v2466_v63 = vpop.f32.mrb[135].mxu1  ;;  %3088 = vmatprep.mubr.bf16.mxu0 %v2768_v0 }
 0x390   : > { %4621 = vtanh.f32 %v2463_v12  ;;  %v2467_v4 = vadd.f32 %v2466_v63, %v6394_v14  ;;  %3089 = vmatmul.mubr.bf16.gmra.mrb[124].mxu0 %v2767_v31 }
 0x391   : > { %v4612_v8 = vpop.eup %4611  ;;  %4623 = vtanh.f32 %v2465_v43 }
 0x392   : > { %v4614_v13 = vpop.eup %4613  ;;  %4625 = vtanh.f32 %v2467_v4 }
 0x393   : > { %v4616_v16 = vpop.eup %4615 }
 0x394   : > { %v4618_v36 = vpop.eup %4617  ;;  %v2470_v2 = vpop.f32.mrb[136].mxu1  ;;  %v2769_v51 = vpack.c.bf16 %v4616_v16, %v4612_v8 }
 0x395   : > { %v2471_v57 = vadd.f32 %v2470_v2, %v6386_v29  ;;  %v2472_v53 = vpop.f32.mrb[137].mxu1  ;;  %v2770_v52 = vpack.c.bf16 %v4618_v36, %v4614_v13 }
 0x396   : > { %v2473_v26 = vadd.f32 %v2472_v53, %v6394_v14  ;;  %v2474_v30 = vpop.f32.mrb[138].mxu1 }
 0x397   : > { %4627 = vtanh.f32 %v2471_v57  ;;  %v2475_v58 = vadd.f32 %v2474_v30, %v6386_v29  ;;  %v2476_v60 = vpop.f32.mrb[139].mxu1  ;;  %3096 = vmatprep.mubr.bf16.mxu0 %v2770_v52 }
 0x398   : > { %4629 = vtanh.f32 %v2473_v26  ;;  %v2477_v25 = vadd.f32 %v2476_v60, %v6394_v14  ;;  %3097 = vmatmul.mubr.bf16.gmra.mrb[128].mxu0 %v2769_v51 }
 0x399   : > { %v4620_v59 = vpop.eup %4619  ;;  %4631 = vtanh.f32 %v2475_v58 }
 0x39a   : > { %v4622_v22 = vpop.eup %4621  ;;  %4633 = vtanh.f32 %v2477_v25 }
 0x39b   : > { %v4624_v35 = vpop.eup %4623 }
 0x39c   : > { %v4626_v3 = vpop.eup %4625  ;;  %v2480_v41 = vpop.f32.mrb[140].mxu1  ;;  %v2771_v28 = vpack.c.bf16 %v4624_v35, %v4620_v59 }
 0x39d   : > { %v2481_v44 = vadd.f32 %v2480_v41, %v6386_v29  ;;  %v2482_v10 = vpop.f32.mrb[141].mxu1  ;;  %v2772_v50 = vpack.c.bf16 %v4626_v3, %v4622_v22 }
 0x39e   : > { %v2483_v39 = vadd.f32 %v2482_v10, %v6394_v14  ;;  %v2484_v20 = vpop.f32.mrb[142].mxu1 }
 0x39f   : > { %4635 = vtanh.f32 %v2481_v44  ;;  %v2485_v40 = vadd.f32 %v2484_v20, %v6386_v29  ;;  %v2486_v23 = vpop.f32.mrb[143].mxu1  ;;  %3104 = vmatprep.mubr.bf16.mxu0 %v2772_v50 }
 0x3a0   : > { %4637 = vtanh.f32 %v2483_v39  ;;  %v2487_v34 = vadd.f32 %v2486_v23, %v6394_v14  ;;  %3105 = vmatmul.mubr.bf16.gmra.mrb[132].mxu0 %v2771_v28 }
 0x3a1   : > { %v4628_v1 = vpop.eup %4627  ;;  %4639 = vtanh.f32 %v2485_v40 }
 0x3a2   : > { %v4630_v45 = vpop.eup %4629  ;;  %4641 = vtanh.f32 %v2487_v34 }
 0x3a3   : > { %v4632_v17 = vpop.eup %4631 }
 0x3a4   : > { %v4634_v19 = vpop.eup %4633  ;;  %v2490_v37 = vpop.f32.mrb[144].mxu1  ;;  %v2773_v11 = vpack.c.bf16 %v4632_v17, %v4628_v1 }
 0x3a5   : > { %v2491_v47 = vadd.f32 %v2490_v37, %v6386_v29  ;;  %v2492_v46 = vpop.f32.mrb[145].mxu1  ;;  %v2774_v38 = vpack.c.bf16 %v4634_v19, %v4630_v45 }
 0x3a6   : > { %v2493_v62 = vadd.f32 %v2492_v46, %v6394_v14  ;;  %v2494_v7 = vpop.f32.mrb[146].mxu1 }
 0x3a7   : > { %4643 = vtanh.f32 %v2491_v47  ;;  %v2495_v24 = vadd.f32 %v2494_v7, %v6386_v29  ;;  %v2496_v61 = vpop.f32.mrb[147].mxu1  ;;  %3112 = vmatprep.mubr.bf16.mxu0 %v2774_v38 }
 0x3a8   : > { %4645 = vtanh.f32 %v2493_v62  ;;  %v2497_v55 = vadd.f32 %v2496_v61, %v6394_v14  ;;  %3113 = vmatmul.mubr.bf16.gmra.mrb[136].mxu0 %v2773_v11 }
 0x3a9   : > { %v4636_v54 = vpop.eup %4635  ;;  %4647 = vtanh.f32 %v2495_v24 }
 0x3aa   : > { %v4638_v48 = vpop.eup %4637  ;;  %4649 = vtanh.f32 %v2497_v55 }
 0x3ab   : > { %v4640_v5 = vpop.eup %4639 }
 0x3ac   : > { %v4642_v18 = vpop.eup %4641  ;;  %v2500_v15 = vpop.f32.mrb[148].mxu1  ;;  %v2775_v21 = vpack.c.bf16 %v4640_v5, %v4636_v54 }
 0x3ad   : > { %v2501_v56 = vadd.f32 %v2500_v15, %v6386_v29  ;;  %v2502_v42 = vpop.f32.mrb[149].mxu1  ;;  %v2776_v32 = vpack.c.bf16 %v4642_v18, %v4638_v48 }
 0x3ae   : > { %v2503_v49 = vadd.f32 %v2502_v42, %v6394_v14  ;;  %v2504_v27 = vpop.f32.mrb[150].mxu1 }
 0x3af   : > { %4651 = vtanh.f32 %v2501_v56  ;;  %v2505_v31 = vadd.f32 %v2504_v27, %v6386_v29  ;;  %v2506_v9 = vpop.f32.mrb[151].mxu1  ;;  %3120 = vmatprep.mubr.bf16.mxu0 %v2776_v32 }
 0x3b0   : > { %4653 = vtanh.f32 %v2503_v49  ;;  %v2507_v6 = vadd.f32 %v2506_v9, %v6394_v14  ;;  %3121 = vmatmul.mubr.bf16.gmra.mrb[140].mxu0 %v2775_v21 }
 0x3b1   : > { %v4644_v0 = vpop.eup %4643  ;;  %4655 = vtanh.f32 %v2505_v31 }
 0x3b2   : > { %v4646_v12 = vpop.eup %4645  ;;  %4657 = vtanh.f32 %v2507_v6 }
 0x3b3   : > { %v4648_v33 = vpop.eup %4647 }
 0x3b4   : > { %v4650_v43 = vpop.eup %4649  ;;  %v2510_v63 = vpop.f32.mrb[152].mxu1  ;;  %v2777_v4 = vpack.c.bf16 %v4648_v33, %v4644_v0 }
 0x3b5   : > { %v2511_v8 = vadd.f32 %v2510_v63, %v6386_v29  ;;  %v2512_v13 = vpop.f32.mrb[153].mxu1  ;;  %v2778_v16 = vpack.c.bf16 %v4650_v43, %v4646_v12 }
 0x3b6   : > { %v2513_v36 = vadd.f32 %v2512_v13, %v6394_v14  ;;  %v2514_v2 = vpop.f32.mrb[154].mxu1 }
 0x3b7   : > { %4659 = vtanh.f32 %v2511_v8  ;;  %v2515_v51 = vadd.f32 %v2514_v2, %v6386_v29  ;;  %v2516_v57 = vpop.f32.mrb[155].mxu1  ;;  %3128 = vmatprep.mubr.bf16.mxu0 %v2778_v16 }
 0x3b8   : > { %4661 = vtanh.f32 %v2513_v36  ;;  %v2517_v53 = vadd.f32 %v2516_v57, %v6394_v14  ;;  %3129 = vmatmul.mubr.bf16.gmra.mrb[144].mxu0 %v2777_v4 }
 0x3b9   : > { %v4652_v52 = vpop.eup %4651  ;;  %4663 = vtanh.f32 %v2515_v51 }
 0x3ba   : > { %v4654_v26 = vpop.eup %4653  ;;  %4665 = vtanh.f32 %v2517_v53 }
 0x3bb   : > { %v4656_v30 = vpop.eup %4655 }
 0x3bc   : > { %v4658_v58 = vpop.eup %4657  ;;  %v2520_v60 = vpop.f32.mrb[156].mxu1  ;;  %v2779_v25 = vpack.c.bf16 %v4656_v30, %v4652_v52 }
 0x3bd   : > { %v2521_v59 = vadd.f32 %v2520_v60, %v6386_v29  ;;  %v2522_v22 = vpop.f32.mrb[157].mxu1  ;;  %v2780_v35 = vpack.c.bf16 %v4658_v58, %v4654_v26 }
 0x3be   : > { %v2523_v3 = vadd.f32 %v2522_v22, %v6394_v14  ;;  %v2524_v41 = vpop.f32.mrb[158].mxu1 }
 0x3bf   : > { %4667 = vtanh.f32 %v2521_v59  ;;  %v2525_v28 = vadd.f32 %v2524_v41, %v6386_v29  ;;  %v2526_v44 = vpop.f32.mrb[159].mxu1  ;;  %3136 = vmatprep.mubr.bf16.mxu0 %v2780_v35 }
 0x3c0   : > { %4669 = vtanh.f32 %v2523_v3  ;;  %v2527_v10 = vadd.f32 %v2526_v44, %v6394_v14  ;;  %3137 = vmatmul.mubr.bf16.gmra.mrb[148].mxu0 %v2779_v25 }
 0x3c1   : > { %v4660_v50 = vpop.eup %4659  ;;  %4671 = vtanh.f32 %v2525_v28 }
 0x3c2   : > { %v4662_v39 = vpop.eup %4661  ;;  %4673 = vtanh.f32 %v2527_v10 }
 0x3c3   : > { %v4664_v20 = vpop.eup %4663 }
 0x3c4   : > { %v4666_v40 = vpop.eup %4665  ;;  %v2530_v23 = vpop.f32.mrb[160].mxu1  ;;  %v2781_v34 = vpack.c.bf16 %v4664_v20, %v4660_v50 }
 0x3c5   : > { %v2531_v1 = vadd.f32 %v2530_v23, %v6386_v29  ;;  %v2532_v45 = vpop.f32.mrb[161].mxu1  ;;  %v2782_v17 = vpack.c.bf16 %v4666_v40, %v4662_v39 }
 0x3c6   : > { %v2533_v19 = vadd.f32 %v2532_v45, %v6394_v14  ;;  %v2534_v37 = vpop.f32.mrb[162].mxu1 }
 0x3c7   : > { %4675 = vtanh.f32 %v2531_v1  ;;  %v2535_v11 = vadd.f32 %v2534_v37, %v6386_v29  ;;  %v2536_v47 = vpop.f32.mrb[163].mxu1  ;;  %3144 = vmatprep.mubr.bf16.mxu0 %v2782_v17 }
 0x3c8   : > { %4677 = vtanh.f32 %v2533_v19  ;;  %v2537_v46 = vadd.f32 %v2536_v47, %v6394_v14  ;;  %3145 = vmatmul.mubr.bf16.gmra.mrb[152].mxu0 %v2781_v34  ;;  %v6546_v19 = vld [vmem:[%s6858_s8] ss:$0 sm:$0xff] }
 0x3c9   : > { %v4668_v38 = vpop.eup %4667  ;;  %4679 = vtanh.f32 %v2535_v11 }
 0x3ca   : > { %v4670_v62 = vpop.eup %4669  ;;  %4681 = vtanh.f32 %v2537_v46 }
 0x3cb   : > { %v4672_v7 = vpop.eup %4671 }
 0x3cc   : > { %v4674_v24 = vpop.eup %4673  ;;  %v2540_v61 = vpop.f32.mrb[164].mxu1  ;;  %v2783_v55 = vpack.c.bf16 %v4672_v7, %v4668_v38 }
 0x3cd   : > { %v2541_v54 = vadd.f32 %v2540_v61, %v6386_v29  ;;  %v2542_v48 = vpop.f32.mrb[165].mxu1  ;;  %v2784_v5 = vpack.c.bf16 %v4674_v24, %v4670_v62 }
 0x3ce   : > { %v2543_v18 = vadd.f32 %v2542_v48, %v6394_v14  ;;  %v2544_v15 = vpop.f32.mrb[166].mxu1 }
 0x3cf   : > { %4683 = vtanh.f32 %v2541_v54  ;;  %v2545_v21 = vadd.f32 %v2544_v15, %v6386_v29  ;;  %v2546_v56 = vpop.f32.mrb[167].mxu1  ;;  %3152 = vmatprep.mubr.bf16.mxu0 %v2784_v5 }
 0x3d0   : > { %4685 = vtanh.f32 %v2543_v18  ;;  %v2547_v42 = vadd.f32 %v2546_v56, %v6394_v14  ;;  %3153 = vmatmul.mubr.bf16.gmra.mrb[156].mxu0 %v2783_v55 }
 0x3d1   : > { %v4676_v32 = vpop.eup %4675  ;;  %4687 = vtanh.f32 %v2545_v21 }
 0x3d2   : > { %v4678_v49 = vpop.eup %4677  ;;  %4689 = vtanh.f32 %v2547_v42 }
 0x3d3   : > { %v4680_v27 = vpop.eup %4679 }
 0x3d4   : > { %v4682_v31 = vpop.eup %4681  ;;  %v2550_v9 = vpop.f32.mrb[168].mxu1  ;;  %v2785_v6 = vpack.c.bf16 %v4680_v27, %v4676_v32 }
 0x3d5   : > { %v2551_v0 = vadd.f32 %v2550_v9, %v6386_v29  ;;  %v2552_v12 = vpop.f32.mrb[169].mxu1  ;;  %v2786_v33 = vpack.c.bf16 %v4682_v31, %v4678_v49 }
 0x3d6   : > { %v2553_v43 = vadd.f32 %v2552_v12, %v6394_v14  ;;  %v2554_v63 = vpop.f32.mrb[170].mxu1 }
 0x3d7   : > { %4691 = vtanh.f32 %v2551_v0  ;;  %v2555_v4 = vadd.f32 %v2554_v63, %v6386_v29  ;;  %v2556_v8 = vpop.f32.mrb[171].mxu1  ;;  %3160 = vmatprep.mubr.bf16.mxu0 %v2786_v33 }
 0x3d8   : > { %4693 = vtanh.f32 %v2553_v43  ;;  %v2557_v13 = vadd.f32 %v2556_v8, %v6394_v14  ;;  %3161 = vmatmul.mubr.bf16.gmra.mrb[160].mxu0 %v2785_v6 }
 0x3d9   : > { %v4684_v16 = vpop.eup %4683  ;;  %4695 = vtanh.f32 %v2555_v4 }
 0x3da   : > { %v4686_v36 = vpop.eup %4685  ;;  %4697 = vtanh.f32 %v2557_v13 }
 0x3db   : > { %v4688_v2 = vpop.eup %4687 }
 0x3dc   : > { %v4690_v51 = vpop.eup %4689  ;;  %v2560_v57 = vpop.f32.mrb[172].mxu1  ;;  %v2787_v53 = vpack.c.bf16 %v4688_v2, %v4684_v16 }
 0x3dd   : > { %v2561_v52 = vadd.f32 %v2560_v57, %v6386_v29  ;;  %v2562_v26 = vpop.f32.mrb[173].mxu1  ;;  %v2788_v30 = vpack.c.bf16 %v4690_v51, %v4686_v36  ;;  %v6561_v57 = vld [vmem:[%s6859_s9] ss:$0 sm:$0xff] }
 0x3de   : > { %v2563_v58 = vadd.f32 %v2562_v26, %v6394_v14  ;;  %v2564_v60 = vpop.f32.mrb[174].mxu1 }
 0x3df   : > { %4699 = vtanh.f32 %v2561_v52  ;;  %v2565_v25 = vadd.f32 %v2564_v60, %v6386_v29  ;;  %v2566_v59 = vpop.f32.mrb[175].mxu1  ;;  %3168 = vmatprep.mubr.bf16.mxu0 %v2788_v30 }
 0x3e0   : > { %4701 = vtanh.f32 %v2563_v58  ;;  %v2567_v22 = vadd.f32 %v2566_v59, %v6394_v14  ;;  %3169 = vmatmul.mubr.bf16.gmra.mrb[164].mxu0 %v2787_v53 }
 0x3e1   : > { %v4692_v35 = vpop.eup %4691  ;;  %4703 = vtanh.f32 %v2565_v25 }
 0x3e2   : > { %v4694_v3 = vpop.eup %4693  ;;  %4705 = vtanh.f32 %v2567_v22 }
 0x3e3   : > { %v4696_v41 = vpop.eup %4695 }
 0x3e4   : > { %v4698_v28 = vpop.eup %4697  ;;  %v2570_v44 = vpop.f32.mrb[176].mxu1  ;;  %v2789_v10 = vpack.c.bf16 %v4696_v41, %v4692_v35 }
 0x3e5   : > { %v2571_v50 = vadd.f32 %v2570_v44, %v6386_v29  ;;  %v2572_v39 = vpop.f32.mrb[177].mxu1  ;;  %v2790_v20 = vpack.c.bf16 %v4698_v28, %v4694_v3 }
 0x3e6   : > { %v2573_v40 = vadd.f32 %v2572_v39, %v6394_v14  ;;  %v2574_v23 = vpop.f32.mrb[178].mxu1 }
 0x3e7   : > { %4707 = vtanh.f32 %v2571_v50  ;;  %v2575_v34 = vadd.f32 %v2574_v23, %v6386_v29  ;;  %v2576_v1 = vpop.f32.mrb[179].mxu1  ;;  %3176 = vmatprep.mubr.bf16.mxu0 %v2790_v20 }
 0x3e8   : > { %4709 = vtanh.f32 %v2573_v40  ;;  %v2577_v45 = vadd.f32 %v2576_v1, %v6394_v14  ;;  %3177 = vmatmul.mubr.bf16.gmra.mrb[168].mxu0 %v2789_v10 }
 0x3e9   : > { %v4700_v17 = vpop.eup %4699  ;;  %4711 = vtanh.f32 %v2575_v34 }
 0x3ea   : > { %v4702_v37 = vpop.eup %4701  ;;  %4713 = vtanh.f32 %v2577_v45 }
 0x3eb   : > { %v4704_v11 = vpop.eup %4703  ;;  %v2970_v47 = vpop.f32.mrb[64].mxu0 }
 0x3ec   : > { %v4706_v46 = vpop.eup %4705  ;;  %v2971_v38 = vadd.f32 %v6546_v19, %v2970_v47  ;;  %v2580_v62 = vpop.f32.mrb[180].mxu1  ;;  %v2791_v24 = vpack.c.bf16 %v4704_v11, %v4700_v17 }
 0x3ed   : > { %v2972_v7 = vpop.f32.mrb[65].mxu0  ;;  %v2581_v61 = vadd.f32 %v2580_v62, %v6386_v29  ;;  %v2582_v55 = vpop.f32.mrb[181].mxu1  ;;  %v2792_v48 = vpack.c.bf16 %v4706_v46, %v4702_v37 }
 0x3ee   : > { %v2973_v54 = vpop.f32.mrb[66].mxu0  ;;  %4715 = vtanh.f32 %v2971_v38  ;;  %v2583_v5 = vadd.f32 %v2582_v55, %v6394_v14  ;;  %v2584_v15 = vpop.f32.mrb[182].mxu1 }
 0x3ef   : > { %v2974_v18 = vadd.f32 %v6546_v19, %v2973_v54  ;;  %v2975_v21 = vpop.f32.mrb[67].mxu0  ;;  %4717 = vtanh.f32 %v2581_v61  ;;  %v2585_v56 = vadd.f32 %v2584_v15, %v6386_v29  ;;  %v2586_v42 = vpop.f32.mrb[183].mxu1  ;;  %3184 = vmatprep.mubr.bf16.mxu0 %v2792_v48 }
 0x3f0   : > { %4719 = vtanh.f32 %v2583_v5  ;;  %v2587_v32 = vadd.f32 %v2586_v42, %v6394_v14  ;;  %3185 = vmatmul.mubr.bf16.gmra.mrb[172].mxu0 %v2791_v24 }
 0x3f1   : > { %v4708_v49 = vpop.eup %4707  ;;  %4721 = vtanh.f32 %v2974_v18 }
 0x3f2   : > { %v4710_v27 = vpop.eup %4709  ;;  %4723 = vtanh.f32 %v2585_v56 }
 0x3f3   : > { %v4712_v31 = vpop.eup %4711  ;;  %4725 = vtanh.f32 %v2587_v32  ;;  %v2978_v9 = vpop.f32.mrb[68].mxu0 }
 0x3f4   : > { %v4714_v6 = vpop.eup %4713  ;;  %v2979_v0 = vadd.f32 %v6546_v19, %v2978_v9  ;;  %v2590_v12 = vpop.f32.mrb[184].mxu1  ;;  %v2793_v43 = vpack.c.bf16 %v4712_v31, %v4708_v49 }
 0x3f5   : > { %v2980_v33 = vpop.f32.mrb[69].mxu0  ;;  %v2591_v63 = vadd.f32 %v2590_v12, %v6386_v29  ;;  %v2592_v4 = vpop.f32.mrb[185].mxu1  ;;  %v2794_v13 = vpack.c.bf16 %v4714_v6, %v4710_v27 }
 0x3f6   : > { %v2981_v8 = vpop.f32.mrb[70].mxu0  ;;  %4727 = vtanh.f32 %v2979_v0  ;;  %v2593_v16 = vadd.f32 %v2592_v4, %v6394_v14  ;;  %v2594_v2 = vpop.f32.mrb[186].mxu1 }
 0x3f7   : > { %v2982_v36 = vadd.f32 %v6546_v19, %v2981_v8  ;;  %v2983_v51 = vpop.f32.mrb[71].mxu0  ;;  %4729 = vtanh.f32 %v2591_v63  ;;  %v2595_v53 = vadd.f32 %v2594_v2, %v6386_v29  ;;  %v2596_v52 = vpop.f32.mrb[187].mxu1  ;;  %3192 = vmatprep.mubr.bf16.mxu0 %v2794_v13 }
 0x3f8   : > { %v4716_v26 = vpop.eup %4715  ;;  %4731 = vtanh.f32 %v2593_v16  ;;  %v2597_v30 = vadd.f32 %v2596_v52, %v6394_v14  ;;  %3193 = vmatmul.mubr.bf16.gmra.mrb[176].mxu0 %v2793_v43 }
 0x3f9   : > { %v4718_v58 = vpop.eup %4717  ;;  %4733 = vtanh.f32 %v2982_v36  ;;  %v3296_v60 = vmul.f32 %v4716_v26, %v6561_v57 }
 0x3fa   : > { %v4720_v25 = vpop.eup %4719  ;;  %4735 = vtanh.f32 %v2595_v53 }
 0x3fb   : > { %v4722_v59 = vpop.eup %4721  ;;  %4737 = vtanh.f32 %v2597_v30  ;;  %v2986_v22 = vpop.f32.mrb[72].mxu0  ;;  %3360 = vadd.xlane.f32.xlu1 %v3296_v60 }
 0x3fc   : > { %v4724_v35 = vpop.eup %4723  ;;  %v2987_v3 = vadd.f32 %v6546_v19, %v2986_v22  ;;  %v2600_v41 = vpop.f32.mrb[188].mxu1  ;;  %v3297_v44 = vmul.f32 %v4722_v59, %v6561_v57 }
 0x3fd   : > { %v2988_v28 = vpop.f32.mrb[73].mxu0  ;;  %v4726_v10 = vpop.eup %4725  ;;  %v2601_v50 = vadd.f32 %v2600_v41, %v6386_v29  ;;  %v2795_v40 = vpack.c.bf16 %v4724_v35, %v4718_v58 }
 0x3fe   : > { %v2989_v39 = vpop.f32.mrb[74].mxu0  ;;  %v2602_v20 = vpop.f32.mrb[189].mxu1  ;;  %4739 = vtanh.f32 %v2987_v3  ;;  %3362 = vadd.xlane.f32.xlu0 %v3297_v44  ;;  %v2796_v17 = vpack.c.bf16 %v4726_v10, %v4720_v25 }
 0x3ff   : > { %v2990_v23 = vadd.f32 %v6546_v19, %v2989_v39  ;;  %v2603_v34 = vadd.f32 %v2602_v20, %v6394_v14  ;;  %v2604_v1 = vpop.f32.mrb[190].mxu1  ;;  %v2991_v45 = vpop.f32.mrb[75].mxu0  ;;  %4741 = vtanh.f32 %v2601_v50 }
 0x400   : > { %v2605_v37 = vadd.f32 %v2604_v1, %v6386_v29  ;;  %v2606_v11 = vpop.f32.mrb[191].mxu1  ;;  %v4728_v47 = vpop.eup %4727  ;;  %3200 = vmatprep.mubr.bf16.mxu0 %v2796_v17 }
 0x401   : > { %4743 = vtanh.f32 %v2990_v23  ;;  %v2607_v46 = vadd.f32 %v2606_v11, %v6394_v14  ;;  %v4730_v38 = vpop.eup %4729  ;;  %3201 = vmatmul.mubr.bf16.gmra.mrb[180].mxu0 %v2795_v40  ;;  %v3298_v62 = vmul.f32 %v4728_v47, %v6561_v57 }
 0x402   : > { %4745 = vtanh.f32 %v2603_v34  ;;  %v4732_v7 = vpop.eup %4731 }
 0x403   : > { %4747 = vtanh.f32 %v2605_v37  ;;  %v4734_v24 = vpop.eup %4733  ;;  %v2994_v61 = vpop.f32.mrb[76].mxu0  ;;  %3364 = vadd.xlane.f32.xlu0 %v3298_v62 }
 0x404   : > { %4749 = vtanh.f32 %v2607_v46  ;;  %v4736_v55 = vpop.eup %4735  ;;  %v2995_v29 = vadd.f32 %v6546_v19, %v2994_v61  ;;  %v2996_v54 = vpop.f32.mrb[77].mxu0  ;;  %v3299_v48 = vmul.f32 %v4734_v24, %v6561_v57 }
 0x405   : > { %v4738_v5 = vpop.eup %4737  ;;  %v2997_v14 = vpop.f32.mrb[78].mxu0  ;;  %v2797_v18 = vpack.c.bf16 %v4736_v55, %v4730_v38 }
 0x406   : > { %4751 = vtanh.f32 %v2995_v29  ;;  %v2998_v15 = vadd.f32 %v6546_v19, %v2997_v14  ;;  %3366 = vadd.xlane.f32.xlu1 %v3299_v48  ;;  %v2999_v21 = vpop.f32.mrb[79].mxu0  ;;  %v2798_v56 = vpack.c.bf16 %v4738_v5, %v4732_v7 }
 0x408   : > { %v4740_v42 = vpop.eup %4739  ;;  %4753 = vtanh.f32 %v2998_v15  ;;  %3208 = vmatprep.mubr.bf16.mxu0 %v2798_v56 }
 0x409   : > { %v4742_v32 = vpop.eup %4741  ;;  %3209 = vmatmul.mubr.bf16.gmra.mrb[184].mxu0 %v2797_v18  ;;  %v3300_v49 = vmul.f32 %v4740_v42, %v6561_v57 }
 0x40b   : > { %v4744_v27 = vpop.eup %4743  ;;  %v3002_v9 = vpop.f32.mrb[80].mxu0  ;;  %3368 = vadd.xlane.f32.xlu0 %v3300_v49 }
 0x40c   : > { %v4746_v31 = vpop.eup %4745  ;;  %v3301_v6 = vmul.f32 %v4744_v27, %v6561_v57  ;;  %v3003_v12 = vadd.f32 %v6546_v19, %v3002_v9  ;;  %v3004_v33 = vpop.f32.mrb[81].mxu0 }
 0x40d   : > { %v4748_v0 = vpop.eup %4747  ;;  %v3005_v63 = vpop.f32.mrb[82].mxu0 }
 0x40e   : > { %v4750_v43 = vpop.eup %4749  ;;  %3370 = vadd.xlane.f32.xlu1 %v3301_v6  ;;  %v2799_v4 = vpack.c.bf16 %v4748_v0, %v4742_v32  ;;  %4755 = vtanh.f32 %v3003_v12  ;;  %v3006_v8 = vadd.f32 %v6546_v19, %v3005_v63  ;;  %v3007_v13 = vpop.f32.mrb[83].mxu0 }
 0x40f   : > { %v2800_v16 = vpack.c.bf16 %v4750_v43, %v4746_v31 }
 0x410   : > { %v4752_v36 = vpop.eup %4751  ;;  %4757 = vtanh.f32 %v3006_v8 }
 0x411   : > { %3216 = vmatprep.mubr.bf16.mxu0 %v2800_v16  ;;  %v3302_v2 = vmul.f32 %v4752_v36, %v6561_v57 }
 0x412   : > { %3217 = vmatmul.mubr.bf16.gmra.mrb[188].mxu0 %v2799_v4  ;;  %v4754_v51 = vpop.eup %4753 }
 0x413   : > { %v3010_v53 = vpop.f32.mrb[84].mxu0  ;;  %3372 = vadd.xlane.f32.xlu0 %v3302_v2  ;;  %v3303_v52 = vmul.f32 %v4754_v51, %v6561_v57 }
 0x414   : > { %v3011_v26 = vadd.f32 %v6546_v19, %v3010_v53  ;;  %v3012_v30 = vpop.f32.mrb[85].mxu0 }
 0x415   : > { %v3013_v58 = vpop.f32.mrb[86].mxu0  ;;  %3374 = vadd.xlane.f32.xlu1 %v3303_v52 }
 0x416   : > { %4759 = vtanh.f32 %v3011_v26  ;;  %v3014_v60 = vadd.f32 %v6546_v19, %v3013_v58  ;;  %v3015_v25 = vpop.f32.mrb[87].mxu0 }
 0x418   : > { %v4756_v59 = vpop.eup %4755  ;;  %4761 = vtanh.f32 %v3014_v60 }
 0x419   : > { %v3304_v22 = vmul.f32 %v4756_v59, %v6561_v57 }
 0x41a   : > { %v4758_v35 = vpop.eup %4757 }
 0x41b   : > { %v3018_v3 = vpop.f32.mrb[88].mxu0  ;;  %3376 = vadd.xlane.f32.xlu0 %v3304_v22  ;;  %v3305_v41 = vmul.f32 %v4758_v35, %v6561_v57 }
 0x41c   : > { %v3019_v28 = vadd.f32 %v6546_v19, %v3018_v3  ;;  %v3020_v44 = vpop.f32.mrb[89].mxu0 }
 0x41d   : > { %v3021_v10 = vpop.f32.mrb[90].mxu0  ;;  %3378 = vadd.xlane.f32.xlu1 %v3305_v41 }
 0x41e   : > { %4763 = vtanh.f32 %v3019_v28  ;;  %v3022_v50 = vadd.f32 %v6546_v19, %v3021_v10  ;;  %v3023_v39 = vpop.f32.mrb[91].mxu0 }
 0x420   : > { %v4760_v20 = vpop.eup %4759  ;;  %4765 = vtanh.f32 %v3022_v50 }
 0x421   : > { %v3306_v40 = vmul.f32 %v4760_v20, %v6561_v57 }
 0x422   : > { %v4762_v23 = vpop.eup %4761 }
 0x423   : > { %v3026_v34 = vpop.f32.mrb[92].mxu0  ;;  %3380 = vadd.xlane.f32.xlu0 %v3306_v40  ;;  %v3307_v1 = vmul.f32 %v4762_v23, %v6561_v57 }
 0x424   : > { %v3027_v45 = vadd.f32 %v6546_v19, %v3026_v34  ;;  %v3028_v17 = vpop.f32.mrb[93].mxu0 }
 0x425   : > { %v3029_v37 = vpop.f32.mrb[94].mxu0  ;;  %3382 = vadd.xlane.f32.xlu1 %v3307_v1 }
 0x426   : > { %4767 = vtanh.f32 %v3027_v45  ;;  %v3030_v11 = vadd.f32 %v6546_v19, %v3029_v37  ;;  %v3031_v47 = vpop.f32.mrb[95].mxu0 }
 0x428   : > { %v4764_v46 = vpop.eup %4763  ;;  %4769 = vtanh.f32 %v3030_v11 }
 0x429   : > { %v3308_v38 = vmul.f32 %v4764_v46, %v6561_v57 }
 0x42a   : > { %v4766_v62 = vpop.eup %4765 }
 0x42b   : > { %v3034_v7 = vpop.f32.mrb[96].mxu0  ;;  %3384 = vadd.xlane.f32.xlu0 %v3308_v38  ;;  %v3309_v24 = vmul.f32 %v4766_v62, %v6561_v57 }
 0x42c   : > { %v3035_v61 = vadd.f32 %v6546_v19, %v3034_v7  ;;  %v3036_v55 = vpop.f32.mrb[97].mxu0 }
 0x42d   : > { %v3037_v29 = vpop.f32.mrb[98].mxu0  ;;  %3386 = vadd.xlane.f32.xlu1 %v3309_v24 }
 0x42e   : > { %4771 = vtanh.f32 %v3035_v61  ;;  %v3038_v54 = vadd.f32 %v6546_v19, %v3037_v29  ;;  %v3039_v48 = vpop.f32.mrb[99].mxu0 }
 0x430   : > { %v4768_v5 = vpop.eup %4767  ;;  %4773 = vtanh.f32 %v3038_v54 }
 0x431   : > { %v3310_v14 = vmul.f32 %v4768_v5, %v6561_v57 }
 0x432   : > { %v4770_v18 = vpop.eup %4769 }
 0x433   : > { %v3042_v15 = vpop.f32.mrb[100].mxu0  ;;  %3388 = vadd.xlane.f32.xlu0 %v3310_v14  ;;  %v3311_v21 = vmul.f32 %v4770_v18, %v6561_v57 }
 0x434   : > { %v3043_v56 = vadd.f32 %v6546_v19, %v3042_v15  ;;  %v3044_v42 = vpop.f32.mrb[101].mxu0 }
 0x435   : > { %v3045_v32 = vpop.f32.mrb[102].mxu0  ;;  %3390 = vadd.xlane.f32.xlu1 %v3311_v21 }
 0x436   : > { %4775 = vtanh.f32 %v3043_v56  ;;  %v3046_v49 = vadd.f32 %v6546_v19, %v3045_v32  ;;  %v3047_v27 = vpop.f32.mrb[103].mxu0 }
 0x438   : > { %v4772_v31 = vpop.eup %4771  ;;  %4777 = vtanh.f32 %v3046_v49 }
 0x439   : > { %v3312_v9 = vmul.f32 %v4772_v31, %v6561_v57 }
 0x43a   : > { %v4774_v6 = vpop.eup %4773 }
 0x43b   : > { %v3050_v0 = vpop.f32.mrb[104].mxu0  ;;  %3392 = vadd.xlane.f32.xlu0 %v3312_v9  ;;  %v3313_v12 = vmul.f32 %v4774_v6, %v6561_v57 }
 0x43c   : > { %v3051_v33 = vadd.f32 %v6546_v19, %v3050_v0  ;;  %v3052_v43 = vpop.f32.mrb[105].mxu0 }
 0x43d   : > { %v3053_v63 = vpop.f32.mrb[106].mxu0  ;;  %3394 = vadd.xlane.f32.xlu1 %v3313_v12 }
 0x43e   : > { %4779 = vtanh.f32 %v3051_v33  ;;  %v3054_v4 = vadd.f32 %v6546_v19, %v3053_v63  ;;  %v3055_v8 = vpop.f32.mrb[107].mxu0 }
 0x440   : > { %v4776_v13 = vpop.eup %4775  ;;  %4781 = vtanh.f32 %v3054_v4 }
 0x441   : > { %v3314_v16 = vmul.f32 %v4776_v13, %v6561_v57 }
 0x442   : > { %v4778_v36 = vpop.eup %4777 }
 0x443   : > { %v3058_v2 = vpop.f32.mrb[108].mxu0  ;;  %3396 = vadd.xlane.f32.xlu0 %v3314_v16  ;;  %v3315_v51 = vmul.f32 %v4778_v36, %v6561_v57 }
 0x444   : > { %v3059_v53 = vadd.f32 %v6546_v19, %v3058_v2  ;;  %v3060_v52 = vpop.f32.mrb[109].mxu0 }
 0x445   : > { %v3061_v26 = vpop.f32.mrb[110].mxu0  ;;  %3398 = vadd.xlane.f32.xlu1 %v3315_v51 }
 0x446   : > { %4783 = vtanh.f32 %v3059_v53  ;;  %v3062_v30 = vadd.f32 %v6546_v19, %v3061_v26  ;;  %v3063_v58 = vpop.f32.mrb[111].mxu0 }
 0x448   : > { %v4780_v60 = vpop.eup %4779  ;;  %4785 = vtanh.f32 %v3062_v30 }
 0x449   : > { %v3316_v25 = vmul.f32 %v4780_v60, %v6561_v57 }
 0x44a   : > { %v4782_v59 = vpop.eup %4781 }
 0x44b   : > { %v3066_v22 = vpop.f32.mrb[112].mxu0  ;;  %3400 = vadd.xlane.f32.xlu0 %v3316_v25  ;;  %v3317_v35 = vmul.f32 %v4782_v59, %v6561_v57 }
 0x44c   : > { %v3067_v3 = vadd.f32 %v6546_v19, %v3066_v22  ;;  %v3068_v41 = vpop.f32.mrb[113].mxu0 }
 0x44d   : > { %v3069_v28 = vpop.f32.mrb[114].mxu0  ;;  %3402 = vadd.xlane.f32.xlu1 %v3317_v35 }
 0x44e   : > { %4787 = vtanh.f32 %v3067_v3  ;;  %v3070_v44 = vadd.f32 %v6546_v19, %v3069_v28  ;;  %v3071_v10 = vpop.f32.mrb[115].mxu0 }
 0x450   : > { %v4784_v50 = vpop.eup %4783  ;;  %4789 = vtanh.f32 %v3070_v44 }
 0x451   : > { %v3318_v39 = vmul.f32 %v4784_v50, %v6561_v57 }
 0x452   : > { %v4786_v20 = vpop.eup %4785 }
 0x453   : > { %v3074_v40 = vpop.f32.mrb[116].mxu0  ;;  %3404 = vadd.xlane.f32.xlu0 %v3318_v39  ;;  %v3319_v23 = vmul.f32 %v4786_v20, %v6561_v57 }
 0x454   : > { %v3075_v34 = vadd.f32 %v6546_v19, %v3074_v40  ;;  %v3076_v1 = vpop.f32.mrb[117].mxu0 }
 0x455   : > { %v3077_v45 = vpop.f32.mrb[118].mxu0  ;;  %3406 = vadd.xlane.f32.xlu1 %v3319_v23 }
 0x456   : > { %4791 = vtanh.f32 %v3075_v34  ;;  %v3078_v17 = vadd.f32 %v6546_v19, %v3077_v45  ;;  %v3079_v37 = vpop.f32.mrb[119].mxu0 }
 0x458   : > { %v4788_v11 = vpop.eup %4787  ;;  %4793 = vtanh.f32 %v3078_v17 }
 0x459   : > { %v3320_v47 = vmul.f32 %v4788_v11, %v6561_v57 }
 0x45a   : > { %v4790_v46 = vpop.eup %4789 }
 0x45b   : > { %v3082_v38 = vpop.f32.mrb[120].mxu0  ;;  %3408 = vadd.xlane.f32.xlu0 %v3320_v47  ;;  %v3321_v62 = vmul.f32 %v4790_v46, %v6561_v57 }
 0x45c   : > { %v3083_v7 = vadd.f32 %v6546_v19, %v3082_v38  ;;  %v3084_v24 = vpop.f32.mrb[121].mxu0 }
 0x45d   : > { %v3085_v61 = vpop.f32.mrb[122].mxu0  ;;  %3410 = vadd.xlane.f32.xlu1 %v3321_v62 }
 0x45e   : > { %4795 = vtanh.f32 %v3083_v7  ;;  %v3086_v55 = vadd.f32 %v6546_v19, %v3085_v61  ;;  %v3087_v29 = vpop.f32.mrb[123].mxu0 }
 0x460   : > { %v4792_v54 = vpop.eup %4791  ;;  %4797 = vtanh.f32 %v3086_v55 }
 0x461   : > { %v3322_v48 = vmul.f32 %v4792_v54, %v6561_v57 }
 0x462   : > { %v4794_v5 = vpop.eup %4793 }
 0x463   : > { %v3090_v14 = vpop.f32.mrb[124].mxu0  ;;  %3412 = vadd.xlane.f32.xlu0 %v3322_v48  ;;  %v3323_v18 = vmul.f32 %v4794_v5, %v6561_v57 }
 0x464   : > { %v3091_v15 = vadd.f32 %v6546_v19, %v3090_v14  ;;  %v3092_v21 = vpop.f32.mrb[125].mxu0 }
 0x465   : > { %v3093_v56 = vpop.f32.mrb[126].mxu0  ;;  %3414 = vadd.xlane.f32.xlu1 %v3323_v18 }
 0x466   : > { %4799 = vtanh.f32 %v3091_v15  ;;  %v3094_v42 = vadd.f32 %v6546_v19, %v3093_v56  ;;  %v3095_v32 = vpop.f32.mrb[127].mxu0 }
 0x468   : > { %v4796_v49 = vpop.eup %4795  ;;  %4801 = vtanh.f32 %v3094_v42 }
 0x469   : > { %v3324_v27 = vmul.f32 %v4796_v49, %v6561_v57 }
 0x46a   : > { %v4798_v31 = vpop.eup %4797 }
 0x46b   : > { %v3098_v9 = vpop.f32.mrb[128].mxu0  ;;  %3416 = vadd.xlane.f32.xlu0 %v3324_v27  ;;  %v3325_v6 = vmul.f32 %v4798_v31, %v6561_v57 }
 0x46c   : > { %v3099_v0 = vadd.f32 %v6546_v19, %v3098_v9  ;;  %v3100_v12 = vpop.f32.mrb[129].mxu0 }
 0x46d   : > { %v3101_v33 = vpop.f32.mrb[130].mxu0  ;;  %3418 = vadd.xlane.f32.xlu1 %v3325_v6 }
 0x46e   : > { %4803 = vtanh.f32 %v3099_v0  ;;  %v3102_v43 = vadd.f32 %v6546_v19, %v3101_v33  ;;  %v3103_v63 = vpop.f32.mrb[131].mxu0 }
 0x470   : > { %v4800_v4 = vpop.eup %4799  ;;  %4805 = vtanh.f32 %v3102_v43 }
 0x471   : > { %v3326_v8 = vmul.f32 %v4800_v4, %v6561_v57 }
 0x472   : > { %v4802_v13 = vpop.eup %4801 }
 0x473   : > { %v3106_v16 = vpop.f32.mrb[132].mxu0  ;;  %3420 = vadd.xlane.f32.xlu0 %v3326_v8  ;;  %v3327_v36 = vmul.f32 %v4802_v13, %v6561_v57 }
 0x474   : > { %v3107_v2 = vadd.f32 %v6546_v19, %v3106_v16  ;;  %v3108_v51 = vpop.f32.mrb[133].mxu0 }
 0x475   : > { %v3109_v53 = vpop.f32.mrb[134].mxu0  ;;  %3422 = vadd.xlane.f32.xlu1 %v3327_v36 }
 0x476   : > { %4807 = vtanh.f32 %v3107_v2  ;;  %v3110_v52 = vadd.f32 %v6546_v19, %v3109_v53  ;;  %v3111_v26 = vpop.f32.mrb[135].mxu0 }
 0x478   : > { %v4804_v30 = vpop.eup %4803  ;;  %4809 = vtanh.f32 %v3110_v52 }
 0x479   : > { %v3328_v58 = vmul.f32 %v4804_v30, %v6561_v57 }
 0x47a   : > { %v4806_v60 = vpop.eup %4805 }
 0x47b   : > { %v3114_v25 = vpop.f32.mrb[136].mxu0  ;;  %3424 = vadd.xlane.f32.xlu0 %v3328_v58  ;;  %v3329_v59 = vmul.f32 %v4806_v60, %v6561_v57 }
 0x47c   : > { %v3115_v22 = vadd.f32 %v6546_v19, %v3114_v25  ;;  %v3116_v35 = vpop.f32.mrb[137].mxu0 }
 0x47d   : > { %v3117_v3 = vpop.f32.mrb[138].mxu0  ;;  %3426 = vadd.xlane.f32.xlu1 %v3329_v59 }
 0x47e   : > { %4811 = vtanh.f32 %v3115_v22  ;;  %v3118_v41 = vadd.f32 %v6546_v19, %v3117_v3  ;;  %v3119_v28 = vpop.f32.mrb[139].mxu0 }
 0x480   : > { %v4808_v44 = vpop.eup %4807  ;;  %4813 = vtanh.f32 %v3118_v41 }
 0x481   : > { %v3330_v10 = vmul.f32 %v4808_v44, %v6561_v57 }
 0x482   : > { %v4810_v50 = vpop.eup %4809 }
 0x483   : > { %v3122_v39 = vpop.f32.mrb[140].mxu0  ;;  %3428 = vadd.xlane.f32.xlu0 %v3330_v10  ;;  %v3331_v20 = vmul.f32 %v4810_v50, %v6561_v57 }
 0x484   : > { %v3123_v40 = vadd.f32 %v6546_v19, %v3122_v39  ;;  %v3124_v23 = vpop.f32.mrb[141].mxu0 }
 0x485   : > { %v3125_v34 = vpop.f32.mrb[142].mxu0  ;;  %3430 = vadd.xlane.f32.xlu1 %v3331_v20 }
 0x486   : > { %4815 = vtanh.f32 %v3123_v40  ;;  %v3126_v1 = vadd.f32 %v6546_v19, %v3125_v34  ;;  %v3127_v45 = vpop.f32.mrb[143].mxu0 }
 0x488   : > { %v4812_v17 = vpop.eup %4811  ;;  %4817 = vtanh.f32 %v3126_v1 }
 0x489   : > { %v3332_v37 = vmul.f32 %v4812_v17, %v6561_v57 }
 0x48a   : > { %v4814_v11 = vpop.eup %4813 }
 0x48b   : > { %v3130_v47 = vpop.f32.mrb[144].mxu0  ;;  %3432 = vadd.xlane.f32.xlu0 %v3332_v37  ;;  %v3333_v46 = vmul.f32 %v4814_v11, %v6561_v57 }
 0x48c   : > { %v3131_v38 = vadd.f32 %v6546_v19, %v3130_v47  ;;  %v3132_v62 = vpop.f32.mrb[145].mxu0 }
 0x48d   : > { %v3133_v7 = vpop.f32.mrb[146].mxu0  ;;  %3434 = vadd.xlane.f32.xlu1 %v3333_v46 }
 0x48e   : > { %4819 = vtanh.f32 %v3131_v38  ;;  %v3134_v24 = vadd.f32 %v6546_v19, %v3133_v7  ;;  %v3135_v61 = vpop.f32.mrb[147].mxu0 }
 0x490   : > { %v4816_v55 = vpop.eup %4815  ;;  %4821 = vtanh.f32 %v3134_v24 }
 0x491   : > { %v3334_v29 = vmul.f32 %v4816_v55, %v6561_v57 }
 0x492   : > { %v4818_v54 = vpop.eup %4817 }
 0x493   : > { %v3138_v48 = vpop.f32.mrb[148].mxu0  ;;  %3436 = vadd.xlane.f32.xlu0 %v3334_v29  ;;  %v3335_v5 = vmul.f32 %v4818_v54, %v6561_v57 }
 0x494   : > { %v3139_v14 = vadd.f32 %v6546_v19, %v3138_v48  ;;  %v3140_v18 = vpop.f32.mrb[149].mxu0 }
 0x495   : > { %v3141_v15 = vpop.f32.mrb[150].mxu0  ;;  %3438 = vadd.xlane.f32.xlu1 %v3335_v5 }
 0x496   : > { %4823 = vtanh.f32 %v3139_v14  ;;  %v3142_v21 = vadd.f32 %v6546_v19, %v3141_v15  ;;  %v3143_v56 = vpop.f32.mrb[151].mxu0 }
 0x498   : > { %v4820_v42 = vpop.eup %4819  ;;  %4825 = vtanh.f32 %v3142_v21 }
 0x499   : > { %v3336_v32 = vmul.f32 %v4820_v42, %v6561_v57 }
 0x49a   : > { %v4822_v49 = vpop.eup %4821 }
 0x49b   : > { %v3146_v27 = vpop.f32.mrb[152].mxu0  ;;  %3440 = vadd.xlane.f32.xlu0 %v3336_v32  ;;  %v3337_v31 = vmul.f32 %v4822_v49, %v6561_v57 }
 0x49c   : > { %v3147_v9 = vadd.f32 %v6546_v19, %v3146_v27  ;;  %v3148_v6 = vpop.f32.mrb[153].mxu0 }
 0x49d   : > { %v3149_v0 = vpop.f32.mrb[154].mxu0  ;;  %3442 = vadd.xlane.f32.xlu1 %v3337_v31 }
 0x49e   : > { %4827 = vtanh.f32 %v3147_v9  ;;  %v3150_v12 = vadd.f32 %v6546_v19, %v3149_v0  ;;  %v3151_v33 = vpop.f32.mrb[155].mxu0 }
 0x4a0   : > { %v4824_v43 = vpop.eup %4823  ;;  %4829 = vtanh.f32 %v3150_v12 }
 0x4a1   : > { %v3338_v63 = vmul.f32 %v4824_v43, %v6561_v57 }
 0x4a2   : > { %v4826_v4 = vpop.eup %4825 }
 0x4a3   : > { %v3154_v8 = vpop.f32.mrb[156].mxu0  ;;  %3444 = vadd.xlane.f32.xlu0 %v3338_v63  ;;  %v3339_v13 = vmul.f32 %v4826_v4, %v6561_v57 }
 0x4a4   : > { %v3155_v16 = vadd.f32 %v6546_v19, %v3154_v8  ;;  %v3156_v36 = vpop.f32.mrb[157].mxu0 }
 0x4a5   : > { %v3157_v2 = vpop.f32.mrb[158].mxu0  ;;  %3446 = vadd.xlane.f32.xlu1 %v3339_v13 }
 0x4a6   : > { %4831 = vtanh.f32 %v3155_v16  ;;  %v3158_v51 = vadd.f32 %v6546_v19, %v3157_v2  ;;  %v3159_v53 = vpop.f32.mrb[159].mxu0 }
 0x4a8   : > { %v4828_v52 = vpop.eup %4827  ;;  %4833 = vtanh.f32 %v3158_v51 }
 0x4a9   : > { %v3340_v26 = vmul.f32 %v4828_v52, %v6561_v57 }
 0x4aa   : > { %v4830_v30 = vpop.eup %4829 }
 0x4ab   : > { %v3162_v58 = vpop.f32.mrb[160].mxu0  ;;  %3448 = vadd.xlane.f32.xlu0 %v3340_v26  ;;  %v3341_v60 = vmul.f32 %v4830_v30, %v6561_v57 }
 0x4ac   : > { %v3163_v25 = vadd.f32 %v6546_v19, %v3162_v58  ;;  %v3164_v59 = vpop.f32.mrb[161].mxu0 }
 0x4ad   : > { %v3165_v22 = vpop.f32.mrb[162].mxu0  ;;  %3450 = vadd.xlane.f32.xlu1 %v3341_v60  ;;  %v3361_v59 = vpop.xlane.xlu1 %3360 }
 0x4ae   : > { %4835 = vtanh.f32 %v3163_v25  ;;  %v3166_v35 = vadd.f32 %v6546_v19, %v3165_v22  ;;  %v3167_v3 = vpop.f32.mrb[163].mxu0  ;;  %v6691_v25 = vld [vmem:[#allocation2] ss:$0 sm:$0xff] }
 0x4af   : > { %v3363_v3 = vpop.xlane.xlu0 %3362 }
 0x4b0   : > { %v4832_v41 = vpop.eup %4831  ;;  %4837 = vtanh.f32 %v3166_v35  ;;  %v3495_v35 = vadd.f32 %v6691_v25, %v3361_v59 }
 0x4b1   : > { %v3342_v28 = vmul.f32 %v4832_v41, %v6561_v57  ;;  %v3496_v41 = vadd.f32 %v6691_v25, %v3363_v3  ;;  %v4868_v3 = vld [vmem:[%s6858_s8] ss:$0 sm:$0xff] }
 0x4b2   : > { %v4834_v44 = vpop.eup %4833 }
 0x4b3   : > { %v3170_v10 = vpop.f32.mrb[164].mxu0  ;;  %3452 = vadd.xlane.f32.xlu0 %v3342_v28  ;;  %v3343_v50 = vmul.f32 %v4834_v44, %v6561_v57  ;;  %v3365_v44 = vpop.xlane.xlu0 %3364 }
 0x4b4   : > { %v3171_v39 = vadd.f32 %v6546_v19, %v3170_v10  ;;  %v3172_v20 = vpop.f32.mrb[165].mxu0  ;;  %v3497_v10 = vadd.f32 %v6691_v25, %v3365_v44 }
 0x4b5   : > { %v3173_v40 = vpop.f32.mrb[166].mxu0  ;;  %3454 = vadd.xlane.f32.xlu1 %v3343_v50  ;;  %v3367_v50 = vpop.xlane.xlu1 %3366 }
 0x4b6   : > { %4839 = vtanh.f32 %v3171_v39  ;;  %v3174_v23 = vadd.f32 %v6546_v19, %v3173_v40  ;;  %v3175_v34 = vpop.f32.mrb[167].mxu0  ;;  %v3498_v39 = vadd.f32 %v6691_v25, %v3367_v50 }
 0x4b7   : > { %v3369_v20 = vpop.xlane.xlu0 %3368 }
 0x4b8   : > { %v4836_v1 = vpop.eup %4835  ;;  %4841 = vtanh.f32 %v3174_v23  ;;  %v3499_v40 = vadd.f32 %v6691_v25, %v3369_v20 }
 0x4b9   : > { %v3344_v45 = vmul.f32 %v4836_v1, %v6561_v57  ;;  %v3371_v23 = vpop.xlane.xlu1 %3370 }
 0x4ba   : > { %v4838_v17 = vpop.eup %4837  ;;  %v3500_v34 = vadd.f32 %v6691_v25, %v3371_v23 }
 0x4bb   : > { %v6666_v37 = vpop.f32.mrb[168].mxu0  ;;  %3456 = vadd.xlane.f32.xlu0 %v3344_v45  ;;  %v3345_v11 = vmul.f32 %v4838_v17, %v6561_v57  ;;  %v3373_v1 = vpop.xlane.xlu0 %3372 }
 0x4bc   : > { %v3180_v47 = vpop.f32.mrb[169].mxu0  ;;  %v3501_v45 = vadd.f32 %v6691_v25, %v3373_v1 }
 0x4bd   : > { %v3181_v46 = vpop.f32.mrb[170].mxu0  ;;  %3458 = vadd.xlane.f32.xlu1 %v3345_v11 }
 0x4be   : > { %v3182_v38 = vadd.f32 %v6546_v19, %v3181_v46  ;;  %v3183_v62 = vpop.f32.mrb[171].mxu0 }
 0x4bf   : > { %v3377_v11 = vpop.xlane.xlu0 %3376 }
 0x4c0   : > { %v4840_v7 = vpop.eup %4839  ;;  %4843 = vtanh.f32 %v3182_v38  ;;  %v3503_v47 = vadd.f32 %v6691_v25, %v3377_v11 }
 0x4c1   : > { %v3346_v24 = vmul.f32 %v4840_v7, %v6561_v57 }
 0x4c2   : > { %v4842_v61 = vpop.eup %4841 }
 0x4c3   : > { %v6671_v55 = vpop.f32.mrb[172].mxu0  ;;  %3460 = vadd.xlane.f32.xlu0 %v3346_v24  ;;  %v3347_v29 = vmul.f32 %v4842_v61, %v6561_v57  ;;  %v3381_v62 = vpop.xlane.xlu0 %3380 }
 0x4c4   : > { %v3188_v54 = vpop.f32.mrb[173].mxu0  ;;  %v3505_v7 = vadd.f32 %v6691_v25, %v3381_v62 }
 0x4c5   : > { %v3189_v48 = vpop.f32.mrb[174].mxu0  ;;  %3462 = vadd.xlane.f32.xlu1 %v3347_v29 }
 0x4c6   : > { %v3190_v5 = vadd.f32 %v6546_v19, %v3189_v48  ;;  %v3191_v14 = vpop.f32.mrb[175].mxu0 }
 0x4c7   : > { %v3385_v29 = vpop.xlane.xlu0 %3384 }
 0x4c8   : > { %4845 = vtanh.f32 %v3190_v5  ;;  %v3507_v54 = vadd.f32 %v6691_v25, %v3385_v29 }
 0x4ca   : > { %v4844_v18 = vpop.eup %4843 }
 0x4cb   : > { %v6675_v15 = vpop.f32.mrb[176].mxu0  ;;  %v3349_v21 = vmul.f32 %v4844_v18, %v6561_v57  ;;  %v3389_v5 = vpop.xlane.xlu0 %3388 }
 0x4cc   : > { %v3196_v56 = vpop.f32.mrb[177].mxu0 }
 0x4cd   : > { %v3197_v42 = vpop.f32.mrb[178].mxu0  ;;  %3466 = vadd.xlane.f32.xlu1 %v3349_v21  ;;  %v3509_v56 = vadd.f32 %v6691_v25, %v3389_v5 }
 0x4ce   : > { %v3198_v32 = vadd.f32 %v6546_v19, %v3197_v42  ;;  %v3199_v49 = vpop.f32.mrb[179].mxu0 }
 0x4cf   : > { %v3393_v21 = vpop.xlane.xlu0 %3392 }
 0x4d0   : > { %4847 = vtanh.f32 %v3198_v32  ;;  %v3511_v42 = vadd.f32 %v6691_v25, %v3393_v21 }
 0x4d2   : > { %v4846_v27 = vpop.eup %4845 }
 0x4d3   : > { %v3351_v31 = vmul.f32 %v4846_v27, %v6561_v57  ;;  %v3397_v49 = vpop.xlane.xlu0 %3396 }
 0x4d4   : > { %v6680_v9 = vpop.f32.mrb[180].mxu0 }
 0x4d5   : > { %v3204_v6 = vpop.f32.mrb[181].mxu0  ;;  %3470 = vadd.xlane.f32.xlu1 %v3351_v31 }
 0x4d6   : > { %v3205_v0 = vpop.f32.mrb[182].mxu0 }
 0x4d7   : > { %v3206_v12 = vadd.f32 %v6546_v19, %v3205_v0  ;;  %v3207_v33 = vpop.f32.mrb[183].mxu0 }
 0x4d8   : > { %v3401_v0 = vpop.xlane.xlu0 %3400 }
 0x4d9   : > { %4849 = vtanh.f32 %v3206_v12  ;;  %v3513_v12 = vadd.f32 %v6691_v25, %v3397_v49 }
 0x4da   : > { %v4848_v43 = vpop.eup %4847 }
 0x4db   : > { %v3353_v63 = vmul.f32 %v4848_v43, %v6561_v57 }
 0x4dc   : > { %v6684_v4 = vpop.f32.mrb[184].mxu0 }
 0x4dd   : > { %v3212_v8 = vpop.f32.mrb[185].mxu0  ;;  %3474 = vadd.xlane.f32.xlu1 %v3353_v63 }
 0x4de   : > { %v3213_v13 = vpop.f32.mrb[186].mxu0 }
 0x4df   : > { %v3214_v16 = vadd.f32 %v6546_v19, %v3213_v13  ;;  %v3215_v36 = vpop.f32.mrb[187].mxu0 }
 0x4e0   : > { %v3405_v43 = vpop.xlane.xlu0 %3404 }
 0x4e1   : > { %4851 = vtanh.f32 %v3214_v16  ;;  %v3515_v16 = vadd.f32 %v6691_v25, %v3401_v0 }
 0x4e3   : > { %v4850_v2 = vpop.eup %4849 }
 0x4e4   : > { %v3355_v53 = vmul.f32 %v4850_v2, %v6561_v57 }
 0x4e5   : > { %v6687_v51 = vpop.f32.mrb[188].mxu0 }
 0x4e6   : > { %v3220_v52 = vpop.f32.mrb[189].mxu0  ;;  %3478 = vadd.xlane.f32.xlu1 %v3355_v53 }
 0x4e7   : > { %v3221_v26 = vpop.f32.mrb[190].mxu0 }
 0x4e8   : > { %v3222_v30 = vadd.f32 %v6546_v19, %v3221_v26  ;;  %v3223_v58 = vpop.f32.mrb[191].mxu0  ;;  %v3409_v13 = vpop.xlane.xlu0 %3408 }
 0x4ea   : > { %4853 = vtanh.f32 %v3222_v30  ;;  %v3517_v30 = vadd.f32 %v6691_v25, %v3405_v43 }
 0x4eb   : > { %v4852_v60 = vpop.eup %4851 }
 0x4ec   : > { %v3357_v22 = vmul.f32 %v4852_v60, %v6561_v57 }
 0x4ee   : > { %3482 = vadd.xlane.f32.xlu1 %v3357_v22 }
 0x4f0   : > { %3559 = vxpose.xlu0.b32.start [1/16] (narrow) %v3495_v35, 8  ;;  %v3413_v2 = vpop.xlane.xlu0 %3412 }
 0x4f4   : > { %v4854_v28 = vpop.eup %4853  ;;  %3560 = vxpose.xlu0.b32.cont [2/16] (narrow) %v3496_v41, 8  ;;  %v3179_v41 = vadd.f32 %v4868_v3, %v6666_v37  ;;  %v3195_v37 = vadd.f32 %v4868_v3, %v6675_v15  ;;  %v3211_v15 = vadd.f32 %v4868_v3, %v6684_v4 }
 0x4f5   : > { %v3359_v19 = vmul.f32 %v4854_v28, %v6561_v57  ;;  %v3375_v57 = vpop.xlane.xlu1 %3374  ;;  %v3519_v28 = vadd.f32 %v6691_v25, %v3409_v13 }
 0x4f6   : > { %v3502_v17 = vadd.f32 %v6691_v25, %v3375_v57  ;;  %4855 = vtanh.f32 %v3179_v41 }
 0x4f7   : > { %3486 = vadd.xlane.f32.xlu1 %v3359_v19 }
 0x4f8   : > { %3561 = vxpose.xlu0.b32.cont [3/16] (narrow) %v3497_v10, 8  ;;  %v3417_v26 = vpop.xlane.xlu0 %3416  ;;  %v3187_v10 = vadd.f32 %v4868_v3, %v6671_v55  ;;  %v3203_v55 = vadd.f32 %v4868_v3, %v6680_v9 }
 0x4f9   : > { %v3379_v46 = vpop.xlane.xlu1 %3378  ;;  %v3523_v11 = vadd.f32 %v6691_v25, %v3417_v26 }
 0x4fa   : > { %v3504_v38 = vadd.f32 %v6691_v25, %v3379_v46  ;;  %4857 = vtanh.f32 %v3187_v10 }
 0x4fb   : > { %4859 = vtanh.f32 %v3195_v37 }
 0x4fc   : > { %3562 = vxpose.xlu0.b32.cont [4/16] (narrow) %v3498_v39, 8  ;;  %4861 = vtanh.f32 %v3203_v55 }
 0x4fd   : > { %v3383_v24 = vpop.xlane.xlu1 %3382  ;;  %4863 = vtanh.f32 %v3211_v15 }
 0x4fe   : > { %v3506_v61 = vadd.f32 %v6691_v25, %v3383_v24 }
 0x500   : > { %3563 = vxpose.xlu0.b32.cont [5/16] (narrow) %v3499_v40, 8  ;;  %v3421_v60 = vpop.xlane.xlu0 %3420  ;;  %v3521_v40 = vadd.f32 %v6691_v25, %v3413_v2 }
 0x501   : > { %v3387_v48 = vpop.xlane.xlu1 %3386 }
 0x502   : > { %v3508_v14 = vadd.f32 %v6691_v25, %v3387_v48  ;;  %v3525_v48 = vadd.f32 %v6691_v25, %v3421_v60 }
 0x504   : > { %3564 = vxpose.xlu0.b32.cont [6/16] (narrow) %v3500_v34, 8 }
 0x505   : > { %v3391_v18 = vpop.xlane.xlu1 %3390 }
 0x506   : > { %v3510_v27 = vadd.f32 %v6691_v25, %v3391_v18 }
 0x508   : > { %3565 = vxpose.xlu0.b32.cont [7/16] (narrow) %v3501_v45, 8  ;;  %v6719_v35 = vpop.xlane.xlu0 %3424  ;;  %v4856_v45 = vpop.eup %4855 }
 0x509   : > { %v3395_v32 = vpop.xlane.xlu1 %3394 }
 0x50a   : > { %v3512_v31 = vadd.f32 %v6691_v25, %v3395_v32 }
 0x50c   : > { %3566 = vxpose.xlu0.b32.cont [8/16] (narrow) %v3502_v17, 8 }
 0x50d   : > { %v3399_v6 = vpop.xlane.xlu1 %3398 }
 0x50e   : > { %v3514_v63 = vadd.f32 %v6691_v25, %v3399_v6 }
 0x510   : > { %3567 = vxpose.xlu0.b32.cont [9/16] (narrow) %v3503_v47, 8  ;;  %v6728_v19 = vpop.xlane.xlu0 %3428  ;;  %v4869_v47 = vld [vmem:[%s6859_s9] ss:$0 sm:$0xff] }
 0x511   : > { %v3403_v33 = vpop.xlane.xlu1 %3402  ;;  %v3348_v46 = vmul.f32 %v4869_v47, %v4856_v45  ;;  %v3529_v2 = vadd.f32 %v6691_v25, %v6728_v19 }
 0x512   : > { %v3516_v53 = vadd.f32 %v6691_v25, %v3403_v33 }
 0x514   : > { %3568 = vxpose.xlu0.b32.cont [10/16] (narrow) %v3504_v38, 8  ;;  %v4858_v38 = vpop.eup %4857 }
 0x515   : > { %v3407_v8 = vpop.xlane.xlu1 %3406  ;;  %v4860_v4 = vpop.eup %4859 }
 0x516   : > { %v3518_v59 = vadd.f32 %v6691_v25, %v3407_v8  ;;  %v3352_v5 = vmul.f32 %v4869_v47, %v4860_v4 }
 0x518   : > { %3569 = vxpose.xlu0.b32.cont [11/16] (narrow) %v3505_v7, 8  ;;  %v6734_v20 = vpop.xlane.xlu0 %3432  ;;  %v3219_v7 = vadd.f32 %v4868_v3, %v6687_v51 }
 0x519   : > { %v3411_v36 = vpop.xlane.xlu1 %3410 }
 0x51a   : > { %v3520_v50 = vadd.f32 %v6691_v25, %v3411_v36  ;;  %4865 = vtanh.f32 %v3219_v7 }
 0x51c   : > { %3570 = vxpose.xlu0.b32.cont [12/16] (narrow) %v3506_v61, 8  ;;  %v3350_v61 = vmul.f32 %v4869_v47, %v4858_v38 }
 0x51d   : > { %v3415_v52 = vpop.xlane.xlu1 %3414 }
 0x51e   : > { %v3522_v1 = vadd.f32 %v6691_v25, %v3415_v52  ;;  %v3531_v52 = vadd.f32 %v6691_v25, %v6734_v20 }
 0x520   : > { %3571 = vxpose.xlu0.b32.cont [13/16] (narrow) %v3507_v54, 8  ;;  %v6740_v34 = vpop.xlane.xlu0 %3436 }
 0x521   : > { %v3419_v58 = vpop.xlane.xlu1 %3418 }
 0x522   : > { %v3524_v24 = vadd.f32 %v6691_v25, %v3419_v58 }
 0x524   : > { %3572 = vxpose.xlu0.b32.cont [14/16] (narrow) %v3508_v14, 8  ;;  %v4862_v14 = vpop.eup %4861 }
 0x525   : > { %v3423_v22 = vpop.xlane.xlu1 %3422  ;;  %v3354_v51 = vmul.f32 %v4869_v47, %v4862_v14 }
 0x528   : > { %3573 = vxpose.xlu0.b32.cont [15/16] (narrow) %v3509_v56, 8  ;;  %v6746_v17 = vpop.xlane.xlu0 %3440  ;;  %v3526_v56 = vadd.f32 %v6691_v25, %v3423_v22 }
 0x529   : > { %v6726_v44 = vpop.xlane.xlu1 %3426  ;;  %v3535_v60 = vadd.f32 %v6691_v25, %v6746_v17 }
 0x52a   : > { %3591 = vxpose.xlu1.b32.start [1/16] (narrow) %v3511_v42, 8  ;;  %v4864_v42 = vpop.eup %4863  ;;  %v3528_v36 = vadd.f32 %v6691_v25, %v6726_v44 }
 0x52b   : > { %v4866_v6 = vpop.eup %4865 }
 0x52c   : > { %3574 = vxpose.xlu0.b32.end [16/16] (narrow) %v3510_v27, 8  ;;  %v3358_v33 = vmul.f32 %v4869_v47, %v4866_v6 }
 0x52d   : > { %v6732_v39 = vpop.xlane.xlu1 %3430 }
 0x52e   : > { %3592 = vxpose.xlu1.b32.cont [2/16] (narrow) %v3512_v31, 8  ;;  %v3356_v31 = vmul.f32 %v4869_v47, %v4864_v42 }
 0x530   : > { %v6753_v62 = vpop.xlane.xlu0 %3444 }
 0x531   : > { %v6738_v23 = vpop.xlane.xlu1 %3434  ;;  %v3537_v22 = vadd.f32 %v6691_v25, %v6753_v62 }
 0x532   : > { %3593 = vxpose.xlu1.b32.cont [3/16] (narrow) %v3513_v12, 8  ;;  %v3532_v26 = vadd.f32 %v6691_v25, %v6738_v23 }
 0x535   : > { %v6744_v57 = vpop.xlane.xlu1 %3438 }
 0x536   : > { %3594 = vxpose.xlu1.b32.cont [4/16] (narrow) %v3514_v63, 8  ;;  %v3534_v58 = vadd.f32 %v6691_v25, %v6744_v57 }
 0x538   : > { %v3449_v54 = vpop.xlane.xlu0 %3448 }
 0x539   : > { %v3443_v9 = vpop.xlane.xlu1 %3442  ;;  %v3539_v3 = vadd.f32 %v6691_v25, %v3449_v54 }
 0x53a   : > { %3595 = vxpose.xlu1.b32.cont [5/16] (narrow) %v3515_v16, 8  ;;  %v3527_v16 = vadd.f32 %v6691_v25, %v6719_v35 }
 0x53d   : > { %v3447_v29 = vpop.xlane.xlu1 %3446 }
 0x53e   : > { %3596 = vxpose.xlu1.b32.cont [6/16] (narrow) %v3516_v53, 8  ;;  %v3530_v53 = vadd.f32 %v6691_v25, %v6732_v39  ;;  %v3538_v35 = vadd.f32 %v6691_v25, %v3447_v29  ;;  %v4936_v29 = vmov 1966171168  }
 0x53f   : > { %v3694_v54 = vunpack.c.l.s4 %v4936_v29 }
 0x540   : > { %v3453_v21 = vpop.xlane.xlu0 %3452 }
 0x541   : > { %v3451_v18 = vpop.xlane.xlu1 %3450 }
 0x542   : > { %3597 = vxpose.xlu1.b32.cont [7/16] (narrow) %v3517_v30, 8  ;;  %v3533_v30 = vadd.f32 %v6691_v25, %v6740_v34  ;;  %v3540_v41 = vadd.f32 %v6691_v25, %v3451_v18  ;;  %v6907_v18 = vld [vmem:[#allocation6_spill] sm:$0xff] }
 0x545   : > { %v3455_v32 = vpop.xlane.xlu1 %3454 }
 0x546   : > { %3598 = vxpose.xlu1.b32.cont [8/16] (narrow) %v3518_v59, 8  ;;  %v3536_v59 = vadd.f32 %v6691_v25, %v3443_v9  ;;  %v3542_v44 = vadd.f32 %v6691_v25, %v3455_v32 }
 0x548   : > { %v3457_v49 = vpop.xlane.xlu0 %3456 }
 0x549   : > { %v3543_v27 = vadd.f32 %v6691_v25, %v3457_v49 }
 0x54a   : > { %3599 = vxpose.xlu1.b32.cont [9/16] (narrow) %v3519_v28, 8  ;;  %v3459_v0 = vpop.xlane.xlu1 %3458  ;;  %v3541_v28 = vadd.f32 %v6691_v25, %v3453_v21 }
 0x54b   : > { %v3544_v12 = vadd.f32 %v6691_v25, %v3459_v0 }
 0x54e   : > { %3600 = vxpose.xlu1.b32.cont [10/16] (narrow) %v3520_v50, 8 }
 0x550   : > { %v3461_v43 = vpop.xlane.xlu0 %3460 }
 0x551   : > { %v3545_v63 = vadd.f32 %v6691_v25, %v3461_v43 }
 0x552   : > { %3601 = vxpose.xlu1.b32.cont [11/16] (narrow) %v3521_v40, 8  ;;  %v3463_v8 = vpop.xlane.xlu1 %3462 }
 0x553   : > { %v3546_v13 = vadd.f32 %v6691_v25, %v3463_v8 }
 0x556   : > { %3602 = vxpose.xlu1.b32.cont [12/16] (narrow) %v3522_v1, 8 }
 0x559   : > { %3464 = vadd.xlane.f32.xlu0 %v3348_v46 }
 0x55a   : > { %3603 = vxpose.xlu1.b32.cont [13/16] (narrow) %v3523_v11, 8  ;;  %v3467_v39 = vpop.xlane.xlu1 %3466 }
 0x55b   : > { %v3548_v20 = vadd.f32 %v6691_v25, %v3467_v39 }
 0x55d   : > { %3468 = vadd.xlane.f32.xlu0 %v3350_v61 }
 0x55e   : > { %3604 = vxpose.xlu1.b32.cont [14/16] (narrow) %v3524_v24, 8 }
 0x561   : > { %3472 = vadd.xlane.f32.xlu0 %v3352_v5 }
 0x562   : > { %3605 = vxpose.xlu1.b32.cont [15/16] (narrow) %v3525_v48, 8  ;;  %v3471_v23 = vpop.xlane.xlu1 %3470  ;;  %v3695_v48 = vunpack.c.0.s8 %v3694_v54 }
 0x563   : > { %v3550_v34 = vadd.f32 %v6691_v25, %v3471_v23 }
 0x564   : > { %v3698_v21 = vsub.s32 %v3695_v48, %v6907_v18 }
 0x565   : > { %3476 = vadd.xlane.f32.xlu0 %v3354_v51 }
 0x566   : > { %3606 = vxpose.xlu1.b32.end [16/16] (narrow) %v3526_v56, 8 }
 0x569   : > { %3480 = vadd.xlane.f32.xlu0 %v3356_v31 }
 0x56a   : > { %3655 = vxpose.xlu1.b32.start [1/16] (narrow) %v3543_v27, 8  ;;  %v3475_v45 = vpop.xlane.xlu1 %3474  ;;  %v6908_v27 = vlaneseq }
 0x56b   : > { %v3552_v57 = vadd.f32 %v6691_v25, %v3475_v45 }
 0x56c   : > { %vm3718_vm0 = vcmp.lt.s32.totalorder %v6908_v27, 512 }
 0x56d   : > { %3484 = vadd.xlane.f32.xlu0 %v3358_v33 }
 0x56e   : > { %3656 = vxpose.xlu1.b32.cont [2/16] (narrow) %v3544_v12, 8 }
 0x570   : > { %v3575_v19 = vpop.trf.xlu0 }
 0x572   : > { %3657 = vxpose.xlu1.b32.cont [3/16] (narrow) %v3545_v63, 8 }
 0x573   : > { %v3479_v11 = vpop.xlane.xlu1 %3478 }
 0x574   : > { %v3554_v47 = vadd.f32 %v6691_v25, %v3479_v11 }
 0x576   : > { %3658 = vxpose.xlu1.b32.cont [4/16] (narrow) %v3546_v13, 8 }
 0x57b   : > { %v3483_v9 = vpop.xlane.xlu1 %3482 }
 0x57c   : > { %v3556_v62 = vadd.f32 %v6691_v25, %v3483_v9 }
 0x584   : > { %v3487_v61 = vpop.xlane.xlu1 %3486 }
 0x585   : > { %v3558_v4 = vadd.f32 %v6691_v25, %v3487_v61 }
 0x59a   : > { %3623 = vxpose.xlu0.b32.start [1/16] (narrow) %v3527_v16, 8 }
 0x59e   : > { %3624 = vxpose.xlu0.b32.cont [2/16] (narrow) %v3528_v36, 8 }
 0x5a2   : > { %3625 = vxpose.xlu0.b32.cont [3/16] (narrow) %v3529_v2, 8 }
 0x5a6   : > { %3626 = vxpose.xlu0.b32.cont [4/16] (narrow) %v3530_v53, 8 }
 0x5aa   : > { %3627 = vxpose.xlu0.b32.cont [5/16] (narrow) %v3531_v52, 8  ;;  %v3607_v5 = vpop.trf.xlu1 }
 0x5ab   : > { %v3691_v56 = vcombine.low %v3575_v19, %v3607_v5 }
 0x5ad   : > { %v3699_v32 = vrot.slane %v3691_v56, %v3698_v21 }
 0x5ae   : > { %3628 = vxpose.xlu0.b32.cont [6/16] (narrow) %v3532_v26, 8 }
 0x5b2   : > { %3629 = vxpose.xlu0.b32.cont [7/16] (narrow) %v3533_v30, 8 }
 0x5b6   : > { %3630 = vxpose.xlu0.b32.cont [8/16] (narrow) %v3534_v58, 8 }
 0x5ba   : > { %3631 = vxpose.xlu0.b32.cont [9/16] (narrow) %v3535_v60, 8 }
 0x5be   : > { %3632 = vxpose.xlu0.b32.cont [10/16] (narrow) %v3536_v59, 8 }
 0x5c2   : > { %3633 = vxpose.xlu0.b32.cont [11/16] (narrow) %v3537_v22, 8 }
 0x5c6   : > { %3634 = vxpose.xlu0.b32.cont [12/16] (narrow) %v3538_v35, 8 }
 0x5ca   : > { %3635 = vxpose.xlu0.b32.cont [13/16] (narrow) %v3539_v3, 8 }
 0x5ce   : > { %3636 = vxpose.xlu0.b32.cont [14/16] (narrow) %v3540_v41, 8 }
 0x5d2   : > { %3637 = vxpose.xlu0.b32.cont [15/16] (narrow) %v3541_v28, 8 }
 0x5d6   : > { %3638 = vxpose.xlu0.b32.end [16/16] (narrow) %v3542_v44, 8 }
 0x5e6   : > { %v3465_v10 = vpop.xlane.xlu0 %3464 }
 0x5e7   : > { %v3547_v50 = vadd.f32 %v6691_v25, %v3465_v10 }
 0x5e9   : > { %3659 = vxpose.xlu1.b32.cont [5/16] (narrow) %v3547_v50, 8 }
 0x5ea   : > { %v3469_v37 = vpop.xlane.xlu0 %3468 }
 0x5eb   : > { %v3549_v40 = vadd.f32 %v6691_v25, %v3469_v37 }
 0x5ed   : > { %3660 = vxpose.xlu1.b32.cont [6/16] (narrow) %v3548_v20, 8 }
 0x5ee   : > { %v3473_v55 = vpop.xlane.xlu0 %3472 }
 0x5ef   : > { %v3551_v1 = vadd.f32 %v6691_v25, %v3473_v55 }
 0x5f1   : > { %3661 = vxpose.xlu1.b32.cont [7/16] (narrow) %v3549_v40, 8 }
 0x5f2   : > { %v3477_v17 = vpop.xlane.xlu0 %3476 }
 0x5f3   : > { %v3553_v15 = vadd.f32 %v6691_v25, %v3477_v17 }
 0x5f5   : > { %3662 = vxpose.xlu1.b32.cont [8/16] (narrow) %v3550_v34, 8 }
 0x5f6   : > { %v3481_v46 = vpop.xlane.xlu0 %3480 }
 0x5f7   : > { %v3555_v38 = vadd.f32 %v6691_v25, %v3481_v46 }
 0x5f9   : > { %3663 = vxpose.xlu1.b32.cont [9/16] (narrow) %v3551_v1, 8 }
 0x5fa   : > { %v3485_v7 = vpop.xlane.xlu0 %3484 }
 0x5fb   : > { %v3557_v24 = vadd.f32 %v6691_v25, %v3485_v7 }
 0x5fd   : > { %3664 = vxpose.xlu1.b32.cont [10/16] (narrow) %v3552_v57, 8 }
 0x601   : > { %3665 = vxpose.xlu1.b32.cont [11/16] (narrow) %v3553_v15, 8 }
 0x605   : > { %3666 = vxpose.xlu1.b32.cont [12/16] (narrow) %v3554_v47, 8 }
 0x609   : > { %3667 = vxpose.xlu1.b32.cont [13/16] (narrow) %v3555_v38, 8 }
 0x60d   : > { %3668 = vxpose.xlu1.b32.cont [14/16] (narrow) %v3556_v62, 8 }
 0x611   : > { %3669 = vxpose.xlu1.b32.cont [15/16] (narrow) %v3557_v24, 8 }
 0x615   : > { %3670 = vxpose.xlu1.b32.end [16/16] (narrow) %v3558_v4, 8 }
 0x61a   : > { %v3639_v14 = vpop.trf.xlu0 }
 0x659   : > { %v3671_v51 = vpop.trf.xlu1 }
 0x65a   : > { %v3692_v42 = vcombine.low %v3639_v14, %v3671_v51 }
 0x65c   : > { %v3706_v49 = vrot.slane %v3692_v42, %v3698_v21 }
 0x65e   : > { %v3707_v25 = vcombine.low %v3699_v32, %v3706_v49 }
 0x660   : > { %v3714_v31 = vrot.slane %v3707_v25, %v3698_v21 }
 0x662   : > { %3720 = vst.msk [vmem:[%s382_s18] sm:$0xf] %vm3718_vm0, %v3714_v31 }
 0x663   : > { %4883 = shalt.err (!%p4880_p3)
}
 0x664   : > { %s4884_s30 = scalar_lea.hbm %s6808_s12, 64  ;;  %s4888_s25 = scalar_lea.hbm %s6861_s11, 128 }
 0x665   : > { %p4885_p4 = scmp.ne.s32.totalorder %s6808_s12, %s4884_s30  ;;  %p4889_p9 = scmp.lt.u32.totalorder %s6808_s12, %s6861_s11 }
 0x666   : > { %p4890_p10 = scmp.lt.u32.totalorder %s4888_s25, %s4884_s30  ;;  %p4892_p12 = scmp.lt.u32.totalorder %s4884_s30, %s6808_s12 }
 0x667   : > { %p4886_p7 = pnand %p4885_p4, %p5036_p5 }
 0x668   : > { %p4891_p11 = por %p4890_p10, %p4889_p9 }
 0x669   : > { %p4887_p8 = pneg %p4886_p7 }
 0x66a   : > { %p4893_p13 = por %p4892_p12, %p4891_p11 }
 0x66c   : > { %p4894_p0 = pnand %p4893_p13, %p4887_p8 }
 0x66e   : > { %4897 = shalt.err (!%p4894_p0)
}
 0x66f   : > { %3892 = dma.vmem_to_hbm [thread:$0]  (%p5036_p5), %s6810_s10, 64, %s6808_s12, %s3722_s13  }
 0x670 PF: > { %p3898_p1 = scmp.ge.s32.totalorder %s4932_s22, 2  ;;  %s3748_s23 = sand.u32 1, %s4920_s19  }
 0x671   : > { %s3749_s15 = scalar_lea.sflag [#allocation4], %s3748_s23 }
 0x672   : > { %p3895_p2 = pnand %p3898_p1, %p5040_p6 }
 0x674   : > { %4915 = dma.done.wait (!%p3895_p2), %s3749_s15, 64  }
 0x675   : > { %4917 = vsyncadd (!%p3895_p2), %s3749_s15, 4294967232  ;;  %p23_p3 = scmp.ge.s32.totalorder %s5024_s24, 4   ;;  %s6909_s19 = smov %s4924_s20 }
 0x676   : > { %s6910_s20 = smov %s4928_s21  ;;  %s6911_s21 = smov %s5034_s27 }
 0x677   : > { %s6912_s22 = smov %s5024_s24  ;;  %25 = sbr.rel (!%p23_p3) target bundleno = 6 (0x6), region = 99 }
 0x67e   :  { %3754 = vsyncpa [#allocation4], 1 }
 0x67f   :  { %3756 = vsyncpa [#allocation4 + $0x1], 1 }

</bundles_post_ra>
